<compile_context>
chip_gen: v7x
topology: tpu7x:2x2x1
jax: 0.10.0
libtpu: 0.0.40
codegen_flags: <defaults>
</compile_context>

<pallas_src>
import jax
import jax.numpy as jnp
from jax.experimental import pallas as pl
from jax.experimental.pallas import tpu as pltpu

EFFNET_B2_FEAT_CH = 1408   # output channels of EfficientNet-b2 extract_features
NUM_FEATURES = 18          # nn.Linear(1408, num_features=18)

_LANE = 128
_FEAT_BUF_CAP_BYTES = 8 * 1024 * 1024   # per-buffer cap; v5e-safe when double-buffered


def _head_kernel(feat_ref, w_ref, b_ref, out_ref):
    """Fused global-avg-pool + dense head, accumulating into the output block.

    feat_ref: (bn, tc, HW)  NCHW feature chunk -- HW on lanes, channels on sublanes
    w_ref:    (tc, Fp)      matching chunk of W^T (out-features zero-padded to 128)
    b_ref:    (1, Fp)       zero-padded bias
    out_ref:  (bn, Fp)      f32; output-resident accumulator across the channel axis
    """
    k = pl.program_id(1)

    @pl.when(k == 0)
    def _():
        # Fold the bias into the accumulator init (Dropout2d is identity in eval mode).
        out_ref[...] = jnp.broadcast_to(b_ref[...], out_ref.shape)

    hw = feat_ref.shape[-1]
    # AdaptiveAvgPool2d(1): reduce over the spatial (lane) axis for this channel chunk.
    # Keep the spatial-sum accumulation in f32 even if features stream in as bf16.
    pooled = jnp.sum(feat_ref[...].astype(jnp.float32), axis=-1) * (1.0 / hw)  # (bn, tc)
    # Partial contribution to the Linear layer (MXU matmul, f32 accumulation).
    out_ref[...] += jnp.dot(pooled, w_ref[...].astype(jnp.float32),
                            preferred_element_type=jnp.float32)


def _choose_channel_tile(C, HW, itemsize, cap):
    # Largest divisor of C (multiple of 8, or C itself) whose single-row feature block
    # fits the per-buffer VMEM cap. For realistic shapes this collapses to tc == C.
    divs = [d for d in range(C, 0, -1) if C % d == 0 and (d % 8 == 0 or d == C)]
    for d in divs:
        if d * HW * itemsize <= cap:
            return d
    return divs[-1]


def _choose_batch_tile(N, tc, HW, itemsize, cap):
    # Batch tile for the 'parallel' grid axis (megacore on v7x). The output block's
    # sublane dim is bn, so bn must be a multiple of 8 or the whole batch.
    cands = [bn for bn in range(N, 0, -1)
             if N % bn == 0 and (bn % 8 == 0 or bn == N)]
    fitting = [bn for bn in cands if bn * tc * HW * itemsize <= cap]
    if not fitting:
        return cands[-1]
    multi = [bn for bn in fitting if N // bn >= 2]   # prefer >=2 blocks for 2 TCs
    return multi[0] if multi else fitting[0]


def custom_efficientnet_head(features_nchw, weight, bias):
    """features_nchw: (N, C=1408, Hf, Wf)  output of extract_features (f32 or bf16)
    weight:           (F, C)  PyTorch nn.Linear layout (out_features x in_features)
    bias:             (F,)
    returns:          (N, F)  float32
    """
    N, C, H, W = features_nchw.shape
    F = weight.shape[0]
    HW = H * W
    itemsize = jnp.dtype(features_nchw.dtype).itemsize

    # NCHW -> (N, C, HW): contiguous reshape, no HBM transpose pass.
    feats = features_nchw.reshape(N, C, HW)

    # Pad out_features to a full 128-lane width: lane-dense weight/bias/output tiles.
    Fp = max(_LANE, ((F + _LANE - 1) // _LANE) * _LANE)
    w_t = jnp.zeros((C, Fp), jnp.float32).at[:, :F].set(weight.T.astype(jnp.float32))
    b_p = jnp.zeros((1, Fp), jnp.float32).at[0, :F].set(bias.astype(jnp.float32))

    tc = _choose_channel_tile(C, HW, itemsize, _FEAT_BUF_CAP_BYTES)
    bn = _choose_batch_tile(N, tc, HW, itemsize, _FEAT_BUF_CAP_BYTES)
    grid = (N // bn, C // tc)   # (parallel batch, arbitrary channel-reduction last)

    cost = pl.CostEstimate(
        flops=2 * N * C * HW + 2 * N * C * Fp,
        transcendentals=0,
        bytes_accessed=(feats.size * itemsize
                        + w_t.size * 4 + b_p.size * 4 + N * Fp * 4),
    )

    out_padded = pl.pallas_call(
        _head_kernel,
        out_shape=jax.ShapeDtypeStruct((N, Fp), jnp.float32),
        grid_spec=pltpu.PrefetchScalarGridSpec(
            num_scalar_prefetch=0,
            grid=grid,
            in_specs=[
                pl.BlockSpec((bn, tc, HW), lambda b, k: (b, k, 0)),
                pl.BlockSpec((tc, Fp), lambda b, k: (k, 0)),
                pl.BlockSpec((1, Fp), lambda b, k: (0, 0)),
            ],
            out_specs=pl.BlockSpec((bn, Fp), lambda b, k: (b, 0)),
        ),
        compiler_params=pltpu.CompilerParams(
            dimension_semantics=("parallel", "arbitrary"),
            vmem_limit_bytes=32 * 1024 * 1024,
        ),
        cost_estimate=cost,
    )(feats, w_t, b_p)

    return out_padded[:, :F]


if __name__ == "__main__":
    key = jax.random.PRNGKey(0)
    k_feat, k_w, k_b = jax.random.split(key, 3)

    # Small deterministic stand-in for extract_features output: for a 64x64 image,
    # EfficientNet-b2 features are (N, 1408, 2, 2).
    N, C, Hf, Wf = 2, EFFNET_B2_FEAT_CH, 2, 2
    features = jax.random.normal(k_feat, (N, C, Hf, Wf), dtype=jnp.float32)

    # nn.Linear(1408, 18) default init: U(-1/sqrt(in), 1/sqrt(in)), deterministic here.
    bound = 1.0 / (C ** 0.5)
    weight = jax.random.uniform(k_w, (NUM_FEATURES, C), jnp.float32, -bound, bound)
    bias = jax.random.uniform(k_b, (NUM_FEATURES,), jnp.float32, -bound, bound)

    out = custom_efficientnet_head(features, weight, bias)
    out = jax.block_until_ready(out)

    # Pure-JAX reference of the module's forward (eval-mode dropout = identity).
    pooled_ref = jnp.mean(features, axis=(2, 3))             # (N, C)
    out_ref = pooled_ref @ weight.T + bias                    # (N, F)

    assert out.shape == (N, NUM_FEATURES)
    assert jnp.allclose(out, out_ref, atol=1e-4, rtol=1e-4), "mismatch vs reference"
    print("KERNEL_OK")
</pallas_src>

<mosaic_0001>
module attributes {stable_mosaic.version = 11 : i64} {
  func.func @_head_kernel(%arg0: i32, %arg1: i32, %arg2: memref<2x1408x4xf32, #tpu.memory_space<vmem>>, %arg3: memref<1408x128xf32, #tpu.memory_space<vmem>>, %arg4: memref<1x128xf32, #tpu.memory_space<vmem>>, %arg5: memref<2x128xf32, #tpu.memory_space<vmem>>) attributes {dimension_semantics = [#tpu.dimension_semantics<parallel>, #tpu.dimension_semantics<arbitrary>], iteration_bounds = array<i64: 1, 1>, scalar_prefetch = 0 : i64, scratch_operands = 0 : i64, tpu.core_type = #tpu.core_type<tc>, window_params = [{transform_indices = @transform_0, window_bounds = array<i64: 2, 1408, 4>}, {transform_indices = @transform_1, window_bounds = array<i64: 1408, 128>}, {pipeline_mode = #tpu.pipeline_mode<synchronous>, transform_indices = @transform_2, window_bounds = array<i64: 1, 128>}, {transform_indices = @transform_3, window_bounds = array<i64: 2, 128>}]} {
    %c0_i32 = arith.constant 0 : i32
    %0 = arith.cmpi eq, %arg1, %c0_i32 : i32
    %1 = arith.extui %0 : i1 to i32
    %c0_i32_0 = arith.constant 0 : i32
    %2 = arith.cmpi ne, %1, %c0_i32_0 : i32
    scf.if %2 {
      %c0_11 = arith.constant 0 : index
      %c0_12 = arith.constant 0 : index
      %12 = vector.load %arg4[%c0_11, %c0_12] : memref<1x128xf32, #tpu.memory_space<vmem>>, vector<1x128xf32>
      %13 = vector.shape_cast %12 : vector<1x128xf32> to vector<1x128xf32>
      %14 = vector.broadcast %13 : vector<1x128xf32> to vector<2x128xf32>
      %c0_13 = arith.constant 0 : index
      %c0_14 = arith.constant 0 : index
      %15 = vector.load %arg5[%c0_13, %c0_14] : memref<2x128xf32, #tpu.memory_space<vmem>>, vector<2x128xf32>
      tpu.vector_store %arg5[%c0_13, %c0_14], %14 {strides = array<i32>} : memref<2x128xf32, #tpu.memory_space<vmem>>, vector<2x128xf32>,
    } else {
    }
    %c0 = arith.constant 0 : index
    %c0_1 = arith.constant 0 : index
    %c0_2 = arith.constant 0 : index
    %3 = vector.load %arg2[%c0, %c0_1, %c0_2] : memref<2x1408x4xf32, #tpu.memory_space<vmem>>, vector<2x1408x4xf32>
    %cst = arith.constant dense<0.000000e+00> : vector<2x1408xf32>
    %4 = vector.multi_reduction <add>, %3, %cst [2] : vector<2x1408x4xf32> to vector<2x1408xf32>
    %cst_3 = arith.constant 2.500000e-01 : f32
    %5 = vector.broadcast %cst_3 : f32 to vector<2x1408xf32>
    %6 = arith.mulf %4, %5 : vector<2x1408xf32>
    %c0_4 = arith.constant 0 : index
    %c0_5 = arith.constant 0 : index
    %7 = vector.load %arg5[%c0_4, %c0_5] : memref<2x128xf32, #tpu.memory_space<vmem>>, vector<2x128xf32>
    %c0_6 = arith.constant 0 : index
    %c0_7 = arith.constant 0 : index
    %8 = vector.load %arg3[%c0_6, %c0_7] : memref<1408x128xf32, #tpu.memory_space<vmem>>, vector<1408x128xf32>
    %cst_8 = arith.constant dense<0.000000e+00> : vector<2x128xf32>
    %9 = tpu.matmul %6, %8, %cst_8 {dimension_numbers = #tpu.dot_dimension_numbers<[1], [0], [0], [1], [0, 0, 1, 1], [], []>} : vector<2x1408xf32>, vector<1408x128xf32>, vector<2x128xf32> -> vector<2x128xf32>
    %10 = arith.addf %7, %9 : vector<2x128xf32>
    %c0_9 = arith.constant 0 : index
    %c0_10 = arith.constant 0 : index
    %11 = vector.load %arg5[%c0_9, %c0_10] : memref<2x128xf32, #tpu.memory_space<vmem>>, vector<2x128xf32>
    tpu.vector_store %arg5[%c0_9, %c0_10], %10 {strides = array<i32>} : memref<2x128xf32, #tpu.memory_space<vmem>>, vector<2x128xf32>,
    return
  }
  func.func @transform_0(%arg0: i32, %arg1: i32) -> (i32, i32, i32) {
    %c0_i32 = arith.constant 0 : i32
    %c0_i32_0 = arith.constant 0 : i32
    return %arg0, %arg1, %c0_i32 : i32, i32, i32
  }
  func.func @transform_1(%arg0: i32, %arg1: i32) -> (i32, i32) {
    %c0_i32 = arith.constant 0 : i32
    %c0_i32_0 = arith.constant 0 : i32
    return %arg1, %c0_i32 : i32, i32
  }
  func.func @transform_2(%arg0: i32, %arg1: i32) -> (i32, i32) {
    %c0_i32 = arith.constant 0 : i32
    %c0_i32_0 = arith.constant 0 : i32
    %c0_i32_1 = arith.constant 0 : i32
    return %c0_i32, %c0_i32_0 : i32, i32
  }
  func.func @transform_3(%arg0: i32, %arg1: i32) -> (i32, i32) {
    %c0_i32 = arith.constant 0 : i32
    %c0_i32_0 = arith.constant 0 : i32
    return %arg0, %c0_i32 : i32, i32
  }
}

</mosaic_0001>

<bundles_post_ra>
// kernel: tpu_custom_call.1
= control target key start
LH: loop header
LB: loop body
LE: loop exit
PB: predicated region body
PF: predicated region fallthrough
CT: control target
= control target key end

     0   :  { %vm379_vm0 = vcmask 31744   ;;  %s8012_s0 = inlined_call_operand.vmem [shape: f32[2,1408,4], index: 0, kind: input, shape index: {}]   ;;  %s8013_s1 = inlined_call_operand.vmem [shape: f32[1408,128], index: 1, kind: input, shape index: {}]   ;;  %s8014_s2 = inlined_call_operand.vmem [shape: f32[1,128], index: 2, kind: input, shape index: {}]   ;;  %s8015_s3 = inlined_call_operand.hbm [shape: f32[2,128], index: 3, kind: output, shape index: {}]  }
   0x1   :  { %v29_v0 = vld [vmem:[%s8012_s0 + $0x10] sm:$0xff]  ;;  %v27_v1 = vld [vmem:[%s8012_s0] sm:$0xff]  ;;  %v30_v2 = vld [vmem:[%s8012_s0 + $0x18] sm:$0xff] }
   0x2   :  { %v386_v3 = vsel %vm379_vm0, %v29_v0, 0.0  ;;  %v380_v4 = vsel %vm379_vm0, %v27_v1, 0.0  ;;  %v28_v5 = vld [vmem:[%s8012_s0 + $0x8] sm:$0xff]  ;;  %v389_v6 = vsel %vm379_vm0, %v30_v2, 0.0  ;;  %v31_v9 = vld [vmem:[%s8012_s0 + $0x20] sm:$0xff]  ;;  %v34_v12 = vld [vmem:[%s8012_s0 + $0x38] sm:$0xff] }
   0x3   :  { %387 = vadd.xlane.f32.xlu1 %v386_v3  ;;  %381 = vadd.xlane.f32.xlu0 %v380_v4  ;;  %v383_v7 = vsel %vm379_vm0, %v28_v5, 0.0  ;;  %v32_v8 = vld [vmem:[%s8012_s0 + $0x28] sm:$0xff]  ;;  %v392_v11 = vsel %vm379_vm0, %v31_v9, 0.0  ;;  %v33_v13 = vld [vmem:[%s8012_s0 + $0x30] sm:$0xff]  ;;  %v401_v14 = vsel %vm379_vm0, %v34_v12, 0.0  ;;  %v35_v17 = vld [vmem:[%s8012_s0 + $0x40] sm:$0xff] }
   0x4   :  { %v395_v10 = vsel %vm379_vm0, %v32_v8, 0.0  ;;  %v398_v15 = vsel %vm379_vm0, %v33_v13, 0.0  ;;  %v36_v16 = vld [vmem:[%s8012_s0 + $0x48] sm:$0xff]  ;;  %v404_v19 = vsel %vm379_vm0, %v35_v17, 0.0  ;;  %v38_v20 = vld [vmem:[%s8012_s0 + $0x58] sm:$0xff]  ;;  %v37_v21 = vld [vmem:[%s8012_s0 + $0x50] sm:$0xff] }
   0x5   :  { %v407_v18 = vsel %vm379_vm0, %v36_v16, 0.0  ;;  %v413_v22 = vsel %vm379_vm0, %v38_v20, 0.0  ;;  %v410_v23 = vsel %vm379_vm0, %v37_v21, 0.0  ;;  %v40_v24 = vld [vmem:[%s8012_s0 + $0x68] sm:$0xff]  ;;  %v39_v25 = vld [vmem:[%s8012_s0 + $0x60] sm:$0xff]  ;;  %v42_v28 = vld [vmem:[%s8012_s0 + $0x78] sm:$0xff] }
   0x6   :  { %v419_v26 = vsel %vm379_vm0, %v40_v24, 0.0  ;;  %v416_v27 = vsel %vm379_vm0, %v39_v25, 0.0  ;;  %v41_v29 = vld [vmem:[%s8012_s0 + $0x70] sm:$0xff]  ;;  %v425_v30 = vsel %vm379_vm0, %v42_v28, 0.0 }
   0x7   :  { %390 = vadd.xlane.f32.xlu1 %v389_v6  ;;  %384 = vadd.xlane.f32.xlu0 %v383_v7  ;;  %v422_v31 = vsel %vm379_vm0, %v41_v29, 0.0 }
   0xb   :  { %396 = vadd.xlane.f32.xlu1 %v395_v10  ;;  %393 = vadd.xlane.f32.xlu0 %v392_v11 }
   0xf   :  { %402 = vadd.xlane.f32.xlu1 %v401_v14  ;;  %399 = vadd.xlane.f32.xlu0 %v398_v15 }
  0x13   :  { %408 = vadd.xlane.f32.xlu1 %v407_v18  ;;  %405 = vadd.xlane.f32.xlu0 %v404_v19 }
  0x17   :  { %414 = vadd.xlane.f32.xlu1 %v413_v22  ;;  %411 = vadd.xlane.f32.xlu0 %v410_v23 }
  0x1b   :  { %420 = vadd.xlane.f32.xlu1 %v419_v26  ;;  %417 = vadd.xlane.f32.xlu0 %v416_v27 }
  0x1c   :  { %8 = vsyncpa [#allocation3], 0  ;;  %v44_v32 = vld [vmem:[%s8012_s0 + $0x88] sm:$0xff]  ;;  %v43_v33 = vld [vmem:[%s8012_s0 + $0x80] sm:$0xff]  ;;  %vm2328_vm1 = vcmask 130112   ;;  %vm2335_vm2 = vcmask 195712  }
  0x1d   :  { %v431_v34 = vsel %vm379_vm0, %v44_v32, 0.0  ;;  %v428_v35 = vsel %vm379_vm0, %v43_v33, 0.0  ;;  %v46_v36 = vld [vmem:[%s8012_s0 + $0x98] sm:$0xff]  ;;  %v45_v37 = vld [vmem:[%s8012_s0 + $0x90] sm:$0xff]  ;;  %v48_v40 = vld [vmem:[%s8012_s0 + $0xa8] sm:$0xff]  ;;  %vm8024_vm3 = vcmask 261312  }
  0x1e   :  { %v437_v38 = vsel %vm379_vm0, %v46_v36, 0.0  ;;  %v434_v39 = vsel %vm379_vm0, %v45_v37, 0.0  ;;  %v47_v41 = vld [vmem:[%s8012_s0 + $0xa0] sm:$0xff]  ;;  %v443_v42 = vsel %vm379_vm0, %v48_v40, 0.0  ;;  %v50_v44 = vld [vmem:[%s8012_s0 + $0xb8] sm:$0xff]  ;;  %v49_v45 = vld [vmem:[%s8012_s0 + $0xb0] sm:$0xff] }
  0x1f   :  { %426 = vadd.xlane.f32.xlu1 %v425_v30  ;;  %423 = vadd.xlane.f32.xlu0 %v422_v31  ;;  %v440_v43 = vsel %vm379_vm0, %v47_v41, 0.0  ;;  %v449_v46 = vsel %vm379_vm0, %v50_v44, 0.0  ;;  %v446_v47 = vsel %vm379_vm0, %v49_v45, 0.0  ;;  %v52_v48 = vld [vmem:[%s8012_s0 + $0xc8] sm:$0xff]  ;;  %v51_v49 = vld [vmem:[%s8012_s0 + $0xc0] sm:$0xff]  ;;  %v54_v52 = vld [vmem:[%s8012_s0 + $0xd8] sm:$0xff] }
  0x20   :  { %v455_v50 = vsel %vm379_vm0, %v52_v48, 0.0  ;;  %v452_v51 = vsel %vm379_vm0, %v51_v49, 0.0  ;;  %v53_v53 = vld [vmem:[%s8012_s0 + $0xd0] sm:$0xff]  ;;  %v461_v54 = vsel %vm379_vm0, %v54_v52, 0.0  ;;  %v56_v56 = vld [vmem:[%s8012_s0 + $0xe8] sm:$0xff]  ;;  %v55_v57 = vld [vmem:[%s8012_s0 + $0xe0] sm:$0xff] }
  0x21   :  { %v458_v55 = vsel %vm379_vm0, %v53_v53, 0.0  ;;  %v467_v58 = vsel %vm379_vm0, %v56_v56, 0.0  ;;  %v464_v59 = vsel %vm379_vm0, %v55_v57, 0.0  ;;  %v58_v60 = vld [vmem:[%s8012_s0 + $0xf8] sm:$0xff]  ;;  %v57_v61 = vld [vmem:[%s8012_s0 + $0xf0] sm:$0xff]  ;;  %v60_v0 = vld [vmem:[%s8012_s0 + $0x108] sm:$0xff] }
  0x22   :  { %v473_v62 = vsel %vm379_vm0, %v58_v60, 0.0  ;;  %v470_v63 = vsel %vm379_vm0, %v57_v61, 0.0  ;;  %v59_v1 = vld [vmem:[%s8012_s0 + $0x100] sm:$0xff]  ;;  %v479_v2 = vsel %vm379_vm0, %v60_v0, 0.0  ;;  %v62_v4 = vld [vmem:[%s8012_s0 + $0x118] sm:$0xff]  ;;  %v61_v5 = vld [vmem:[%s8012_s0 + $0x110] sm:$0xff] }
  0x23   :  { %432 = vadd.xlane.f32.xlu1 %v431_v34  ;;  %429 = vadd.xlane.f32.xlu0 %v428_v35  ;;  %v476_v3 = vsel %vm379_vm0, %v59_v1, 0.0  ;;  %v485_v6 = vsel %vm379_vm0, %v62_v4, 0.0  ;;  %v482_v7 = vsel %vm379_vm0, %v61_v5, 0.0  ;;  %v64_v8 = vld [vmem:[%s8012_s0 + $0x128] sm:$0xff]  ;;  %v63_v9 = vld [vmem:[%s8012_s0 + $0x120] sm:$0xff]  ;;  %v66_v12 = vld [vmem:[%s8012_s0 + $0x138] sm:$0xff] }
  0x24   :  { %v491_v10 = vsel %vm379_vm0, %v64_v8, 0.0  ;;  %v488_v11 = vsel %vm379_vm0, %v63_v9, 0.0  ;;  %v65_v13 = vld [vmem:[%s8012_s0 + $0x130] sm:$0xff]  ;;  %v497_v14 = vsel %vm379_vm0, %v66_v12, 0.0  ;;  %v68_v16 = vld [vmem:[%s8012_s0 + $0x148] sm:$0xff]  ;;  %v67_v17 = vld [vmem:[%s8012_s0 + $0x140] sm:$0xff]  ;;  %v2317_v12 = vlaneseq }
  0x25   :  { %v494_v15 = vsel %vm379_vm0, %v65_v13, 0.0  ;;  %v503_v18 = vsel %vm379_vm0, %v68_v16, 0.0  ;;  %v500_v19 = vsel %vm379_vm0, %v67_v17, 0.0  ;;  %v70_v20 = vld [vmem:[%s8012_s0 + $0x158] sm:$0xff]  ;;  %v69_v21 = vld [vmem:[%s8012_s0 + $0x150] sm:$0xff]  ;;  %v72_v24 = vld [vmem:[%s8012_s0 + $0x168] sm:$0xff] }
  0x26   :  { %v509_v22 = vsel %vm379_vm0, %v70_v20, 0.0  ;;  %v506_v23 = vsel %vm379_vm0, %v69_v21, 0.0  ;;  %v71_v25 = vld [vmem:[%s8012_s0 + $0x160] sm:$0xff]  ;;  %v515_v26 = vsel %vm379_vm0, %v72_v24, 0.0  ;;  %v74_v28 = vld [vmem:[%s8012_s0 + $0x178] sm:$0xff]  ;;  %v73_v29 = vld [vmem:[%s8012_s0 + $0x170] sm:$0xff] }
  0x27   :  { %438 = vadd.xlane.f32.xlu1 %v437_v38  ;;  %435 = vadd.xlane.f32.xlu0 %v434_v39  ;;  %v512_v27 = vsel %vm379_vm0, %v71_v25, 0.0  ;;  %v521_v30 = vsel %vm379_vm0, %v74_v28, 0.0  ;;  %v518_v31 = vsel %vm379_vm0, %v73_v29, 0.0  ;;  %v76_v32 = vld [vmem:[%s8012_s0 + $0x188] sm:$0xff]  ;;  %v75_v33 = vld [vmem:[%s8012_s0 + $0x180] sm:$0xff]  ;;  %v78_v36 = vld [vmem:[%s8012_s0 + $0x198] sm:$0xff] }
  0x28   :  { %v527_v34 = vsel %vm379_vm0, %v76_v32, 0.0  ;;  %v524_v35 = vsel %vm379_vm0, %v75_v33, 0.0  ;;  %v77_v37 = vld [vmem:[%s8012_s0 + $0x190] sm:$0xff]  ;;  %v533_v38 = vsel %vm379_vm0, %v78_v36, 0.0  ;;  %v80_v40 = vld [vmem:[%s8012_s0 + $0x1a8] sm:$0xff]  ;;  %v79_v41 = vld [vmem:[%s8012_s0 + $0x1a0] sm:$0xff] }
  0x29   :  { %v530_v39 = vsel %vm379_vm0, %v77_v37, 0.0  ;;  %v82_v44 = vld [vmem:[%s8012_s0 + $0x1b8] sm:$0xff]  ;;  %v81_v45 = vld [vmem:[%s8012_s0 + $0x1b0] sm:$0xff]  ;;  %v84_v48 = vld [vmem:[%s8012_s0 + $0x1c8] sm:$0xff]  ;;  %v5298_v17 = vand.u32 127, %v2317_v12  ;;  %v5306_v20 = vshrl.u32 %v2317_v12, 7 }
  0x2a   :  { %v83_v49 = vld [vmem:[%s8012_s0 + $0x1c0] sm:$0xff]  ;;  %v86_v52 = vld [vmem:[%s8012_s0 + $0x1d8] sm:$0xff]  ;;  %v85_v53 = vld [vmem:[%s8012_s0 + $0x1d0] sm:$0xff]  ;;  %vm2349_vm4 = vcmask 326912   ;;  %vm2356_vm5 = vcmask 392512   ;;  %vm2363_vm6 = vcmask 458112  }
  0x2b   :  { %444 = vadd.xlane.f32.xlu1 %v443_v42  ;;  %441 = vadd.xlane.f32.xlu0 %v440_v43  ;;  %v539_v42 = vsel %vm379_vm0, %v80_v40, 0.0  ;;  %v536_v43 = vsel %vm379_vm0, %v79_v41, 0.0  ;;  %v88_v56 = vld [vmem:[%s8012_s0 + $0x1e8] sm:$0xff]  ;;  %v87_v57 = vld [vmem:[%s8012_s0 + $0x1e0] sm:$0xff]  ;;  %v90_v60 = vld [vmem:[%s8012_s0 + $0x1f8] sm:$0xff]  ;;  %v2323_v21 = vadd.s32 4294967288, %v5298_v17 }
  0x2c   :  { %v89_v61 = vld [vmem:[%s8012_s0 + $0x1f0] sm:$0xff]  ;;  %v92_v0 = vld [vmem:[%s8012_s0 + $0x208] sm:$0xff]  ;;  %v91_v1 = vld [vmem:[%s8012_s0 + $0x200] sm:$0xff]  ;;  %vm2370_vm7 = vcmask 523712   ;;  %vm2377_vm8 = vcmask 589312   ;;  %vm2384_vm9 = vcmask 654912  }
  0x2d   :  { %v94_v4 = vld [vmem:[%s8012_s0 + $0x218] sm:$0xff]  ;;  %v93_v5 = vld [vmem:[%s8012_s0 + $0x210] sm:$0xff]  ;;  %v96_v8 = vld [vmem:[%s8012_s0 + $0x228] sm:$0xff]  ;;  %v5325_v33 = vsub.s32 %v2323_v21, %v5306_v20  ;;  %vm2391_vm10 = vcmask 720512   ;;  %vm2398_vm11 = vcmask 786112   ;;  %vm2405_vm12 = vcmask 851712  }
  0x2e   :  { %v95_v9 = vld [vmem:[%s8012_s0 + $0x220] sm:$0xff]  ;;  %v98_v13 = vld [vmem:[%s8012_s0 + $0x238] sm:$0xff]  ;;  %v101_v29 = vld [vmem:[%s8012_s0 + $0x250] sm:$0xff]  ;;  %vm2412_vm13 = vcmask 917312   ;;  %vm2419_vm14 = vcmask 982912   ;;  %vm2426_vm15 = vcmask 1048512  }
  0x2f   :  { %450 = vadd.xlane.f32.xlu1 %v449_v46  ;;  %447 = vadd.xlane.f32.xlu0 %v446_v47  ;;  %v545_v46 = vsel %vm379_vm0, %v82_v44, 0.0  ;;  %v542_v47 = vsel %vm379_vm0, %v81_v45, 0.0  ;;  %v102_v28 = vld [vmem:[%s8012_s0 + $0x258] sm:$0xff]  ;;  %8027 = vst [vmem:[#allocation6_spill] sm:$0xff] %v5325_v33  ;;  %v602_v40 = vsel %vm379_vm0, %v101_v29, 0.0  ;;  %v104_v44 = vld [vmem:[%s8012_s0 + $0x268] sm:$0xff] }
  0x30   :  { %v103_v45 = vld [vmem:[%s8012_s0 + $0x260] sm:$0xff]  ;;  %s4989_s12 = smov [#allocation2]  }
  0x31   :  { %s4538_s13 = sshll.u32 %s4989_s12, 4  ;;  %s4539_s13 = int_to_ptr.vmem [resolvable:$true] %s4538_s13 }
  0x32   :  { %p4967_p1 = scmp.lt.s32.totalorder %s4539_s13, %s4539_s13 }
  0x33   :  { %456 = vadd.xlane.f32.xlu1 %v455_v50  ;;  %453 = vadd.xlane.f32.xlu0 %v452_v51  ;;  %v551_v50 = vsel %vm379_vm0, %v84_v48, 0.0  ;;  %v548_v51 = vsel %vm379_vm0, %v83_v49, 0.0  ;;  %v2358_v48 = vadd.s32 4294967248, %v5298_v17 }
  0x37   :  { %462 = vadd.xlane.f32.xlu1 %v461_v54  ;;  %459 = vadd.xlane.f32.xlu0 %v458_v55  ;;  %v557_v54 = vsel %vm379_vm0, %v86_v52, 0.0  ;;  %v554_v55 = vsel %vm379_vm0, %v85_v53, 0.0 }
  0x3b   :  { %468 = vadd.xlane.f32.xlu1 %v467_v58  ;;  %465 = vadd.xlane.f32.xlu0 %v464_v59  ;;  %v563_v58 = vsel %vm379_vm0, %v88_v56, 0.0  ;;  %v560_v59 = vsel %vm379_vm0, %v87_v57, 0.0  ;;  %v608_v56 = vsel %vm379_vm0, %v103_v45, 0.0 }
  0x3f   :  { %474 = vadd.xlane.f32.xlu1 %v473_v62  ;;  %471 = vadd.xlane.f32.xlu0 %v470_v63  ;;  %v569_v62 = vsel %vm379_vm0, %v90_v60, 0.0  ;;  %v566_v63 = vsel %vm379_vm0, %v89_v61, 0.0  ;;  %v106_v61 = vld [vmem:[%s8012_s0 + $0x278] sm:$0xff] }
  0x43   :  { %480 = vadd.xlane.f32.xlu1 %v479_v2  ;;  %477 = vadd.xlane.f32.xlu0 %v476_v3  ;;  %v575_v2 = vsel %vm379_vm0, %v92_v0, 0.0  ;;  %v572_v3 = vsel %vm379_vm0, %v91_v1, 0.0  ;;  %v5368_v1 = vsub.s32 %v2358_v48, %v5306_v20 }
  0x47   :  { %486 = vadd.xlane.f32.xlu1 %v485_v6  ;;  %483 = vadd.xlane.f32.xlu0 %v482_v7  ;;  %v581_v6 = vsel %vm379_vm0, %v94_v4, 0.0  ;;  %v578_v7 = vsel %vm379_vm0, %v93_v5, 0.0 }
  0x4b   :  { %492 = vadd.xlane.f32.xlu1 %v491_v10  ;;  %489 = vadd.xlane.f32.xlu0 %v488_v11  ;;  %v587_v10 = vsel %vm379_vm0, %v96_v8, 0.0  ;;  %v584_v11 = vsel %vm379_vm0, %v95_v9, 0.0  ;;  %v617_v9 = vsel %vm379_vm0, %v106_v61, 0.0 }
  0x4f   :  { %498 = vadd.xlane.f32.xlu1 %v497_v14  ;;  %495 = vadd.xlane.f32.xlu0 %v494_v15  ;;  %v97_v14 = vld [vmem:[%s8012_s0 + $0x230] sm:$0xff]  ;;  %v593_v15 = vsel %vm379_vm0, %v98_v13, 0.0 }
  0x50   :  { %v590_v16 = vsel %vm379_vm0, %v97_v14, 0.0  ;;  %v108_v14 = vld [vmem:[%s8012_s0 + $0x288] sm:$0xff] }
  0x53   :  { %504 = vadd.xlane.f32.xlu1 %v503_v18  ;;  %501 = vadd.xlane.f32.xlu0 %v500_v19  ;;  %v100_v18 = vld [vmem:[%s8012_s0 + $0x248] sm:$0xff]  ;;  %v99_v19 = vld [vmem:[%s8012_s0 + $0x240] sm:$0xff] }
  0x54   :  { %v599_v25 = vsel %vm379_vm0, %v100_v18, 0.0 }
  0x57   :  { %510 = vadd.xlane.f32.xlu1 %v509_v22  ;;  %507 = vadd.xlane.f32.xlu0 %v506_v23  ;;  %v2330_v22 = vadd.s32 4294967280, %v5298_v17 }
  0x5b   :  { %516 = vadd.xlane.f32.xlu1 %v515_v26  ;;  %513 = vadd.xlane.f32.xlu0 %v512_v27  ;;  %v596_v26 = vsel %vm379_vm0, %v99_v19, 0.0  ;;  %v2337_v27 = vadd.s32 4294967272, %v5298_v17  ;;  %v2393_v19 = vadd.s32 4294967208, %v5298_v17 }
  0x5d   :  { %v5334_v41 = vsub.s32 %v2337_v27, %v5306_v20  ;;  %v623_v27 = vsel %vm379_vm0, %v108_v14, 0.0 }
  0x5f   :  { %522 = vadd.xlane.f32.xlu1 %v521_v30  ;;  %519 = vadd.xlane.f32.xlu0 %v518_v31  ;;  %v2351_v30 = vadd.s32 4294967256, %v5298_v17  ;;  %v5322_v31 = vsub.s32 %v5298_v17, %v5306_v20  ;;  %8029 = vst [vmem:[#allocation8_spill] sm:$0xff] %v5334_v41 }
  0x61   :  { %8026 = vst [vmem:[#allocation5_spill] sm:$0xff] %v5322_v31 }
  0x63   :  { %528 = vadd.xlane.f32.xlu1 %v527_v34  ;;  %525 = vadd.xlane.f32.xlu0 %v524_v35  ;;  %v2344_v34 = vadd.s32 4294967264, %v5298_v17  ;;  %v5329_v35 = vsub.s32 %v2330_v22, %v5306_v20 }
  0x65   :  { %8028 = vst [vmem:[#allocation7_spill] sm:$0xff] %v5329_v35 }
  0x67   :  { %534 = vadd.xlane.f32.xlu1 %v533_v38  ;;  %531 = vadd.xlane.f32.xlu0 %v530_v39  ;;  %v605_v39 = vsel %vm379_vm0, %v102_v28, 0.0 }
  0x6b   :  { %540 = vadd.xlane.f32.xlu1 %v539_v42  ;;  %537 = vadd.xlane.f32.xlu0 %v536_v43 }
  0x6f   :  { %546 = vadd.xlane.f32.xlu1 %v545_v46  ;;  %543 = vadd.xlane.f32.xlu0 %v542_v47  ;;  %v5343_v46 = vsub.s32 %v2351_v30, %v5306_v20  ;;  %v2365_v47 = vadd.s32 4294967240, %v5298_v17 }
  0x71   :  { %v5365_v0 = vsub.s32 %v2365_v47, %v5306_v20 }
  0x73   :  { %552 = vadd.xlane.f32.xlu1 %v551_v50  ;;  %549 = vadd.xlane.f32.xlu0 %v548_v51  ;;  %v5350_v51 = vsub.s32 %v2344_v34, %v5306_v20  ;;  %v110_v34 = vld [vmem:[%s8012_s0 + $0x298] sm:$0xff] }
  0x74   :  { %v629_v48 = vsel %vm379_vm0, %v110_v34, 0.0 }
  0x77   :  { %558 = vadd.xlane.f32.xlu1 %v557_v54  ;;  %555 = vadd.xlane.f32.xlu0 %v554_v55  ;;  %v611_v55 = vsel %vm379_vm0, %v104_v44, 0.0  ;;  %v2400_v44 = vadd.s32 4294967200, %v5298_v17 }
  0x79   :  { %v5432_v61 = vsub.s32 %v2400_v44, %v5306_v20 }
  0x7b   :  { %564 = vadd.xlane.f32.xlu1 %v563_v58  ;;  %561 = vadd.xlane.f32.xlu0 %v560_v59 }
  0x7f   :  { %570 = vadd.xlane.f32.xlu1 %v569_v62  ;;  %567 = vadd.xlane.f32.xlu0 %v566_v63  ;;  %v105_v62 = vld [vmem:[%s8012_s0 + $0x270] sm:$0xff] }
  0x83   :  { %576 = vadd.xlane.f32.xlu1 %v575_v2  ;;  %573 = vadd.xlane.f32.xlu0 %v572_v3  ;;  %v2379_v2 = vadd.s32 4294967224, %v5298_v17 }
  0x85   :  { %v5386_v18 = vsub.s32 %v2379_v2, %v5306_v20 }
  0x87   :  { %582 = vadd.xlane.f32.xlu1 %v581_v6  ;;  %579 = vadd.xlane.f32.xlu0 %v578_v7  ;;  %v2372_v6 = vadd.s32 4294967232, %v5298_v17 }
  0x8b   :  { %588 = vadd.xlane.f32.xlu1 %v587_v10  ;;  %585 = vadd.xlane.f32.xlu0 %v584_v11  ;;  %v614_v10 = vsel %vm379_vm0, %v105_v62, 0.0  ;;  %v2414_v62 = vadd.s32 4294967184, %v5298_v17 }
  0x8f   :  { %594 = vadd.xlane.f32.xlu1 %v593_v15  ;;  %591 = vadd.xlane.f32.xlu0 %v590_v16  ;;  %v107_v15 = vld [vmem:[%s8012_s0 + $0x280] sm:$0xff] }
  0x90   :  { %v388_v23 = vpop.xlane.xlu1 %387  ;;  %v382_v24 = vpop.xlane.xlu0 %381  ;;  %v620_v28 = vsel %vm379_vm0, %v107_v15, 0.0 }
  0x91   :  { %v1436_v32 = vmul.f32 0.25, %v382_v24  ;;  %v1438_v36 = vmul.f32 0.25, %v388_v23  ;;  %v5392_v23 = vsub.s32 %v2372_v6, %v5306_v20  ;;  %v2386_v24 = vadd.s32 4294967216, %v5298_v17 }
  0x93   :  { %600 = vadd.xlane.f32.xlu1 %v599_v25  ;;  %597 = vadd.xlane.f32.xlu0 %v596_v26  ;;  %v2322_v49 = vrot.slane %v1436_v32, %v5322_v31  ;;  %v2334_v52 = vrot.slane %v1438_v36, %v5329_v35  ;;  %v109_v36 = vld [vmem:[%s8012_s0 + $0x290] sm:$0xff] }
  0x94   :  { %v391_v37 = vpop.xlane.xlu1 %390  ;;  %v385_v38 = vpop.xlane.xlu0 %384 }
  0x95   :  { %v1439_v42 = vmul.f32 0.25, %v391_v37  ;;  %v1437_v43 = vmul.f32 0.25, %v385_v38  ;;  %v5406_v38 = vsub.s32 %v2393_v19, %v5306_v20 }
  0x97   :  { %v2327_v50 = vrot.slane %v1437_v43, %v5325_v33  ;;  %606 = vadd.xlane.f32.xlu1 %v605_v39  ;;  %603 = vadd.xlane.f32.xlu0 %v602_v40  ;;  %v2341_v57 = vrot.slane %v1439_v42, %v5334_v41  ;;  %v2407_v39 = vadd.s32 4294967192, %v5298_v17  ;;  %v5412_v43 = vsub.s32 %v2386_v24, %v5306_v20 }
  0x98   :  { %v397_v53 = vpop.xlane.xlu1 %396  ;;  %v394_v54 = vpop.xlane.xlu0 %393 }
  0x99   :  { %v2329_v58 = vsel %vm2328_vm1, %v2327_v50, %v2322_v49  ;;  %v1441_v59 = vmul.f32 0.25, %v397_v53  ;;  %v1440_v60 = vmul.f32 0.25, %v394_v54  ;;  %v626_v49 = vsel %vm379_vm0, %v109_v36, 0.0  ;;  %v112_v54 = vld [vmem:[%s8012_s0 + $0x2a8] sm:$0xff] }
  0x9a   :  { %v2336_v63 = vsel %vm2335_vm2, %v2334_v52, %v2329_v58  ;;  %v2421_v58 = vadd.s32 4294967176, %v5298_v17 }
  0x9b   :  { %v2355_v3 = vrot.slane %v1441_v59, %v5343_v46  ;;  %v2343_v4 = vsel %vm8024_vm3, %v2341_v57, %v2336_v63  ;;  %v2348_v5 = vrot.slane %v1440_v60, %v5350_v51  ;;  %612 = vadd.xlane.f32.xlu1 %v611_v55  ;;  %609 = vadd.xlane.f32.xlu0 %v608_v56  ;;  %v111_v55 = vld [vmem:[%s8012_s0 + $0x2a0] sm:$0xff] }
  0x9c   :  { %v403_v7 = vpop.xlane.xlu1 %402  ;;  %v400_v8 = vpop.xlane.xlu0 %399  ;;  %v5426_v57 = vsub.s32 %v2407_v39, %v5306_v20  ;;  %v118_v39 = vld [vmem:[%s8012_s0 + $0x2d8] sm:$0xff] }
  0x9d   :  { %v2350_v11 = vsel %vm2349_vm4, %v2348_v5, %v2343_v4  ;;  %v1443_v12 = vmul.f32 0.25, %v403_v7  ;;  %v1442_v13 = vmul.f32 0.25, %v400_v8  ;;  %v632_v4 = vsel %vm379_vm0, %v111_v55, 0.0  ;;  %v114_v8 = vld [vmem:[%s8012_s0 + $0x2b8] sm:$0xff] }
  0x9e   :  { %v2357_v16 = vsel %vm2356_vm5, %v2355_v3, %v2350_v11  ;;  %v635_v3 = vsel %vm379_vm0, %v112_v54, 0.0 }
  0x9f   :  { %v2369_v21 = vrot.slane %v1443_v12, %v5365_v0  ;;  %v2362_v22 = vrot.slane %v1442_v13, %v5368_v1  ;;  %618 = vadd.xlane.f32.xlu1 %v617_v9  ;;  %615 = vadd.xlane.f32.xlu0 %v614_v10  ;;  %v113_v9 = vld [vmem:[%s8012_s0 + $0x2b0] sm:$0xff]  ;;  %v5446_v10 = vsub.s32 %v2421_v58, %v5306_v20  ;;  %v119_v58 = vld [vmem:[%s8012_s0 + $0x2e0] sm:$0xff] }
  0xa0   :  { %v409_v25 = vpop.xlane.xlu1 %408  ;;  %v406_v26 = vpop.xlane.xlu0 %405  ;;  %v5451_v13 = vsub.s32 %v2414_v62, %v5306_v20  ;;  %v638_v19 = vsel %vm379_vm0, %v113_v9, 0.0  ;;  %v115_v20 = vld [vmem:[%s8012_s0 + $0x2c0] sm:$0xff] }
  0xa1   :  { %v2364_v29 = vsel %vm2363_vm6, %v2362_v22, %v2357_v16  ;;  %v1445_v30 = vmul.f32 0.25, %v409_v25  ;;  %v1444_v32 = vmul.f32 0.25, %v406_v26  ;;  %v641_v16 = vsel %vm379_vm0, %v114_v8, 0.0  ;;  %v116_v25 = vld [vmem:[%s8012_s0 + $0x2c8] sm:$0xff]  ;;  %v121_v8 = vld [vmem:[%s8012_s0 + $0x2f0] sm:$0xff] }
  0xa2   :  { %v2371_v37 = vsel %vm2370_vm7, %v2369_v21, %v2364_v29  ;;  %v644_v34 = vsel %vm379_vm0, %v115_v20, 0.0 }
  0xa3   :  { %v2383_v40 = vrot.slane %v1445_v30, %v5386_v18  ;;  %v2376_v42 = vrot.slane %v1444_v32, %v5392_v23  ;;  %624 = vadd.xlane.f32.xlu1 %v623_v27  ;;  %621 = vadd.xlane.f32.xlu0 %v620_v28  ;;  %v647_v32 = vsel %vm379_vm0, %v116_v25, 0.0  ;;  %v123_v25 = vld [vmem:[%s8012_s0 + $0x300] sm:$0xff] }
  0xa4   :  { %v415_v45 = vpop.xlane.xlu1 %414  ;;  %v412_v47 = vpop.xlane.xlu0 %411 }
  0xa5   :  { %v2378_v50 = vsel %vm2377_vm8, %v2376_v42, %v2371_v37  ;;  %v1447_v52 = vmul.f32 0.25, %v415_v45  ;;  %v1446_v53 = vmul.f32 0.25, %v412_v47 }
  0xa6   :  { %v2385_v56 = vsel %vm2384_vm9, %v2383_v40, %v2378_v50  ;;  %v117_v40 = vld [vmem:[%s8012_s0 + $0x2d0] sm:$0xff]  ;;  %v653_v50 = vsel %vm379_vm0, %v118_v39, 0.0  ;;  %v126_v39 = vld [vmem:[%s8012_s0 + $0x318] sm:$0xff] }
  0xa7   :  { %v2397_v59 = vrot.slane %v1447_v52, %v5406_v38  ;;  %v2390_v60 = vrot.slane %v1446_v53, %v5412_v43  ;;  %630 = vadd.xlane.f32.xlu1 %v629_v48  ;;  %627 = vadd.xlane.f32.xlu0 %v626_v49  ;;  %v650_v52 = vsel %vm379_vm0, %v117_v40, 0.0  ;;  %v125_v40 = vld [vmem:[%s8012_s0 + $0x310] sm:$0xff] }
  0xa8   :  { %v421_v63 = vpop.xlane.xlu1 %420  ;;  %v418_v2 = vpop.xlane.xlu0 %417 }
  0xa9   :  { %v2392_v5 = vsel %vm2391_vm10, %v2390_v60, %v2385_v56  ;;  %v1449_v6 = vmul.f32 0.25, %v421_v63  ;;  %v1448_v7 = vmul.f32 0.25, %v418_v2  ;;  %v120_v56 = vld [vmem:[%s8012_s0 + $0x2e8] sm:$0xff] }
  0xaa   :  { %v2399_v17 = vsel %vm2398_vm11, %v2397_v59, %v2392_v5  ;;  %v659_v2 = vsel %vm379_vm0, %v120_v56, 0.0  ;;  %v128_v56 = vld [vmem:[%s8012_s0 + $0x328] sm:$0xff] }
  0xab   :  { %v2411_v11 = vrot.slane %v1449_v6, %v5426_v57  ;;  %v2404_v12 = vrot.slane %v1448_v7, %v5432_v61  ;;  %636 = vadd.xlane.f32.xlu1 %v635_v3  ;;  %633 = vadd.xlane.f32.xlu0 %v632_v4  ;;  %v656_v3 = vsel %vm379_vm0, %v119_v58, 0.0  ;;  %v122_v7 = vld [vmem:[%s8012_s0 + $0x2f8] sm:$0xff]  ;;  %v127_v58 = vld [vmem:[%s8012_s0 + $0x320] sm:$0xff] }
  0xac   :  { %v427_v14 = vpop.xlane.xlu1 %426  ;;  %v424_v15 = vpop.xlane.xlu0 %423 }
  0xad   :  { %v2406_v21 = vsel %vm2405_vm12, %v2404_v12, %v2399_v17  ;;  %v1451_v22 = vmul.f32 0.25, %v427_v14  ;;  %v1450_v24 = vmul.f32 0.25, %v424_v15  ;;  %v665_v15 = vsel %vm379_vm0, %v122_v7, 0.0 }
  0xae   :  { %v2413_v26 = vsel %vm2412_vm13, %v2411_v11, %v2406_v21 }
  0xaf   :  { %v2425_v27 = vrot.slane %v1451_v22, %v5446_v10  ;;  %v2418_v28 = vrot.slane %v1450_v24, %v5451_v13  ;;  %642 = vadd.xlane.f32.xlu1 %v641_v16  ;;  %639 = vadd.xlane.f32.xlu0 %v638_v19  ;;  %v662_v16 = vsel %vm379_vm0, %v121_v8, 0.0  ;;  %v124_v24 = vld [vmem:[%s8012_s0 + $0x308] sm:$0xff]  ;;  %v130_v8 = vld [vmem:[%s8012_s0 + $0x338] sm:$0xff] }
  0xb0   :  { %v433_v29 = vpop.xlane.xlu1 %432  ;;  %v430_v30 = vpop.xlane.xlu0 %429 }
  0xb1   :  { %v1453_v36 = vmul.f32 0.25, %v433_v29  ;;  %v1452_v37 = vmul.f32 0.25, %v430_v30  ;;  %v2420_v42 = vsel %vm2419_vm14, %v2418_v28, %v2413_v26  ;;  %v671_v30 = vsel %vm379_vm0, %v124_v24, 0.0 }
  0xb2   :  { %v5475_v44 = vsel %vm2426_vm15, %v2425_v27, %v2420_v42 }
  0xb3   :  { %v2435_v45 = vrot.slane %v1453_v36, %v5325_v33  ;;  %v2431_v47 = vrot.slane %v1452_v37, %v5322_v31  ;;  %648 = vadd.xlane.f32.xlu1 %v647_v32  ;;  %645 = vadd.xlane.f32.xlu0 %v644_v34  ;;  %v668_v32 = vsel %vm379_vm0, %v123_v25, 0.0  ;;  %v132_v25 = vld [vmem:[%s8012_s0 + $0x348] sm:$0xff] }
  0xb4   :  { %v439_v48 = vpop.xlane.xlu1 %438  ;;  %v436_v49 = vpop.xlane.xlu0 %435 }
  0xb5   :  { %v2436_v53 = vsel %vm2328_vm1, %v2435_v45, %v2431_v47  ;;  %v1455_v54 = vmul.f32 0.25, %v439_v48  ;;  %v1454_v55 = vmul.f32 0.25, %v436_v49 }
  0xb7   :  { %v2445_v59 = vrot.slane %v1455_v54, %v5334_v41  ;;  %v2440_v60 = vrot.slane %v1454_v55, %v5329_v35  ;;  %654 = vadd.xlane.f32.xlu1 %v653_v50  ;;  %651 = vadd.xlane.f32.xlu0 %v650_v52  ;;  %v677_v50 = vsel %vm379_vm0, %v126_v39, 0.0  ;;  %v674_v52 = vsel %vm379_vm0, %v125_v40, 0.0  ;;  %v134_v39 = vld [vmem:[%s8012_s0 + $0x358] sm:$0xff]  ;;  %v133_v40 = vld [vmem:[%s8012_s0 + $0x350] sm:$0xff] }
  0xb8   :  { %v445_v62 = vpop.xlane.xlu1 %444  ;;  %v442_v63 = vpop.xlane.xlu0 %441 }
  0xb9   :  { %v2441_v4 = vsel %vm2335_vm2, %v2440_v60, %v2436_v53  ;;  %v1457_v5 = vmul.f32 0.25, %v445_v62  ;;  %v1456_v6 = vmul.f32 0.25, %v442_v63 }
  0xba   :  { %v2446_v9 = vsel %vm8024_vm3, %v2445_v59, %v2441_v4  ;;  %v680_v4 = vsel %vm379_vm0, %v127_v58, 0.0  ;;  %v136_v58 = vld [vmem:[%s8012_s0 + $0x368] sm:$0xff] }
  0xbb   :  { %v2455_v17 = vrot.slane %v1457_v5, %v5343_v46  ;;  %v2450_v11 = vrot.slane %v1456_v6, %v5350_v51  ;;  %660 = vadd.xlane.f32.xlu1 %v659_v2  ;;  %657 = vadd.xlane.f32.xlu0 %v656_v3  ;;  %v683_v3 = vsel %vm379_vm0, %v128_v56, 0.0 }
  0xbc   :  { %v451_v12 = vpop.xlane.xlu1 %450  ;;  %v448_v14 = vpop.xlane.xlu0 %447 }
  0xbd   :  { %v2451_v19 = vsel %vm2349_vm4, %v2450_v11, %v2446_v9  ;;  %v1459_v21 = vmul.f32 0.25, %v451_v12  ;;  %v1458_v22 = vmul.f32 0.25, %v448_v14  ;;  %v129_v9 = vld [vmem:[%s8012_s0 + $0x330] sm:$0xff] }
  0xbe   :  { %v2456_v20 = vsel %vm2356_vm5, %v2455_v17, %v2451_v19  ;;  %v686_v19 = vsel %vm379_vm0, %v129_v9, 0.0  ;;  %v137_v9 = vld [vmem:[%s8012_s0 + $0x370] sm:$0xff] }
  0xbf   :  { %v2465_v26 = vrot.slane %v1459_v21, %v5365_v0  ;;  %v2460_v27 = vrot.slane %v1458_v22, %v5368_v1  ;;  %666 = vadd.xlane.f32.xlu1 %v665_v15  ;;  %663 = vadd.xlane.f32.xlu0 %v662_v16  ;;  %v689_v16 = vsel %vm379_vm0, %v130_v8, 0.0  ;;  %v138_v8 = vld [vmem:[%s8012_s0 + $0x378] sm:$0xff] }
  0xc0   :  { %v457_v28 = vpop.xlane.xlu1 %456  ;;  %v454_v29 = vpop.xlane.xlu0 %453 }
  0xc1   :  { %v2461_v34 = vsel %vm2363_vm6, %v2460_v27, %v2456_v20  ;;  %v1461_v36 = vmul.f32 0.25, %v457_v28  ;;  %v1460_v37 = vmul.f32 0.25, %v454_v29  ;;  %v131_v20 = vld [vmem:[%s8012_s0 + $0x340] sm:$0xff] }
  0xc2   :  { %v2466_v42 = vsel %vm2370_vm7, %v2465_v26, %v2461_v34  ;;  %v692_v34 = vsel %vm379_vm0, %v131_v20, 0.0  ;;  %v139_v20 = vld [vmem:[%s8012_s0 + $0x380] sm:$0xff] }
  0xc3   :  { %v2475_v45 = vrot.slane %v1461_v36, %v5386_v18  ;;  %v2470_v47 = vrot.slane %v1460_v37, %v5392_v23  ;;  %672 = vadd.xlane.f32.xlu1 %v671_v30  ;;  %669 = vadd.xlane.f32.xlu0 %v668_v32  ;;  %v695_v32 = vsel %vm379_vm0, %v132_v25, 0.0  ;;  %v140_v25 = vld [vmem:[%s8012_s0 + $0x388] sm:$0xff] }
  0xc4   :  { %v463_v48 = vpop.xlane.xlu1 %462  ;;  %v460_v49 = vpop.xlane.xlu0 %459 }
  0xc5   :  { %v2471_v53 = vsel %vm2377_vm8, %v2470_v47, %v2466_v42  ;;  %v1463_v54 = vmul.f32 0.25, %v463_v48  ;;  %v1462_v55 = vmul.f32 0.25, %v460_v49 }
  0xc6   :  { %v2476_v59 = vsel %vm2384_vm9, %v2475_v45, %v2471_v53  ;;  %v698_v53 = vsel %vm379_vm0, %v133_v40, 0.0  ;;  %v142_v40 = vld [vmem:[%s8012_s0 + $0x398] sm:$0xff] }
  0xc7   :  { %v2485_v60 = vrot.slane %v1463_v54, %v5406_v38  ;;  %v2480_v62 = vrot.slane %v1462_v55, %v5412_v43  ;;  %678 = vadd.xlane.f32.xlu1 %v677_v50  ;;  %675 = vadd.xlane.f32.xlu0 %v674_v52  ;;  %v701_v52 = vsel %vm379_vm0, %v134_v39, 0.0 }
  0xc8   :  { %v469_v63 = vpop.xlane.xlu1 %468  ;;  %v466_v2 = vpop.xlane.xlu0 %465 }
  0xc9   :  { %v2481_v5 = vsel %vm2391_vm10, %v2480_v62, %v2476_v59  ;;  %v1465_v6 = vmul.f32 0.25, %v469_v63  ;;  %v1464_v7 = vmul.f32 0.25, %v466_v2  ;;  %v135_v59 = vld [vmem:[%s8012_s0 + $0x360] sm:$0xff] }
  0xca   :  { %v2486_v17 = vsel %vm2398_vm11, %v2485_v60, %v2481_v5 }
  0xcb   :  { %v2495_v11 = vrot.slane %v1465_v6, %v5426_v57  ;;  %v2490_v12 = vrot.slane %v1464_v7, %v5432_v61  ;;  %684 = vadd.xlane.f32.xlu1 %v683_v3  ;;  %681 = vadd.xlane.f32.xlu0 %v680_v4  ;;  %v707_v3 = vsel %vm379_vm0, %v136_v58, 0.0  ;;  %v704_v4 = vsel %vm379_vm0, %v135_v59, 0.0  ;;  %v144_v59 = vld [vmem:[%s8012_s0 + $0x3a8] sm:$0xff] }
  0xcc   :  { %v475_v14 = vpop.xlane.xlu1 %474  ;;  %v472_v15 = vpop.xlane.xlu0 %471 }
  0xcd   :  { %v2491_v21 = vsel %vm2405_vm12, %v2490_v12, %v2486_v17  ;;  %v1467_v22 = vmul.f32 0.25, %v475_v14  ;;  %v1466_v24 = vmul.f32 0.25, %v472_v15 }
  0xce   :  { %v2496_v26 = vsel %vm2412_vm13, %v2495_v11, %v2491_v21 }
  0xcf   :  { %v2505_v27 = vrot.slane %v1467_v22, %v5446_v10  ;;  %v2500_v28 = vrot.slane %v1466_v24, %v5451_v13  ;;  %690 = vadd.xlane.f32.xlu1 %v689_v16  ;;  %687 = vadd.xlane.f32.xlu0 %v686_v19  ;;  %v713_v16 = vsel %vm379_vm0, %v138_v8, 0.0  ;;  %v710_v19 = vsel %vm379_vm0, %v137_v9, 0.0 }
  0xd0   :  { %v481_v29 = vpop.xlane.xlu1 %480  ;;  %v478_v30 = vpop.xlane.xlu0 %477 }
  0xd1   :  { %v1469_v36 = vmul.f32 0.25, %v481_v29  ;;  %v1468_v37 = vmul.f32 0.25, %v478_v30  ;;  %v2501_v42 = vsel %vm2419_vm14, %v2500_v28, %v2496_v26 }
  0xd2   :  { %v5572_v45 = vsel %vm2426_vm15, %v2505_v27, %v2501_v42  ;;  %v141_v42 = vld [vmem:[%s8012_s0 + $0x390] sm:$0xff] }
  0xd3   :  { %v2514_v47 = vrot.slane %v1469_v36, %v5325_v33  ;;  %v2510_v48 = vrot.slane %v1468_v37, %v5322_v31  ;;  %696 = vadd.xlane.f32.xlu1 %v695_v32  ;;  %693 = vadd.xlane.f32.xlu0 %v692_v34  ;;  %v719_v32 = vsel %vm379_vm0, %v140_v25, 0.0  ;;  %v716_v34 = vsel %vm379_vm0, %v139_v20, 0.0 }
  0xd4   :  { %v487_v49 = vpop.xlane.xlu1 %486  ;;  %v484_v50 = vpop.xlane.xlu0 %483 }
  0xd5   :  { %v2515_v54 = vsel %vm2328_vm1, %v2514_v47, %v2510_v48  ;;  %v1471_v55 = vmul.f32 0.25, %v487_v49  ;;  %v1470_v56 = vmul.f32 0.25, %v484_v50 }
  0xd7   :  { %v2524_v60 = vrot.slane %v1471_v55, %v5334_v41  ;;  %v2519_v62 = vrot.slane %v1470_v56, %v5329_v35  ;;  %702 = vadd.xlane.f32.xlu1 %v701_v52  ;;  %699 = vadd.xlane.f32.xlu0 %v698_v53  ;;  %v725_v53 = vsel %vm379_vm0, %v142_v40, 0.0 }
  0xd8   :  { %v493_v63 = vpop.xlane.xlu1 %492  ;;  %v490_v2 = vpop.xlane.xlu0 %489 }
  0xd9   :  { %v2520_v5 = vsel %vm2335_vm2, %v2519_v62, %v2515_v54  ;;  %v1473_v6 = vmul.f32 0.25, %v493_v63  ;;  %v1472_v7 = vmul.f32 0.25, %v490_v2  ;;  %v722_v54 = vsel %vm379_vm0, %v141_v42, 0.0  ;;  %v150_v42 = vld [vmem:[%s8012_s0 + $0x3d8] sm:$0xff] }
  0xda   :  { %v2525_v17 = vsel %vm8024_vm3, %v2524_v60, %v2520_v5  ;;  %v143_v60 = vld [vmem:[%s8012_s0 + $0x3a0] sm:$0xff]  ;;  %v731_v5 = vsel %vm379_vm0, %v144_v59, 0.0 }
  0xdb   :  { %v2534_v11 = vrot.slane %v1473_v6, %v5343_v46  ;;  %v2529_v12 = vrot.slane %v1472_v7, %v5350_v51  ;;  %708 = vadd.xlane.f32.xlu1 %v707_v3  ;;  %705 = vadd.xlane.f32.xlu0 %v704_v4  ;;  %v728_v6 = vsel %vm379_vm0, %v143_v60, 0.0 }
  0xdc   :  { %v499_v14 = vpop.xlane.xlu1 %498  ;;  %v496_v15 = vpop.xlane.xlu0 %495 }
  0xdd   :  { %v2530_v21 = vsel %vm2349_vm4, %v2529_v12, %v2525_v17  ;;  %v1475_v22 = vmul.f32 0.25, %v499_v14  ;;  %v1474_v24 = vmul.f32 0.25, %v496_v15  ;;  %v146_v17 = vld [vmem:[%s8012_s0 + $0x3b8] sm:$0xff] }
  0xde   :  { %v2535_v26 = vsel %vm2356_vm5, %v2534_v11, %v2530_v21  ;;  %v145_v11 = vld [vmem:[%s8012_s0 + $0x3b0] sm:$0xff]  ;;  %v737_v21 = vsel %vm379_vm0, %v146_v17, 0.0 }
  0xdf   :  { %v2544_v27 = vrot.slane %v1475_v22, %v5365_v0  ;;  %v2539_v28 = vrot.slane %v1474_v24, %v5368_v1  ;;  %714 = vadd.xlane.f32.xlu1 %v713_v16  ;;  %711 = vadd.xlane.f32.xlu0 %v710_v19  ;;  %v734_v22 = vsel %vm379_vm0, %v145_v11, 0.0  ;;  %v154_v11 = vld [vmem:[%s8012_s0 + $0x3f8] sm:$0xff] }
  0xe0   :  { %v505_v29 = vpop.xlane.xlu1 %504  ;;  %v502_v30 = vpop.xlane.xlu0 %501 }
  0xe1   :  { %v2540_v36 = vsel %vm2363_vm6, %v2539_v28, %v2535_v26  ;;  %v1477_v37 = vmul.f32 0.25, %v505_v29  ;;  %v1476_v39 = vmul.f32 0.25, %v502_v30  ;;  %v148_v26 = vld [vmem:[%s8012_s0 + $0x3c8] sm:$0xff] }
  0xe2   :  { %v2545_v47 = vsel %vm2370_vm7, %v2544_v27, %v2540_v36  ;;  %v147_v27 = vld [vmem:[%s8012_s0 + $0x3c0] sm:$0xff]  ;;  %v743_v36 = vsel %vm379_vm0, %v148_v26, 0.0 }
  0xe3   :  { %v2554_v48 = vrot.slane %v1477_v37, %v5386_v18  ;;  %v2549_v49 = vrot.slane %v1476_v39, %v5392_v23  ;;  %720 = vadd.xlane.f32.xlu1 %v719_v32  ;;  %717 = vadd.xlane.f32.xlu0 %v716_v34  ;;  %v740_v37 = vsel %vm379_vm0, %v147_v27, 0.0  ;;  %v156_v27 = vld [vmem:[%s8012_s0 + $0x408] sm:$0xff] }
  0xe4   :  { %v511_v50 = vpop.xlane.xlu1 %510  ;;  %v508_v52 = vpop.xlane.xlu0 %507 }
  0xe5   :  { %v2550_v55 = vsel %vm2377_vm8, %v2549_v49, %v2545_v47  ;;  %v1479_v56 = vmul.f32 0.25, %v511_v50  ;;  %v1478_v58 = vmul.f32 0.25, %v508_v52  ;;  %v149_v47 = vld [vmem:[%s8012_s0 + $0x3d0] sm:$0xff] }
  0xe6   :  { %v2555_v62 = vsel %vm2384_vm9, %v2554_v48, %v2550_v55  ;;  %v749_v55 = vsel %vm379_vm0, %v150_v42, 0.0 }
  0xe7   :  { %v2564_v63 = vrot.slane %v1479_v56, %v5406_v38  ;;  %v2559_v2 = vrot.slane %v1478_v58, %v5412_v43  ;;  %726 = vadd.xlane.f32.xlu1 %v725_v53  ;;  %723 = vadd.xlane.f32.xlu0 %v722_v54  ;;  %v746_v56 = vsel %vm379_vm0, %v149_v47, 0.0 }
  0xe8   :  { %v517_v3 = vpop.xlane.xlu1 %516  ;;  %v514_v4 = vpop.xlane.xlu0 %513 }
  0xe9   :  { %v2560_v7 = vsel %vm2391_vm10, %v2559_v2, %v2555_v62  ;;  %v1481_v8 = vmul.f32 0.25, %v517_v3  ;;  %v1480_v9 = vmul.f32 0.25, %v514_v4  ;;  %v152_v62 = vld [vmem:[%s8012_s0 + $0x3e8] sm:$0xff] }
  0xea   :  { %v2565_v12 = vsel %vm2398_vm11, %v2564_v63, %v2560_v7  ;;  %v151_v63 = vld [vmem:[%s8012_s0 + $0x3e0] sm:$0xff] }
  0xeb   :  { %v2574_v14 = vrot.slane %v1481_v8, %v5426_v57  ;;  %v2569_v15 = vrot.slane %v1480_v9, %v5432_v61  ;;  %732 = vadd.xlane.f32.xlu1 %v731_v5  ;;  %729 = vadd.xlane.f32.xlu0 %v728_v6  ;;  %v755_v6 = vsel %vm379_vm0, %v152_v62, 0.0  ;;  %v752_v7 = vsel %vm379_vm0, %v151_v63, 0.0 }
  0xec   :  { %v523_v16 = vpop.xlane.xlu1 %522  ;;  %v520_v19 = vpop.xlane.xlu0 %519 }
  0xed   :  { %v2570_v24 = vsel %vm2405_vm12, %v2569_v15, %v2565_v12  ;;  %v1483_v25 = vmul.f32 0.25, %v523_v16  ;;  %v1482_v20 = vmul.f32 0.25, %v520_v19  ;;  %v153_v12 = vld [vmem:[%s8012_s0 + $0x3f0] sm:$0xff] }
  0xee   :  { %v2575_v28 = vsel %vm2412_vm13, %v2574_v14, %v2570_v24  ;;  %v758_v24 = vsel %vm379_vm0, %v153_v12, 0.0 }
  0xef   :  { %v2584_v29 = vrot.slane %v1483_v25, %v5446_v10  ;;  %v2579_v30 = vrot.slane %v1482_v20, %v5451_v13  ;;  %738 = vadd.xlane.f32.xlu1 %v737_v21  ;;  %735 = vadd.xlane.f32.xlu0 %v734_v22  ;;  %v761_v22 = vsel %vm379_vm0, %v154_v11, 0.0 }
  0xf0   :  { %v529_v32 = vpop.xlane.xlu1 %528  ;;  %v526_v34 = vpop.xlane.xlu0 %525 }
  0xf1   :  { %v1485_v39 = vmul.f32 0.25, %v529_v32  ;;  %v1484_v40 = vmul.f32 0.25, %v526_v34  ;;  %v2580_v48 = vsel %vm2419_vm14, %v2579_v30, %v2575_v28  ;;  %v155_v28 = vld [vmem:[%s8012_s0 + $0x400] sm:$0xff] }
  0xf2   :  { %v5669_v49 = vsel %vm2426_vm15, %v2584_v29, %v2580_v48  ;;  %v158_v48 = vld [vmem:[%s8012_s0 + $0x418] sm:$0xff] }
  0xf3   :  { %v2593_v50 = vrot.slane %v1485_v39, %v5325_v33  ;;  %v2589_v52 = vrot.slane %v1484_v40, %v5322_v31  ;;  %744 = vadd.xlane.f32.xlu1 %v743_v36  ;;  %741 = vadd.xlane.f32.xlu0 %v740_v37  ;;  %v767_v37 = vsel %vm379_vm0, %v156_v27, 0.0  ;;  %v764_v39 = vsel %vm379_vm0, %v155_v28, 0.0 }
  0xf4   :  { %v535_v53 = vpop.xlane.xlu1 %534  ;;  %v532_v54 = vpop.xlane.xlu0 %531 }
  0xf5   :  { %v2594_v58 = vsel %vm2328_vm1, %v2593_v50, %v2589_v52  ;;  %v1487_v59 = vmul.f32 0.25, %v535_v53  ;;  %v1486_v60 = vmul.f32 0.25, %v532_v54  ;;  %v157_v50 = vld [vmem:[%s8012_s0 + $0x410] sm:$0xff] }
  0xf7   :  { %v2603_v2 = vrot.slane %v1487_v59, %v5334_v41  ;;  %v2598_v3 = vrot.slane %v1486_v60, %v5329_v35  ;;  %750 = vadd.xlane.f32.xlu1 %v749_v55  ;;  %747 = vadd.xlane.f32.xlu0 %v746_v56  ;;  %v770_v59 = vsel %vm379_vm0, %v157_v50, 0.0 }
  0xf8   :  { %v541_v4 = vpop.xlane.xlu1 %540  ;;  %v538_v5 = vpop.xlane.xlu0 %537 }
  0xf9   :  { %v2599_v8 = vsel %vm2335_vm2, %v2598_v3, %v2594_v58  ;;  %v1489_v9 = vmul.f32 0.25, %v541_v4  ;;  %v1488_v17 = vmul.f32 0.25, %v538_v5  ;;  %v773_v58 = vsel %vm379_vm0, %v158_v48, 0.0  ;;  %v159_v3 = vld [vmem:[%s8012_s0 + $0x420] sm:$0xff] }
  0xfa   :  { %v2604_v14 = vsel %vm8024_vm3, %v2603_v2, %v2599_v8  ;;  %v160_v2 = vld [vmem:[%s8012_s0 + $0x428] sm:$0xff] }
  0xfb   :  { %v2613_v15 = vrot.slane %v1489_v9, %v5343_v46  ;;  %v2608_v16 = vrot.slane %v1488_v17, %v5350_v51  ;;  %756 = vadd.xlane.f32.xlu1 %v755_v6  ;;  %753 = vadd.xlane.f32.xlu0 %v752_v7  ;;  %v779_v9 = vsel %vm379_vm0, %v160_v2, 0.0  ;;  %v776_v17 = vsel %vm379_vm0, %v159_v3, 0.0 }
  0xfc   :  { %v547_v19 = vpop.xlane.xlu1 %546  ;;  %v544_v21 = vpop.xlane.xlu0 %543 }
  0xfd   :  { %v2609_v25 = vsel %vm2349_vm4, %v2608_v16, %v2604_v14  ;;  %v1491_v20 = vmul.f32 0.25, %v547_v19  ;;  %v1490_v26 = vmul.f32 0.25, %v544_v21  ;;  %v161_v16 = vld [vmem:[%s8012_s0 + $0x430] sm:$0xff] }
  0xfe   :  { %v2614_v29 = vsel %vm2356_vm5, %v2613_v15, %v2609_v25  ;;  %v162_v15 = vld [vmem:[%s8012_s0 + $0x438] sm:$0xff] }
  0xff   :  { %v2623_v30 = vrot.slane %v1491_v20, %v5365_v0  ;;  %v2618_v32 = vrot.slane %v1490_v26, %v5368_v1  ;;  %762 = vadd.xlane.f32.xlu1 %v761_v22  ;;  %759 = vadd.xlane.f32.xlu0 %v758_v24  ;;  %v785_v20 = vsel %vm379_vm0, %v162_v15, 0.0  ;;  %v782_v26 = vsel %vm379_vm0, %v161_v16, 0.0 }
 0x100   :  { %v553_v34 = vpop.xlane.xlu1 %552  ;;  %v550_v36 = vpop.xlane.xlu0 %549 }
 0x101   :  { %v2619_v40 = vsel %vm2363_vm6, %v2618_v32, %v2614_v29  ;;  %v1493_v42 = vmul.f32 0.25, %v553_v34  ;;  %v1492_v47 = vmul.f32 0.25, %v550_v36  ;;  %v163_v32 = vld [vmem:[%s8012_s0 + $0x440] sm:$0xff] }
 0x102   :  { %v2624_v52 = vsel %vm2370_vm7, %v2623_v30, %v2619_v40  ;;  %v164_v30 = vld [vmem:[%s8012_s0 + $0x448] sm:$0xff] }
 0x103   :  { %v2633_v53 = vrot.slane %v1493_v42, %v5386_v18  ;;  %v2628_v54 = vrot.slane %v1492_v47, %v5392_v23  ;;  %768 = vadd.xlane.f32.xlu1 %v767_v37  ;;  %765 = vadd.xlane.f32.xlu0 %v764_v39  ;;  %v791_v42 = vsel %vm379_vm0, %v164_v30, 0.0  ;;  %v788_v47 = vsel %vm379_vm0, %v163_v32, 0.0 }
 0x104   :  { %v559_v55 = vpop.xlane.xlu1 %558  ;;  %v556_v56 = vpop.xlane.xlu0 %555 }
 0x105   :  { %v2629_v60 = vsel %vm2377_vm8, %v2628_v54, %v2624_v52  ;;  %v1495_v62 = vmul.f32 0.25, %v559_v55  ;;  %v1494_v63 = vmul.f32 0.25, %v556_v56  ;;  %v166_v52 = vld [vmem:[%s8012_s0 + $0x458] sm:$0xff] }
 0x106   :  { %v2634_v4 = vsel %vm2384_vm9, %v2633_v53, %v2629_v60  ;;  %v165_v53 = vld [vmem:[%s8012_s0 + $0x450] sm:$0xff] }
 0x107   :  { %v2643_v5 = vrot.slane %v1495_v62, %v5406_v38  ;;  %v2638_v6 = vrot.slane %v1494_v63, %v5412_v43  ;;  %774 = vadd.xlane.f32.xlu1 %v773_v58  ;;  %771 = vadd.xlane.f32.xlu0 %v770_v59  ;;  %v797_v62 = vsel %vm379_vm0, %v166_v52, 0.0  ;;  %v794_v63 = vsel %vm379_vm0, %v165_v53, 0.0 }
 0x108   :  { %v565_v7 = vpop.xlane.xlu1 %564  ;;  %v562_v8 = vpop.xlane.xlu0 %561 }
 0x109   :  { %v2639_v11 = vsel %vm2391_vm10, %v2638_v6, %v2634_v4  ;;  %v1497_v12 = vmul.f32 0.25, %v565_v7  ;;  %v1496_v14 = vmul.f32 0.25, %v562_v8  ;;  %v167_v6 = vld [vmem:[%s8012_s0 + $0x460] sm:$0xff] }
 0x10a   :  { %v2644_v19 = vsel %vm2398_vm11, %v2643_v5, %v2639_v11  ;;  %v168_v5 = vld [vmem:[%s8012_s0 + $0x468] sm:$0xff] }
 0x10b   :  { %v2653_v21 = vrot.slane %v1497_v12, %v5426_v57  ;;  %v2648_v22 = vrot.slane %v1496_v14, %v5432_v61  ;;  %780 = vadd.xlane.f32.xlu1 %v779_v9  ;;  %777 = vadd.xlane.f32.xlu0 %v776_v17  ;;  %v803_v11 = vsel %vm379_vm0, %v168_v5, 0.0  ;;  %v800_v12 = vsel %vm379_vm0, %v167_v6, 0.0 }
 0x10c   :  { %v571_v24 = vpop.xlane.xlu1 %570  ;;  %v568_v25 = vpop.xlane.xlu0 %567 }
 0x10d   :  { %v2649_v27 = vsel %vm2405_vm12, %v2648_v22, %v2644_v19  ;;  %v1499_v28 = vmul.f32 0.25, %v571_v24  ;;  %v1498_v29 = vmul.f32 0.25, %v568_v25  ;;  %v170_v19 = vld [vmem:[%s8012_s0 + $0x478] sm:$0xff] }
 0x10e   :  { %v2654_v34 = vsel %vm2412_vm13, %v2653_v21, %v2649_v27  ;;  %v169_v21 = vld [vmem:[%s8012_s0 + $0x470] sm:$0xff]  ;;  %v809_v27 = vsel %vm379_vm0, %v170_v19, 0.0 }
 0x10f   :  { %v2663_v36 = vrot.slane %v1499_v28, %v5446_v10  ;;  %v2658_v37 = vrot.slane %v1498_v29, %v5451_v13  ;;  %786 = vadd.xlane.f32.xlu1 %v785_v20  ;;  %783 = vadd.xlane.f32.xlu0 %v782_v26  ;;  %v806_v28 = vsel %vm379_vm0, %v169_v21, 0.0 }
 0x110   :  { %v577_v39 = vpop.xlane.xlu1 %576  ;;  %v574_v40 = vpop.xlane.xlu0 %573 }
 0x111   :  { %v1501_v48 = vmul.f32 0.25, %v577_v39  ;;  %v1500_v50 = vmul.f32 0.25, %v574_v40  ;;  %v2659_v54 = vsel %vm2419_vm14, %v2658_v37, %v2654_v34  ;;  %v172_v34 = vld [vmem:[%s8012_s0 + $0x488] sm:$0xff] }
 0x112   :  { %v5766_v55 = vsel %vm2426_vm15, %v2663_v36, %v2659_v54  ;;  %v171_v36 = vld [vmem:[%s8012_s0 + $0x480] sm:$0xff] }
 0x113   :  { %v2672_v56 = vrot.slane %v1501_v48, %v5325_v33  ;;  %v2668_v58 = vrot.slane %v1500_v50, %v5322_v31  ;;  %792 = vadd.xlane.f32.xlu1 %v791_v42  ;;  %789 = vadd.xlane.f32.xlu0 %v788_v47  ;;  %v815_v48 = vsel %vm379_vm0, %v172_v34, 0.0  ;;  %v812_v50 = vsel %vm379_vm0, %v171_v36, 0.0 }
 0x114   :  { %v583_v59 = vpop.xlane.xlu1 %582  ;;  %v580_v60 = vpop.xlane.xlu0 %579 }
 0x115   :  { %v2673_v2 = vsel %vm2328_vm1, %v2672_v56, %v2668_v58  ;;  %v1503_v3 = vmul.f32 0.25, %v583_v59  ;;  %v1502_v4 = vmul.f32 0.25, %v580_v60  ;;  %v174_v56 = vld [vmem:[%s8012_s0 + $0x498] sm:$0xff]  ;;  %v173_v58 = vld [vmem:[%s8012_s0 + $0x490] sm:$0xff] }
 0x117   :  { %v2682_v7 = vrot.slane %v1503_v3, %v5334_v41  ;;  %v2677_v8 = vrot.slane %v1502_v4, %v5329_v35  ;;  %798 = vadd.xlane.f32.xlu1 %v797_v62  ;;  %795 = vadd.xlane.f32.xlu0 %v794_v63  ;;  %v821_v3 = vsel %vm379_vm0, %v174_v56, 0.0  ;;  %v818_v4 = vsel %vm379_vm0, %v173_v58, 0.0 }
 0x118   :  { %v589_v9 = vpop.xlane.xlu1 %588  ;;  %v586_v17 = vpop.xlane.xlu0 %585 }
 0x119   :  { %v2678_v14 = vsel %vm2335_vm2, %v2677_v8, %v2673_v2  ;;  %v1505_v15 = vmul.f32 0.25, %v589_v9  ;;  %v1504_v16 = vmul.f32 0.25, %v586_v17  ;;  %v176_v8 = vld [vmem:[%s8012_s0 + $0x4a8] sm:$0xff]  ;;  %v175_v9 = vld [vmem:[%s8012_s0 + $0x4a0] sm:$0xff] }
 0x11a   :  { %v2683_v22 = vsel %vm8024_vm3, %v2682_v7, %v2678_v14  ;;  %v824_v19 = vsel %vm379_vm0, %v175_v9, 0.0 }
 0x11b   :  { %v2692_v24 = vrot.slane %v1505_v15, %v5343_v46  ;;  %v2687_v25 = vrot.slane %v1504_v16, %v5350_v51  ;;  %804 = vadd.xlane.f32.xlu1 %v803_v11  ;;  %801 = vadd.xlane.f32.xlu0 %v800_v12  ;;  %v827_v16 = vsel %vm379_vm0, %v176_v8, 0.0 }
 0x11c   :  { %v595_v20 = vpop.xlane.xlu1 %594  ;;  %v592_v26 = vpop.xlane.xlu0 %591 }
 0x11d   :  { %v2688_v29 = vsel %vm2349_vm4, %v2687_v25, %v2683_v22  ;;  %v1507_v30 = vmul.f32 0.25, %v595_v20  ;;  %v1506_v32 = vmul.f32 0.25, %v592_v26  ;;  %v178_v25 = vld [vmem:[%s8012_s0 + $0x4b8] sm:$0xff]  ;;  %v177_v20 = vld [vmem:[%s8012_s0 + $0x4b0] sm:$0xff] }
 0x11e   :  { %v2693_v37 = vsel %vm2356_vm5, %v2692_v24, %v2688_v29  ;;  %v830_v34 = vsel %vm379_vm0, %v177_v20, 0.0 }
 0x11f   :  { %v2702_v39 = vrot.slane %v1507_v30, %v5365_v0  ;;  %v2697_v40 = vrot.slane %v1506_v32, %v5368_v1  ;;  %810 = vadd.xlane.f32.xlu1 %v809_v27  ;;  %807 = vadd.xlane.f32.xlu0 %v806_v28  ;;  %v833_v32 = vsel %vm379_vm0, %v178_v25, 0.0 }
 0x120   :  { %v601_v42 = vpop.xlane.xlu1 %600  ;;  %v598_v47 = vpop.xlane.xlu0 %597 }
 0x121   :  { %v2698_v52 = vsel %vm2363_vm6, %v2697_v40, %v2693_v37  ;;  %v1509_v53 = vmul.f32 0.25, %v601_v42  ;;  %v1508_v54 = vmul.f32 0.25, %v598_v47  ;;  %v180_v40 = vld [vmem:[%s8012_s0 + $0x4c8] sm:$0xff]  ;;  %v179_v42 = vld [vmem:[%s8012_s0 + $0x4c0] sm:$0xff] }
 0x122   :  { %v2703_v59 = vsel %vm2370_vm7, %v2702_v39, %v2698_v52  ;;  %v836_v56 = vsel %vm379_vm0, %v179_v42, 0.0 }
 0x123   :  { %v2712_v60 = vrot.slane %v1509_v53, %v5386_v18  ;;  %v2707_v62 = vrot.slane %v1508_v54, %v5392_v23  ;;  %816 = vadd.xlane.f32.xlu1 %v815_v48  ;;  %813 = vadd.xlane.f32.xlu0 %v812_v50  ;;  %v839_v54 = vsel %vm379_vm0, %v180_v40, 0.0 }
 0x124   :  { %v607_v63 = vpop.xlane.xlu1 %606  ;;  %v604_v2 = vpop.xlane.xlu0 %603 }
 0x125   :  { %v2708_v5 = vsel %vm2377_vm8, %v2707_v62, %v2703_v59  ;;  %v1511_v6 = vmul.f32 0.25, %v607_v63  ;;  %v1510_v7 = vmul.f32 0.25, %v604_v2  ;;  %v181_v62 = vld [vmem:[%s8012_s0 + $0x4d0] sm:$0xff] }
 0x126   :  { %v2713_v17 = vsel %vm2384_vm9, %v2712_v60, %v2708_v5  ;;  %v182_v60 = vld [vmem:[%s8012_s0 + $0x4d8] sm:$0xff]  ;;  %v842_v8 = vsel %vm379_vm0, %v181_v62, 0.0 }
 0x127   :  { %v2722_v11 = vrot.slane %v1511_v6, %v5406_v38  ;;  %v2717_v12 = vrot.slane %v1510_v7, %v5412_v43  ;;  %822 = vadd.xlane.f32.xlu1 %v821_v3  ;;  %819 = vadd.xlane.f32.xlu0 %v818_v4  ;;  %v845_v7 = vsel %vm379_vm0, %v182_v60, 0.0 }
 0x128   :  { %v613_v14 = vpop.xlane.xlu1 %612  ;;  %v610_v15 = vpop.xlane.xlu0 %609 }
 0x129   :  { %v2718_v21 = vsel %vm2391_vm10, %v2717_v12, %v2713_v17  ;;  %v1513_v22 = vmul.f32 0.25, %v613_v14  ;;  %v1512_v24 = vmul.f32 0.25, %v610_v15  ;;  %v184_v12 = vld [vmem:[%s8012_s0 + $0x4e8] sm:$0xff]  ;;  %v183_v14 = vld [vmem:[%s8012_s0 + $0x4e0] sm:$0xff] }
 0x12a   :  { %v2723_v26 = vsel %vm2398_vm11, %v2722_v11, %v2718_v21 }
 0x12b   :  { %v2732_v27 = vrot.slane %v1513_v22, %v5426_v57  ;;  %v2727_v28 = vrot.slane %v1512_v24, %v5432_v61  ;;  %828 = vadd.xlane.f32.xlu1 %v827_v16  ;;  %825 = vadd.xlane.f32.xlu0 %v824_v19  ;;  %v851_v22 = vsel %vm379_vm0, %v184_v12, 0.0  ;;  %v848_v24 = vsel %vm379_vm0, %v183_v14, 0.0 }
 0x12c   :  { %v619_v29 = vpop.xlane.xlu1 %618  ;;  %v616_v30 = vpop.xlane.xlu0 %615 }
 0x12d   :  { %v2728_v36 = vsel %vm2405_vm12, %v2727_v28, %v2723_v26  ;;  %v1515_v37 = vmul.f32 0.25, %v619_v29  ;;  %v1514_v39 = vmul.f32 0.25, %v616_v30  ;;  %v185_v28 = vld [vmem:[%s8012_s0 + $0x4f0] sm:$0xff] }
 0x12e   :  { %v2733_v47 = vsel %vm2412_vm13, %v2732_v27, %v2728_v36  ;;  %v186_v27 = vld [vmem:[%s8012_s0 + $0x4f8] sm:$0xff] }
 0x12f   :  { %v2742_v48 = vrot.slane %v1515_v37, %v5446_v10  ;;  %v2737_v50 = vrot.slane %v1514_v39, %v5451_v13  ;;  %834 = vadd.xlane.f32.xlu1 %v833_v32  ;;  %831 = vadd.xlane.f32.xlu0 %v830_v34  ;;  %v857_v37 = vsel %vm379_vm0, %v186_v27, 0.0  ;;  %v854_v39 = vsel %vm379_vm0, %v185_v28, 0.0 }
 0x130   :  { %v625_v52 = vpop.xlane.xlu1 %624  ;;  %v622_v53 = vpop.xlane.xlu0 %621 }
 0x131   :  { %v1517_v58 = vmul.f32 0.25, %v625_v52  ;;  %v1516_v59 = vmul.f32 0.25, %v622_v53  ;;  %v2738_v63 = vsel %vm2419_vm14, %v2737_v50, %v2733_v47  ;;  %v187_v50 = vld [vmem:[%s8012_s0 + $0x500] sm:$0xff] }
 0x132   :  { %v5863_v2 = vsel %vm2426_vm15, %v2742_v48, %v2738_v63  ;;  %v188_v48 = vld [vmem:[%s8012_s0 + $0x508] sm:$0xff]  ;;  %v860_v60 = vsel %vm379_vm0, %v187_v50, 0.0 }
 0x133   :  { %8030 = vst [vmem:[#allocation9_spill] sm:$0xff] %v5863_v2  ;;  %v2751_v3 = vrot.slane %v1517_v58, %v5325_v33  ;;  %v2747_v4 = vrot.slane %v1516_v59, %v5322_v31  ;;  %840 = vadd.xlane.f32.xlu1 %v839_v54  ;;  %837 = vadd.xlane.f32.xlu0 %v836_v56  ;;  %v863_v59 = vsel %vm379_vm0, %v188_v48, 0.0 }
 0x134   :  { %v631_v5 = vpop.xlane.xlu1 %630  ;;  %v628_v6 = vpop.xlane.xlu0 %627 }
 0x135   :  { %v2752_v9 = vsel %vm2328_vm1, %v2751_v3, %v2747_v4  ;;  %v1519_v17 = vmul.f32 0.25, %v631_v5  ;;  %v1518_v11 = vmul.f32 0.25, %v628_v6  ;;  %v219_v4 = vld [vmem:[%s8012_s0 + $0x600] sm:$0xff]  ;;  %v189_v5 = vld [vmem:[%s8012_s0 + $0x510] sm:$0xff] }
 0x136   :  { %v866_v12 = vsel %vm379_vm0, %v189_v5, 0.0 }
 0x137   :  { %v2761_v15 = vrot.slane %v1519_v17, %v5334_v41  ;;  %v2756_v16 = vrot.slane %v1518_v11, %v5329_v35  ;;  %846 = vadd.xlane.f32.xlu1 %v845_v7  ;;  %843 = vadd.xlane.f32.xlu0 %v842_v8  ;;  %v956_v11 = vsel %vm379_vm0, %v219_v4, 0.0 }
 0x138   :  { %v637_v19 = vpop.xlane.xlu1 %636  ;;  %v634_v21 = vpop.xlane.xlu0 %633 }
 0x139   :  { %v2757_v25 = vsel %vm2335_vm2, %v2756_v16, %v2752_v9  ;;  %v1521_v20 = vmul.f32 0.25, %v637_v19  ;;  %v1520_v26 = vmul.f32 0.25, %v634_v21  ;;  %v203_v19 = vld [vmem:[%s8012_s0 + $0x580] sm:$0xff]  ;;  %v220_v21 = vld [vmem:[%s8012_s0 + $0x608] sm:$0xff] }
 0x13a   :  { %v2762_v29 = vsel %vm8024_vm3, %v2761_v15, %v2757_v25  ;;  %v908_v27 = vsel %vm379_vm0, %v203_v19, 0.0  ;;  %v959_v28 = vsel %vm379_vm0, %v220_v21, 0.0 }
 0x13b   :  { %v2771_v30 = vrot.slane %v1521_v20, %v5343_v46  ;;  %v2766_v32 = vrot.slane %v1520_v26, %v5350_v51  ;;  %852 = vadd.xlane.f32.xlu1 %v851_v22  ;;  %849 = vadd.xlane.f32.xlu0 %v848_v24 }
 0x13c   :  { %v643_v34 = vpop.xlane.xlu1 %642  ;;  %v640_v36 = vpop.xlane.xlu0 %639 }
 0x13d   :  { %v2767_v40 = vsel %vm2349_vm4, %v2766_v32, %v2762_v29  ;;  %v1523_v42 = vmul.f32 0.25, %v643_v34  ;;  %v1522_v47 = vmul.f32 0.25, %v640_v36  ;;  %v221_v34 = vld [vmem:[%s8012_s0 + $0x610] sm:$0xff]  ;;  %v204_v36 = vld [vmem:[%s8012_s0 + $0x588] sm:$0xff] }
 0x13e   :  { %v2772_v52 = vsel %vm2356_vm5, %v2771_v30, %v2767_v40  ;;  %v962_v48 = vsel %vm379_vm0, %v221_v34, 0.0  ;;  %v911_v50 = vsel %vm379_vm0, %v204_v36, 0.0 }
 0x13f   :  { %v2781_v53 = vrot.slane %v1523_v42, %v5365_v0  ;;  %v2776_v54 = vrot.slane %v1522_v47, %v5368_v1  ;;  %858 = vadd.xlane.f32.xlu1 %v857_v37  ;;  %855 = vadd.xlane.f32.xlu0 %v854_v39 }
 0x140   :  { %v649_v56 = vpop.xlane.xlu1 %648  ;;  %v646_v58 = vpop.xlane.xlu0 %645 }
 0x141   :  { %v2777_v62 = vsel %vm2363_vm6, %v2776_v54, %v2772_v52  ;;  %v1525_v63 = vmul.f32 0.25, %v649_v56  ;;  %v1524_v3 = vmul.f32 0.25, %v646_v58  ;;  %v222_v56 = vld [vmem:[%s8012_s0 + $0x618] sm:$0xff]  ;;  %v205_v58 = vld [vmem:[%s8012_s0 + $0x590] sm:$0xff] }
 0x142   :  { %v2782_v6 = vsel %vm2370_vm7, %v2781_v53, %v2777_v62  ;;  %v965_v4 = vsel %vm379_vm0, %v222_v56, 0.0  ;;  %v914_v5 = vsel %vm379_vm0, %v205_v58, 0.0 }
 0x143   :  { %v2791_v7 = vrot.slane %v1525_v63, %v5386_v18  ;;  %v2786_v8 = vrot.slane %v1524_v3, %v5392_v23  ;;  %864 = vadd.xlane.f32.xlu1 %v863_v59  ;;  %861 = vadd.xlane.f32.xlu0 %v860_v60 }
 0x144   :  { %v655_v9 = vpop.xlane.xlu1 %654  ;;  %v652_v17 = vpop.xlane.xlu0 %651 }
 0x145   :  { %v2787_v14 = vsel %vm2377_vm8, %v2786_v8, %v2782_v6  ;;  %v1527_v15 = vmul.f32 0.25, %v655_v9  ;;  %v1526_v16 = vmul.f32 0.25, %v652_v17  ;;  %v223_v8 = vld [vmem:[%s8012_s0 + $0x620] sm:$0xff]  ;;  %v206_v9 = vld [vmem:[%s8012_s0 + $0x598] sm:$0xff] }
 0x146   :  { %v2792_v22 = vsel %vm2384_vm9, %v2791_v7, %v2787_v14  ;;  %v968_v19 = vsel %vm379_vm0, %v223_v8, 0.0  ;;  %v917_v21 = vsel %vm379_vm0, %v206_v9, 0.0 }
 0x147   :  { %v2801_v24 = vrot.slane %v1527_v15, %v5406_v38  ;;  %v2796_v25 = vrot.slane %v1526_v16, %v5412_v43  ;;  %957 = vadd.xlane.f32.xlu1 %v956_v11  ;;  %867 = vadd.xlane.f32.xlu0 %v866_v12 }
 0x148   :  { %v661_v20 = vpop.xlane.xlu1 %660  ;;  %v658_v26 = vpop.xlane.xlu0 %657 }
 0x149   :  { %v2797_v29 = vsel %vm2391_vm10, %v2796_v25, %v2792_v22  ;;  %v1529_v30 = vmul.f32 0.25, %v661_v20  ;;  %v1528_v32 = vmul.f32 0.25, %v658_v26  ;;  %v224_v20 = vld [vmem:[%s8012_s0 + $0x628] sm:$0xff]  ;;  %v207_v26 = vld [vmem:[%s8012_s0 + $0x5a0] sm:$0xff] }
 0x14a   :  { %v2802_v37 = vsel %vm2398_vm11, %v2801_v24, %v2797_v29  ;;  %v920_v34 = vsel %vm379_vm0, %v207_v26, 0.0 }
 0x14b   :  { %v2811_v39 = vrot.slane %v1529_v30, %v5426_v57  ;;  %v2806_v40 = vrot.slane %v1528_v32, %v5432_v61  ;;  %909 = vadd.xlane.f32.xlu1 %v908_v27  ;;  %960 = vadd.xlane.f32.xlu0 %v959_v28  ;;  %v971_v32 = vsel %vm379_vm0, %v224_v20, 0.0 }
 0x14c   :  { %v667_v42 = vpop.xlane.xlu1 %666  ;;  %v664_v47 = vpop.xlane.xlu0 %663 }
 0x14d   :  { %v2807_v52 = vsel %vm2405_vm12, %v2806_v40, %v2802_v37  ;;  %v1531_v53 = vmul.f32 0.25, %v667_v42  ;;  %v1530_v54 = vmul.f32 0.25, %v664_v47  ;;  %v225_v40 = vld [vmem:[%s8012_s0 + $0x630] sm:$0xff]  ;;  %v208_v42 = vld [vmem:[%s8012_s0 + $0x5a8] sm:$0xff] }
 0x14e   :  { %v2812_v59 = vsel %vm2412_vm13, %v2811_v39, %v2807_v52  ;;  %v923_v56 = vsel %vm379_vm0, %v208_v42, 0.0 }
 0x14f   :  { %v2821_v60 = vrot.slane %v1531_v53, %v5446_v10  ;;  %v2816_v62 = vrot.slane %v1530_v54, %v5451_v13  ;;  %963 = vadd.xlane.f32.xlu1 %v962_v48  ;;  %912 = vadd.xlane.f32.xlu0 %v911_v50  ;;  %v974_v54 = vsel %vm379_vm0, %v225_v40, 0.0 }
 0x150   :  { %v673_v63 = vpop.xlane.xlu1 %672  ;;  %v670_v3 = vpop.xlane.xlu0 %669 }
 0x151   :  { %v1533_v6 = vmul.f32 0.25, %v673_v63  ;;  %v1532_v7 = vmul.f32 0.25, %v670_v3  ;;  %v2817_v17 = vsel %vm2419_vm14, %v2816_v62, %v2812_v59  ;;  %v252_v62 = vld [vmem:[%s8012_s0 + $0x708] sm:$0xff]  ;;  %v251_v63 = vld [vmem:[%s8012_s0 + $0x700] sm:$0xff] }
 0x152   :  { %v5960_v11 = vsel %vm2426_vm15, %v2821_v60, %v2817_v17  ;;  %v1055_v8 = vsel %vm379_vm0, %v252_v62, 0.0  ;;  %v1052_v9 = vsel %vm379_vm0, %v251_v63, 0.0 }
 0x153   :  { %8031 = vst [vmem:[#allocation10_spill] sm:$0xff] %v5960_v11  ;;  %v2830_v12 = vrot.slane %v1533_v6, %v5325_v33  ;;  %v2826_v14 = vrot.slane %v1532_v7, %v5322_v31  ;;  %966 = vadd.xlane.f32.xlu1 %v965_v4  ;;  %915 = vadd.xlane.f32.xlu0 %v914_v5 }
 0x154   :  { %v679_v15 = vpop.xlane.xlu1 %678  ;;  %v676_v16 = vpop.xlane.xlu0 %675 }
 0x155   :  { %v2831_v22 = vsel %vm2328_vm1, %v2830_v12, %v2826_v14  ;;  %v1535_v24 = vmul.f32 0.25, %v679_v15  ;;  %v1534_v25 = vmul.f32 0.25, %v676_v16  ;;  %v226_v15 = vld [vmem:[%s8012_s0 + $0x638] sm:$0xff]  ;;  %v209_v16 = vld [vmem:[%s8012_s0 + $0x5b0] sm:$0xff] }
 0x156   :  { %v977_v20 = vsel %vm379_vm0, %v226_v15, 0.0  ;;  %v926_v26 = vsel %vm379_vm0, %v209_v16, 0.0 }
 0x157   :  { %v2840_v27 = vrot.slane %v1535_v24, %v5334_v41  ;;  %v2835_v28 = vrot.slane %v1534_v25, %v5329_v35  ;;  %969 = vadd.xlane.f32.xlu1 %v968_v19  ;;  %918 = vadd.xlane.f32.xlu0 %v917_v21 }
 0x158   :  { %v685_v29 = vpop.xlane.xlu1 %684  ;;  %v682_v30 = vpop.xlane.xlu0 %681 }
 0x159   :  { %v2836_v36 = vsel %vm2335_vm2, %v2835_v28, %v2831_v22  ;;  %v1537_v37 = vmul.f32 0.25, %v685_v29  ;;  %v1536_v39 = vmul.f32 0.25, %v682_v30  ;;  %v236_v30 = vld [vmem:[%s8012_s0 + $0x688] sm:$0xff] }
 0x15a   :  { %v2841_v47 = vsel %vm8024_vm3, %v2840_v27, %v2836_v36  ;;  %v1007_v42 = vsel %vm379_vm0, %v236_v30, 0.0 }
 0x15b   :  { %v2850_v48 = vrot.slane %v1537_v37, %v5343_v46  ;;  %v2845_v50 = vrot.slane %v1536_v39, %v5350_v51  ;;  %972 = vadd.xlane.f32.xlu1 %v971_v32  ;;  %921 = vadd.xlane.f32.xlu0 %v920_v34  ;;  %v235_v32 = vld [vmem:[%s8012_s0 + $0x680] sm:$0xff] }
 0x15c   :  { %v691_v52 = vpop.xlane.xlu1 %690  ;;  %v688_v53 = vpop.xlane.xlu0 %687 }
 0x15d   :  { %v2846_v58 = vsel %vm2349_vm4, %v2845_v50, %v2841_v47  ;;  %v1539_v59 = vmul.f32 0.25, %v691_v52  ;;  %v1538_v60 = vmul.f32 0.25, %v688_v53  ;;  %v1004_v47 = vsel %vm379_vm0, %v235_v32, 0.0  ;;  %v210_v53 = vld [vmem:[%s8012_s0 + $0x5b8] sm:$0xff] }
 0x15e   :  { %v2851_v3 = vsel %vm2356_vm5, %v2850_v48, %v2846_v58  ;;  %v929_v63 = vsel %vm379_vm0, %v210_v53, 0.0 }
 0x15f   :  { %v2860_v4 = vrot.slane %v1539_v59, %v5365_v0  ;;  %v2855_v5 = vrot.slane %v1538_v60, %v5368_v1  ;;  %975 = vadd.xlane.f32.xlu1 %v974_v54  ;;  %924 = vadd.xlane.f32.xlu0 %v923_v56  ;;  %v253_v54 = vld [vmem:[%s8012_s0 + $0x710] sm:$0xff] }
 0x160   :  { %v697_v6 = vpop.xlane.xlu1 %696  ;;  %v694_v7 = vpop.xlane.xlu0 %693 }
 0x161   :  { %v2856_v17 = vsel %vm2363_vm6, %v2855_v5, %v2851_v3  ;;  %v1541_v12 = vmul.f32 0.25, %v697_v6  ;;  %v1540_v14 = vmul.f32 0.25, %v694_v7  ;;  %v1058_v3 = vsel %vm379_vm0, %v253_v54, 0.0  ;;  %v237_v7 = vld [vmem:[%s8012_s0 + $0x690] sm:$0xff] }
 0x162   :  { %v2861_v19 = vsel %vm2370_vm7, %v2860_v4, %v2856_v17  ;;  %v1010_v16 = vsel %vm379_vm0, %v237_v7, 0.0 }
 0x163   :  { %v2870_v21 = vrot.slane %v1541_v12, %v5386_v18  ;;  %v2865_v22 = vrot.slane %v1540_v14, %v5392_v23  ;;  %1056 = vadd.xlane.f32.xlu1 %v1055_v8  ;;  %1053 = vadd.xlane.f32.xlu0 %v1052_v9  ;;  %v227_v8 = vld [vmem:[%s8012_s0 + $0x640] sm:$0xff] }
 0x164   :  { %v703_v24 = vpop.xlane.xlu1 %702  ;;  %v700_v25 = vpop.xlane.xlu0 %699 }
 0x165   :  { %v2866_v27 = vsel %vm2377_vm8, %v2865_v22, %v2861_v19  ;;  %v1543_v28 = vmul.f32 0.25, %v703_v24  ;;  %v1542_v29 = vmul.f32 0.25, %v700_v25  ;;  %v980_v19 = vsel %vm379_vm0, %v227_v8, 0.0  ;;  %v211_v24 = vld [vmem:[%s8012_s0 + $0x5c0] sm:$0xff]  ;;  %v254_v25 = vld [vmem:[%s8012_s0 + $0x718] sm:$0xff] }
 0x166   :  { %v2871_v34 = vsel %vm2384_vm9, %v2870_v21, %v2866_v27  ;;  %v932_v32 = vsel %vm379_vm0, %v211_v24, 0.0 }
 0x167   :  { %v2880_v36 = vrot.slane %v1543_v28, %v5406_v38  ;;  %v2875_v37 = vrot.slane %v1542_v29, %v5412_v43  ;;  %978 = vadd.xlane.f32.xlu1 %v977_v20  ;;  %927 = vadd.xlane.f32.xlu0 %v926_v26 }
 0x168   :  { %v709_v39 = vpop.xlane.xlu1 %708  ;;  %v706_v40 = vpop.xlane.xlu0 %705 }
 0x169   :  { %v2876_v48 = vsel %vm2391_vm10, %v2875_v37, %v2871_v34  ;;  %v1545_v50 = vmul.f32 0.25, %v709_v39  ;;  %v1544_v52 = vmul.f32 0.25, %v706_v40  ;;  %v1061_v34 = vsel %vm379_vm0, %v254_v25, 0.0  ;;  %v238_v40 = vld [vmem:[%s8012_s0 + $0x698] sm:$0xff] }
 0x16a   :  { %v2881_v56 = vsel %vm2398_vm11, %v2880_v36, %v2876_v48  ;;  %v1013_v53 = vsel %vm379_vm0, %v238_v40, 0.0 }
 0x16b   :  { %v2890_v58 = vrot.slane %v1545_v50, %v5426_v57  ;;  %v2885_v59 = vrot.slane %v1544_v52, %v5432_v61  ;;  %1008 = vadd.xlane.f32.xlu1 %v1007_v42  ;;  %1005 = vadd.xlane.f32.xlu0 %v1004_v47  ;;  %v228_v42 = vld [vmem:[%s8012_s0 + $0x648] sm:$0xff] }
 0x16c   :  { %v715_v60 = vpop.xlane.xlu1 %714  ;;  %v712_v62 = vpop.xlane.xlu0 %711  ;;  %v983_v54 = vsel %vm379_vm0, %v228_v42, 0.0 }
 0x16d   :  { %v2886_v4 = vsel %vm2405_vm12, %v2885_v59, %v2881_v56  ;;  %v1547_v5 = vmul.f32 0.25, %v715_v60  ;;  %v1546_v6 = vmul.f32 0.25, %v712_v62  ;;  %v212_v60 = vld [vmem:[%s8012_s0 + $0x5c8] sm:$0xff]  ;;  %v255_v62 = vld [vmem:[%s8012_s0 + $0x720] sm:$0xff] }
 0x16e   :  { %v2891_v9 = vsel %vm2412_vm13, %v2890_v58, %v2886_v4  ;;  %v935_v7 = vsel %vm379_vm0, %v212_v60, 0.0  ;;  %v1064_v8 = vsel %vm379_vm0, %v255_v62, 0.0 }
 0x16f   :  { %v2900_v17 = vrot.slane %v1547_v5, %v5446_v10  ;;  %v2895_v12 = vrot.slane %v1546_v6, %v5451_v13  ;;  %930 = vadd.xlane.f32.xlu1 %v929_v63  ;;  %1059 = vadd.xlane.f32.xlu0 %v1058_v3 }
 0x170   :  { %v721_v14 = vpop.xlane.xlu1 %720  ;;  %v718_v15 = vpop.xlane.xlu0 %717 }
 0x171   :  { %v1549_v21 = vmul.f32 0.25, %v721_v14  ;;  %v1548_v22 = vmul.f32 0.25, %v718_v15  ;;  %v2896_v20 = vsel %vm2419_vm14, %v2895_v12, %v2891_v9  ;;  %v239_v14 = vld [vmem:[%s8012_s0 + $0x6a0] sm:$0xff]  ;;  %v229_v15 = vld [vmem:[%s8012_s0 + $0x650] sm:$0xff] }
 0x172   :  { %v6057_v26 = vsel %vm2426_vm15, %v2900_v17, %v2896_v20  ;;  %v1016_v25 = vsel %vm379_vm0, %v239_v14, 0.0  ;;  %v986_v20 = vsel %vm379_vm0, %v229_v15, 0.0 }
 0x173   :  { %8032 = vst [vmem:[#allocation11_spill] sm:$0xff] %v6057_v26  ;;  %v2909_v27 = vrot.slane %v1549_v21, %v5325_v33  ;;  %v2905_v28 = vrot.slane %v1548_v22, %v5322_v31  ;;  %1011 = vadd.xlane.f32.xlu1 %v1010_v16  ;;  %981 = vadd.xlane.f32.xlu0 %v980_v19 }
 0x174   :  { %v727_v29 = vpop.xlane.xlu1 %726  ;;  %v724_v30 = vpop.xlane.xlu0 %723 }
 0x175   :  { %v2910_v36 = vsel %vm2328_vm1, %v2909_v27, %v2905_v28  ;;  %v1551_v37 = vmul.f32 0.25, %v727_v29  ;;  %v1550_v39 = vmul.f32 0.25, %v724_v30  ;;  %v213_v30 = vld [vmem:[%s8012_s0 + $0x5d0] sm:$0xff] }
 0x176   :  { %v938_v42 = vsel %vm379_vm0, %v213_v30, 0.0 }
 0x177   :  { %v2919_v47 = vrot.slane %v1551_v37, %v5334_v41  ;;  %v2914_v48 = vrot.slane %v1550_v39, %v5329_v35  ;;  %933 = vadd.xlane.f32.xlu1 %v932_v32  ;;  %1062 = vadd.xlane.f32.xlu0 %v1061_v34  ;;  %v256_v32 = vld [vmem:[%s8012_s0 + $0x728] sm:$0xff] }
 0x178   :  { %v733_v50 = vpop.xlane.xlu1 %732  ;;  %v730_v52 = vpop.xlane.xlu0 %729 }
 0x179   :  { %v2915_v56 = vsel %vm2335_vm2, %v2914_v48, %v2910_v36  ;;  %v1553_v58 = vmul.f32 0.25, %v733_v50  ;;  %v1552_v59 = vmul.f32 0.25, %v730_v52 }
 0x17a   :  { %v2920_v63 = vsel %vm8024_vm3, %v2919_v47, %v2915_v56  ;;  %v1067_v47 = vsel %vm379_vm0, %v256_v32, 0.0 }
 0x17b   :  { %v2929_v3 = vrot.slane %v1553_v58, %v5343_v46  ;;  %v2924_v4 = vrot.slane %v1552_v59, %v5350_v51  ;;  %1014 = vadd.xlane.f32.xlu1 %v1013_v53  ;;  %984 = vadd.xlane.f32.xlu0 %v983_v54  ;;  %v240_v53 = vld [vmem:[%s8012_s0 + $0x6a8] sm:$0xff]  ;;  %v230_v54 = vld [vmem:[%s8012_s0 + $0x658] sm:$0xff] }
 0x17c   :  { %v739_v5 = vpop.xlane.xlu1 %738  ;;  %v736_v6 = vpop.xlane.xlu0 %735 }
 0x17d   :  { %v2925_v9 = vsel %vm2349_vm4, %v2924_v4, %v2920_v63  ;;  %v1555_v17 = vmul.f32 0.25, %v739_v5  ;;  %v1554_v12 = vmul.f32 0.25, %v736_v6  ;;  %v1019_v63 = vsel %vm379_vm0, %v240_v53, 0.0 }
 0x17e   :  { %v2930_v16 = vsel %vm2356_vm5, %v2929_v3, %v2925_v9  ;;  %v989_v3 = vsel %vm379_vm0, %v230_v54, 0.0 }
 0x17f   :  { %v2939_v19 = vrot.slane %v1555_v17, %v5365_v0  ;;  %v2934_v21 = vrot.slane %v1554_v12, %v5368_v1  ;;  %936 = vadd.xlane.f32.xlu1 %v935_v7  ;;  %1065 = vadd.xlane.f32.xlu0 %v1064_v8  ;;  %v214_v7 = vld [vmem:[%s8012_s0 + $0x5d8] sm:$0xff]  ;;  %v257_v8 = vld [vmem:[%s8012_s0 + $0x730] sm:$0xff] }
 0x180   :  { %v745_v22 = vpop.xlane.xlu1 %744  ;;  %v742_v24 = vpop.xlane.xlu0 %741 }
 0x181   :  { %v2935_v27 = vsel %vm2363_vm6, %v2934_v21, %v2930_v16  ;;  %v1557_v28 = vmul.f32 0.25, %v745_v22  ;;  %v1556_v29 = vmul.f32 0.25, %v742_v24  ;;  %v941_v16 = vsel %vm379_vm0, %v214_v7, 0.0 }
 0x182   :  { %v2940_v34 = vsel %vm2370_vm7, %v2939_v19, %v2935_v27  ;;  %v1070_v19 = vsel %vm379_vm0, %v257_v8, 0.0 }
 0x183   :  { %v2949_v36 = vrot.slane %v1557_v28, %v5386_v18  ;;  %v2944_v37 = vrot.slane %v1556_v29, %v5392_v23  ;;  %1017 = vadd.xlane.f32.xlu1 %v1016_v25  ;;  %987 = vadd.xlane.f32.xlu0 %v986_v20  ;;  %v241_v25 = vld [vmem:[%s8012_s0 + $0x6b0] sm:$0xff]  ;;  %v231_v20 = vld [vmem:[%s8012_s0 + $0x660] sm:$0xff] }
 0x184   :  { %v751_v39 = vpop.xlane.xlu1 %750  ;;  %v748_v40 = vpop.xlane.xlu0 %747 }
 0x185   :  { %v2945_v48 = vsel %vm2377_vm8, %v2944_v37, %v2940_v34  ;;  %v1559_v50 = vmul.f32 0.25, %v751_v39  ;;  %v1558_v52 = vmul.f32 0.25, %v748_v40  ;;  %v1022_v34 = vsel %vm379_vm0, %v241_v25, 0.0  ;;  %v215_v40 = vld [vmem:[%s8012_s0 + $0x5e0] sm:$0xff] }
 0x186   :  { %v2950_v56 = vsel %vm2384_vm9, %v2949_v36, %v2945_v48  ;;  %v992_v36 = vsel %vm379_vm0, %v231_v20, 0.0 }
 0x187   :  { %v2959_v58 = vrot.slane %v1559_v50, %v5406_v38  ;;  %v2954_v59 = vrot.slane %v1558_v52, %v5412_v43  ;;  %939 = vadd.xlane.f32.xlu1 %v938_v42  ;;  %1068 = vadd.xlane.f32.xlu0 %v1067_v47  ;;  %v258_v42 = vld [vmem:[%s8012_s0 + $0x738] sm:$0xff] }
 0x188   :  { %v757_v60 = vpop.xlane.xlu1 %756  ;;  %v754_v62 = vpop.xlane.xlu0 %753 }
 0x189   :  { %v2955_v4 = vsel %vm2391_vm10, %v2954_v59, %v2950_v56  ;;  %v1561_v5 = vmul.f32 0.25, %v757_v60  ;;  %v1560_v6 = vmul.f32 0.25, %v754_v62  ;;  %v944_v56 = vsel %vm379_vm0, %v215_v40, 0.0 }
 0x18a   :  { %v2960_v9 = vsel %vm2398_vm11, %v2959_v58, %v2955_v4  ;;  %v1073_v58 = vsel %vm379_vm0, %v258_v42, 0.0 }
 0x18b   :  { %v2969_v17 = vrot.slane %v1561_v5, %v5426_v57  ;;  %v2964_v12 = vrot.slane %v1560_v6, %v5432_v61  ;;  %1020 = vadd.xlane.f32.xlu1 %v1019_v63  ;;  %990 = vadd.xlane.f32.xlu0 %v989_v3  ;;  %v242_v63 = vld [vmem:[%s8012_s0 + $0x6b8] sm:$0xff]  ;;  %v232_v3 = vld [vmem:[%s8012_s0 + $0x668] sm:$0xff] }
 0x18c   :  { %v763_v14 = vpop.xlane.xlu1 %762  ;;  %v760_v15 = vpop.xlane.xlu0 %759  ;;  %v1025_v8 = vsel %vm379_vm0, %v242_v63, 0.0  ;;  %v1789_v63 = vld [vmem:[%s8013_s1] sm:$0xff] }
 0x18d   :  { %v2965_v21 = vsel %vm2405_vm12, %v2964_v12, %v2960_v9  ;;  %v1563_v22 = vmul.f32 0.25, %v763_v14  ;;  %v1562_v24 = vmul.f32 0.25, %v760_v15  ;;  %v995_v9 = vsel %vm379_vm0, %v232_v3, 0.0  ;;  %v216_v15 = vld [vmem:[%s8012_s0 + $0x5e8] sm:$0xff] }
 0x18e   :  { %v2970_v27 = vsel %vm2412_vm13, %v2969_v17, %v2965_v21  ;;  %v947_v20 = vsel %vm379_vm0, %v216_v15, 0.0  ;;  %v1808_v15 = vld [vmem:[%s8013_s1 + $0x98] sm:$0xff] }
 0x18f   :  { %v2979_v28 = vrot.slane %v1563_v22, %v5446_v10  ;;  %v2974_v29 = vrot.slane %v1562_v24, %v5451_v13  ;;  %942 = vadd.xlane.f32.xlu1 %v941_v16  ;;  %1071 = vadd.xlane.f32.xlu0 %v1070_v19  ;;  %v259_v16 = vld [vmem:[%s8012_s0 + $0x740] sm:$0xff] }
 0x190   :  { %v769_v30 = vpop.xlane.xlu1 %768  ;;  %v766_v32 = vpop.xlane.xlu0 %765 }
 0x191   :  { %v1565_v37 = vmul.f32 0.25, %v769_v30  ;;  %v1564_v39 = vmul.f32 0.25, %v766_v32  ;;  %v2975_v47 = vsel %vm2419_vm14, %v2974_v29, %v2970_v27  ;;  %v1076_v27 = vsel %vm379_vm0, %v259_v16, 0.0  ;;  %v243_v32 = vld [vmem:[%s8012_s0 + $0x6c0] sm:$0xff] }
 0x192   :  { %v6154_v48 = vsel %vm2426_vm15, %v2979_v28, %v2975_v47  ;;  %v1028_v47 = vsel %vm379_vm0, %v243_v32, 0.0 }
 0x193   :  { %8033 = vst [vmem:[#allocation12_spill] sm:$0xff] %v6154_v48  ;;  %v2988_v50 = vrot.slane %v1565_v37, %v5325_v33  ;;  %v2984_v52 = vrot.slane %v1564_v39, %v5322_v31  ;;  %1023 = vadd.xlane.f32.xlu1 %v1022_v34  ;;  %993 = vadd.xlane.f32.xlu0 %v992_v36  ;;  %v233_v34 = vld [vmem:[%s8012_s0 + $0x670] sm:$0xff] }
 0x194   :  { %v775_v53 = vpop.xlane.xlu1 %774  ;;  %v772_v54 = vpop.xlane.xlu0 %771 }
 0x195   :  { %v2989_v59 = vsel %vm2328_vm1, %v2988_v50, %v2984_v52  ;;  %v1567_v60 = vmul.f32 0.25, %v775_v53  ;;  %v1566_v62 = vmul.f32 0.25, %v772_v54  ;;  %v998_v50 = vsel %vm379_vm0, %v233_v34, 0.0  ;;  %v1805_v52 = vld [vmem:[%s8013_s1 + $0x80] sm:$0xff]  ;;  %v1806_v53 = vld [vmem:[%s8013_s1 + $0x88] sm:$0xff] }
 0x197   :  { %v2998_v4 = vrot.slane %v1567_v60, %v5334_v41  ;;  %v2993_v5 = vrot.slane %v1566_v62, %v5329_v35  ;;  %945 = vadd.xlane.f32.xlu1 %v944_v56  ;;  %1074 = vadd.xlane.f32.xlu0 %v1073_v58  ;;  %v260_v60 = vld [vmem:[%s8012_s0 + $0x748] sm:$0xff]  ;;  %v4774_v62 = vpack.c.bf16 %v1806_v53, %v1805_v52  ;;  %v218_v53 = vld [vmem:[%s8012_s0 + $0x5f8] sm:$0xff] }
 0x198   :  { %v781_v6 = vpop.xlane.xlu1 %780  ;;  %v778_v7 = vpop.xlane.xlu0 %777 }
 0x199   :  { %v2994_v17 = vsel %vm2335_vm2, %v2993_v5, %v2989_v59  ;;  %v1569_v12 = vmul.f32 0.25, %v781_v6  ;;  %v1568_v14 = vmul.f32 0.25, %v778_v7  ;;  %v217_v59 = vld [vmem:[%s8012_s0 + $0x5f0] sm:$0xff]  ;;  %4775 = vmatprep.subr.bf16.mxu0 %v4774_v62 }
 0x19a   :  { %v2999_v19 = vsel %vm8024_vm3, %v2998_v4, %v2994_v17  ;;  %v1790_v4 = vld [vmem:[%s8013_s1 + $0x8] sm:$0xff]  ;;  %v950_v17 = vsel %vm379_vm0, %v217_v59, 0.0 }
 0x19b   :  { %v3008_v21 = vrot.slane %v1569_v12, %v5343_v46  ;;  %v3003_v22 = vrot.slane %v1568_v14, %v5350_v51  ;;  %1026 = vadd.xlane.f32.xlu1 %v1025_v8  ;;  %996 = vadd.xlane.f32.xlu0 %v995_v9  ;;  %v4776_v7 = vpack.c.bf16 %v1790_v4, %v1789_v63  ;;  %v1079_v12 = vsel %vm379_vm0, %v260_v60, 0.0  ;;  %v1807_v14 = vld [vmem:[%s8013_s1 + $0x90] sm:$0xff]  ;;  %v1794_v60 = vld [vmem:[%s8013_s1 + $0x28] sm:$0xff] }
 0x19c   :  { %v787_v24 = vpop.xlane.xlu1 %786  ;;  %v784_v25 = vpop.xlane.xlu0 %783 }
 0x19d   :  { %v3004_v28 = vsel %vm2349_vm4, %v3003_v22, %v2999_v19  ;;  %v1571_v29 = vmul.f32 0.25, %v787_v24  ;;  %v1570_v30 = vmul.f32 0.25, %v784_v25  ;;  %v244_v22 = vld [vmem:[%s8012_s0 + $0x6c8] sm:$0xff]  ;;  %v234_v24 = vld [vmem:[%s8012_s0 + $0x678] sm:$0xff]  ;;  %4777 = vmatpush3.bf16.msra.mxu0 %v4776_v7  ;;  %v4778_v25 = vpack.c.bf16 %v1808_v15, %v1807_v14 }
 0x19e   :  { %v3009_v36 = vsel %vm2356_vm5, %v3008_v21, %v3004_v28  ;;  %v1792_v28 = vld [vmem:[%s8013_s1 + $0x18] sm:$0xff] }
 0x19f   :  { %v3018_v37 = vrot.slane %v1571_v29, %v5365_v0  ;;  %v3013_v39 = vrot.slane %v1570_v30, %v5368_v1  ;;  %948 = vadd.xlane.f32.xlu1 %v947_v20  ;;  %1077 = vadd.xlane.f32.xlu0 %v1076_v27  ;;  %v1791_v20 = vld [vmem:[%s8013_s1 + $0x10] sm:$0xff]  ;;  %v262_v15 = vld [vmem:[%s8012_s0 + $0x758] sm:$0xff] }
 0x1a0   :  { %v793_v40 = vpop.xlane.xlu1 %792  ;;  %v790_v42 = vpop.xlane.xlu0 %789  ;;  %v4780_v32 = vpack.c.bf16 %v1792_v28, %v1791_v20  ;;  %4779 = vmatprep.subr.bf16.mxu0 %v4778_v25 }
 0x1a1   :  { %v3014_v54 = vsel %vm2363_vm6, %v3013_v39, %v3009_v36  ;;  %v1573_v56 = vmul.f32 0.25, %v793_v40  ;;  %v1572_v58 = vmul.f32 0.25, %v790_v42  ;;  %v1001_v39 = vsel %vm379_vm0, %v234_v24, 0.0  ;;  %v1809_v40 = vld [vmem:[%s8013_s1 + $0xa0] sm:$0xff]  ;;  %v1810_v42 = vld [vmem:[%s8013_s1 + $0xa8] sm:$0xff] }
 0x1a2   :  { %v3019_v3 = vsel %vm2370_vm7, %v3018_v37, %v3014_v54  ;;  %v1031_v37 = vsel %vm379_vm0, %v244_v22, 0.0  ;;  %v261_v54 = vld [vmem:[%s8012_s0 + $0x750] sm:$0xff]  ;;  %4781 = vmatpush3.bf16.msra.mxu0 %v4780_v32  ;;  %v1796_v22 = vld [vmem:[%s8013_s1 + $0x38] sm:$0xff] }
 0x1a3   :  { %v3028_v5 = vrot.slane %v1573_v56, %v5386_v18  ;;  %v3023_v6 = vrot.slane %v1572_v58, %v5392_v23  ;;  %1029 = vadd.xlane.f32.xlu1 %v1028_v47  ;;  %999 = vadd.xlane.f32.xlu0 %v998_v50  ;;  %v4782_v56 = vpack.c.bf16 %v1810_v42, %v1809_v40  ;;  %v1793_v58 = vld [vmem:[%s8013_s1 + $0x20] sm:$0xff]  ;;  %v1082_v7 = vsel %vm379_vm0, %v261_v54, 0.0  ;;  %v246_v42 = vld [vmem:[%s8012_s0 + $0x6d8] sm:$0xff] }
 0x1a4   :  { %v799_v8 = vpop.xlane.xlu1 %798  ;;  %v796_v9 = vpop.xlane.xlu0 %795  ;;  %v263_v40 = vld [vmem:[%s8012_s0 + $0x760] sm:$0xff] }
 0x1a5   :  { %v3024_v16 = vsel %vm2377_vm8, %v3023_v6, %v3019_v3  ;;  %v1575_v19 = vmul.f32 0.25, %v799_v8  ;;  %v1574_v21 = vmul.f32 0.25, %v796_v9  ;;  %v4784_v3 = vpack.c.bf16 %v1794_v60, %v1793_v58  ;;  %4783 = vmatprep.subr.bf16.mxu0 %v4782_v56  ;;  %v1811_v8 = vld [vmem:[%s8013_s1 + $0xb0] sm:$0xff]  ;;  %v1812_v9 = vld [vmem:[%s8013_s1 + $0xb8] sm:$0xff] }
 0x1a6   :  { %v3029_v27 = vsel %vm2384_vm9, %v3028_v5, %v3024_v16  ;;  %v953_v6 = vsel %vm379_vm0, %v218_v53, 0.0  ;;  %v245_v16 = vld [vmem:[%s8012_s0 + $0x6d0] sm:$0xff]  ;;  %v1798_v53 = vld [vmem:[%s8013_s1 + $0x48] sm:$0xff] }
 0x1a7   :  { %v3038_v29 = vrot.slane %v1575_v19, %v5406_v38  ;;  %v3033_v30 = vrot.slane %v1574_v21, %v5412_v43  ;;  %951 = vadd.xlane.f32.xlu1 %v950_v17  ;;  %1080 = vadd.xlane.f32.xlu0 %v1079_v12  ;;  %v4786_v19 = vpack.c.bf16 %v1812_v9, %v1811_v8  ;;  %v1795_v21 = vld [vmem:[%s8013_s1 + $0x30] sm:$0xff]  ;;  %v1034_v32 = vsel %vm379_vm0, %v245_v16, 0.0  ;;  %v264_v9 = vld [vmem:[%s8012_s0 + $0x768] sm:$0xff] }
 0x1a8   :  { %v805_v34 = vpop.xlane.xlu1 %804  ;;  %v802_v36 = vpop.xlane.xlu0 %801  ;;  %4785 = vmatpush3.bf16.msra.mxu0 %v4784_v3  ;;  %v1037_v3 = vsel %vm379_vm0, %v246_v42, 0.0 }
 0x1a9   :  { %v3034_v47 = vsel %vm2391_vm10, %v3033_v30, %v3029_v27  ;;  %v1577_v50 = vmul.f32 0.25, %v805_v34  ;;  %v1576_v52 = vmul.f32 0.25, %v802_v36  ;;  %v4788_v27 = vpack.c.bf16 %v1796_v22, %v1795_v21  ;;  %4787 = vmatprep.subr.bf16.mxu0 %v4786_v19  ;;  %v1813_v34 = vld [vmem:[%s8013_s1 + $0xc0] sm:$0xff]  ;;  %v1814_v36 = vld [vmem:[%s8013_s1 + $0xc8] sm:$0xff] }
 0x1aa   :  { %v3039_v59 = vsel %vm2398_vm11, %v3038_v29, %v3034_v47  ;;  %v1085_v30 = vsel %vm379_vm0, %v262_v15, 0.0  ;;  %v4790_v47 = vpack.c.bf16 %v1814_v36, %v1813_v34  ;;  %v1800_v15 = vld [vmem:[%s8013_s1 + $0x58] sm:$0xff]  ;;  %v265_v36 = vld [vmem:[%s8012_s0 + $0x770] sm:$0xff] }
 0x1ab   :  { %v3048_v62 = vrot.slane %v1577_v50, %v5426_v57  ;;  %v3043_v63 = vrot.slane %v1576_v52, %v5432_v61  ;;  %1032 = vadd.xlane.f32.xlu1 %v1031_v37  ;;  %1002 = vadd.xlane.f32.xlu0 %v1001_v39  ;;  %v1797_v50 = vld [vmem:[%s8013_s1 + $0x40] sm:$0xff] }
 0x1ac   :  { %v811_v4 = vpop.xlane.xlu1 %810  ;;  %v808_v5 = vpop.xlane.xlu0 %807  ;;  %4789 = vmatpush3.bf16.msra.mxu0 %v4788_v27  ;;  %v1817_v27 = vld [vmem:[%s8013_s1 + $0xe0] sm:$0xff] }
 0x1ad   :  { %v3044_v17 = vsel %vm2405_vm12, %v3043_v63, %v3039_v59  ;;  %v1579_v12 = vmul.f32 0.25, %v811_v4  ;;  %v1578_v14 = vmul.f32 0.25, %v808_v5  ;;  %v4792_v59 = vpack.c.bf16 %v1798_v53, %v1797_v50  ;;  %4791 = vmatprep.subr.bf16.mxu0 %v4790_v47  ;;  %v1815_v4 = vld [vmem:[%s8013_s1 + $0xd0] sm:$0xff]  ;;  %v1816_v5 = vld [vmem:[%s8013_s1 + $0xd8] sm:$0xff]  ;;  %v1801_v50 = vld [vmem:[%s8013_s1 + $0x60] sm:$0xff] }
 0x1ae   :  { %v3049_v24 = vsel %vm2412_vm13, %v3048_v62, %v3044_v17  ;;  %v1088_v63 = vsel %vm379_vm0, %v263_v40, 0.0  ;;  %v247_v17 = vld [vmem:[%s8012_s0 + $0x6e0] sm:$0xff]  ;;  %v1838_v40 = vld [vmem:[%s8013_s1 + $0x188] sm:$0xff] }
 0x1af   :  { %v3058_v25 = vrot.slane %v1579_v12, %v5446_v10  ;;  %v3053_v20 = vrot.slane %v1578_v14, %v5451_v13  ;;  %954 = vadd.xlane.f32.xlu1 %v953_v6  ;;  %1083 = vadd.xlane.f32.xlu0 %v1082_v7  ;;  %v4794_v12 = vpack.c.bf16 %v1816_v5, %v1815_v4  ;;  %v1799_v14 = vld [vmem:[%s8013_s1 + $0x50] sm:$0xff]  ;;  %v1821_v53 = vld [vmem:[%s8013_s1 + $0x100] sm:$0xff] }
 0x1b0   :  { %v817_v28 = vpop.xlane.xlu1 %816  ;;  %v814_v29 = vpop.xlane.xlu0 %813  ;;  %4793 = vmatpush3.bf16.msra.mxu0 %v4792_v59  ;;  %v4796_v21 = vpack.c.bf16 %v1800_v15, %v1799_v14  ;;  %v266_v14 = vld [vmem:[%s8012_s0 + $0x778] sm:$0xff]  ;;  %v249_v15 = vld [vmem:[%s8012_s0 + $0x6f0] sm:$0xff] }
 0x1b1   :  { %v1581_v37 = vmul.f32 0.25, %v817_v28  ;;  %v1580_v39 = vmul.f32 0.25, %v814_v29  ;;  %v3054_v52 = vsel %vm2419_vm14, %v3053_v20, %v3049_v24  ;;  %v1040_v20 = vsel %vm379_vm0, %v247_v17, 0.0  ;;  %4795 = vmatprep.subr.bf16.mxu0 %v4794_v12  ;;  %v1818_v28 = vld [vmem:[%s8013_s1 + $0xe8] sm:$0xff]  ;;  %v1837_v29 = vld [vmem:[%s8013_s1 + $0x180] sm:$0xff] }
 0x1b2   :  { %v6311_v54 = vsel %vm2426_vm15, %v3058_v25, %v3054_v52  ;;  %v1091_v25 = vsel %vm379_vm0, %v264_v9, 0.0  ;;  %v4806_v47 = vpack.c.bf16 %v1838_v40, %v1837_v29  ;;  %v1802_v52 = vld [vmem:[%s8013_s1 + $0x68] sm:$0xff] }
 0x1b3   :  { %8034 = vst [vmem:[#allocation13_spill] sm:$0xff] %v6311_v54  ;;  %v3067_v56 = vrot.slane %v1581_v37, %v5325_v33  ;;  %v3063_v58 = vrot.slane %v1580_v39, %v5322_v31  ;;  %1086 = vadd.xlane.f32.xlu1 %v1085_v30  ;;  %1035 = vadd.xlane.f32.xlu0 %v1034_v32  ;;  %v248_v37 = vld [vmem:[%s8012_s0 + $0x6e8] sm:$0xff] }
 0x1b4   :  { %v823_v60 = vpop.xlane.xlu1 %822  ;;  %v820_v62 = vpop.xlane.xlu0 %819  ;;  %4797 = vmatpush3.bf16.msra.mxu0 %v4796_v21  ;;  %v4798_v39 = vpack.c.bf16 %v1818_v28, %v1817_v27  ;;  %v4800_v59 = vpack.c.bf16 %v1802_v52, %v1801_v50  ;;  %v1043_v4 = vsel %vm379_vm0, %v248_v37, 0.0  ;;  %4807 = vmatprep.subr.bf16.mxu1 %v4806_v47  ;;  %v1046_v37 = vsel %vm379_vm0, %v249_v15, 0.0  ;;  %v250_v52 = vld [vmem:[%s8012_s0 + $0x6f8] sm:$0xff]  ;;  %v284_v15 = vld [vmem:[%s8012_s0 + $0x808] sm:$0xff] }
 0x1b5   :  { %v3068_v6 = vsel %vm2328_vm1, %v3067_v56, %v3063_v58  ;;  %v1583_v7 = vmul.f32 0.25, %v823_v60  ;;  %v1582_v8 = vmul.f32 0.25, %v820_v62  ;;  %v1822_v60 = vld [vmem:[%s8013_s1 + $0x108] sm:$0xff] }
 0x1b6   :  { %4799 = vmatprep.subr.bf16.mxu0 %v4798_v39  ;;  %v4808_v5 = vpack.c.bf16 %v1822_v60, %v1821_v53  ;;  %v283_v39 = vld [vmem:[%s8012_s0 + $0x800] sm:$0xff] }
 0x1b7   :  { %v3077_v16 = vrot.slane %v1583_v7, %v5334_v41  ;;  %v3072_v19 = vrot.slane %v1582_v8, %v5329_v35  ;;  %1089 = vadd.xlane.f32.xlu1 %v1088_v63  ;;  %1038 = vadd.xlane.f32.xlu0 %v1037_v3  ;;  %v1094_v3 = vsel %vm379_vm0, %v265_v36, 0.0  ;;  %v1820_v7 = vld [vmem:[%s8013_s1 + $0xf8] sm:$0xff]  ;;  %v1839_v8 = vld [vmem:[%s8013_s1 + $0x190] sm:$0xff]  ;;  %v1097_v36 = vsel %vm379_vm0, %v266_v14, 0.0  ;;  %v1841_v53 = vld [vmem:[%s8013_s1 + $0x1a0] sm:$0xff] }
 0x1b8   :  { %v829_v22 = vpop.xlane.xlu1 %828  ;;  %v826_v24 = vpop.xlane.xlu0 %825  ;;  %4801 = vmatpush3.bf16.msra.mxu0 %v4800_v59  ;;  %4809 = vmatpush3.bf16.msra.mxu1 %v4808_v5  ;;  %v1825_v60 = vld [vmem:[%s8013_s1 + $0x120] sm:$0xff] }
 0x1b9   :  { %v3073_v30 = vsel %vm2335_vm2, %v3072_v19, %v3068_v6  ;;  %v1585_v32 = vmul.f32 0.25, %v829_v22  ;;  %v1584_v34 = vmul.f32 0.25, %v826_v24  ;;  %v1819_v6 = vld [vmem:[%s8013_s1 + $0xf0] sm:$0xff]  ;;  %v1840_v19 = vld [vmem:[%s8013_s1 + $0x198] sm:$0xff] }
 0x1ba   :  { %v3078_v42 = vsel %vm8024_vm3, %v3077_v16, %v3073_v30  ;;  %v4802_v16 = vpack.c.bf16 %v1820_v7, %v1819_v6  ;;  %v4810_v22 = vpack.c.bf16 %v1840_v19, %v1839_v8  ;;  %v1803_v24 = vld [vmem:[%s8013_s1 + $0x70] sm:$0xff]  ;;  %v1824_v30 = vld [vmem:[%s8013_s1 + $0x118] sm:$0xff]  ;;  %v1148_v6 = vsel %vm379_vm0, %v283_v39, 0.0  ;;  %v267_v8 = vld [vmem:[%s8012_s0 + $0x780] sm:$0xff] }
 0x1bb   :  { %v3087_v56 = vrot.slane %v1585_v32, %v5343_v46  ;;  %v3082_v58 = vrot.slane %v1584_v34, %v5350_v51  ;;  %1092 = vadd.xlane.f32.xlu1 %v1091_v25  ;;  %1041 = vadd.xlane.f32.xlu0 %v1040_v20  ;;  %v1804_v25 = vld [vmem:[%s8013_s1 + $0x78] sm:$0xff]  ;;  %v1823_v20 = vld [vmem:[%s8013_s1 + $0x110] sm:$0xff]  ;;  %v1049_v7 = vsel %vm379_vm0, %v250_v52, 0.0 }
 0x1bc   :  { %v835_v62 = vpop.xlane.xlu1 %834  ;;  %v832_v63 = vpop.xlane.xlu0 %831  ;;  %v4804_v29 = vpack.c.bf16 %v1804_v25, %v1803_v24  ;;  %4803 = vmatprep.subr.bf16.mxu0 %v4802_v16  ;;  %4811 = vmatprep.subr.bf16.mxu1 %v4810_v22  ;;  %v4812_v40 = vpack.c.bf16 %v1824_v30, %v1823_v20  ;;  %v1843_v16 = vld [vmem:[%s8013_s1 + $0x1b0] sm:$0xff]  ;;  %v1844_v19 = vld [vmem:[%s8013_s1 + $0x1b8] sm:$0xff]  ;;  %v1100_v30 = vsel %vm379_vm0, %v267_v8, 0.0 }
 0x1bd   :  { %v3083_v9 = vsel %vm2349_vm4, %v3082_v58, %v3078_v42  ;;  %v1587_v17 = vmul.f32 0.25, %v835_v62  ;;  %v1586_v12 = vmul.f32 0.25, %v832_v63  ;;  %v4818_v22 = vpack.c.bf16 %v1844_v19, %v1843_v16  ;;  %v1827_v24 = vld [vmem:[%s8013_s1 + $0x130] sm:$0xff] }
 0x1be   :  { %v3088_v21 = vsel %vm2356_vm5, %v3087_v56, %v3083_v9  ;;  %4805 = vmatpush3.bf16.msra.mxu0 %v4804_v29  ;;  %v1842_v56 = vld [vmem:[%s8013_s1 + $0x1a8] sm:$0xff]  ;;  %4813 = vmatpush3.bf16.msra.mxu1 %v4812_v40  ;;  %v1831_v16 = vld [vmem:[%s8013_s1 + $0x150] sm:$0xff] }
 0x1bf   :  { %v3097_v27 = vrot.slane %v1587_v17, %v5365_v0  ;;  %v3092_v28 = vrot.slane %v1586_v12, %v5368_v1  ;;  %1095 = vadd.xlane.f32.xlu1 %v1094_v3  ;;  %1044 = vadd.xlane.f32.xlu0 %v1043_v4  ;;  %v4814_v59 = vpack.c.bf16 %v1842_v56, %v1841_v53  ;;  %v1826_v3 = vld [vmem:[%s8013_s1 + $0x128] sm:$0xff]  ;;  %v1829_v56 = vld [vmem:[%s8013_s1 + $0x140] sm:$0xff] }
 0x1c0   :  { %v841_v32 = vpop.xlane.xlu1 %840  ;;  %v838_v34 = vpop.xlane.xlu0 %837  ;;  %v4816_v9 = vpack.c.bf16 %v1826_v3, %v1825_v60  ;;  %v1830_v60 = vld [vmem:[%s8013_s1 + $0x148] sm:$0xff] }
 0x1c1   :  { %v3093_v42 = vsel %vm2363_vm6, %v3092_v28, %v3088_v21  ;;  %v1589_v47 = vmul.f32 0.25, %v841_v32  ;;  %v1588_v50 = vmul.f32 0.25, %v838_v34  ;;  %4815 = vmatprep.subr.bf16.mxu1 %v4814_v59  ;;  %v1151_v32 = vsel %vm379_vm0, %v284_v15, 0.0  ;;  %v285_v34 = vld [vmem:[%s8012_s0 + $0x810] sm:$0xff] }
 0x1c2   :  { %v3098_v58 = vsel %vm2370_vm7, %v3097_v27, %v3093_v42  ;;  %4817 = vmatpush3.bf16.msra.mxu1 %v4816_v9  ;;  %v1828_v27 = vld [vmem:[%s8013_s1 + $0x138] sm:$0xff]  ;;  %v268_v42 = vld [vmem:[%s8012_s0 + $0x788] sm:$0xff]  ;;  %v1154_v3 = vsel %vm379_vm0, %v285_v34, 0.0 }
 0x1c3   :  { %v3107_v62 = vrot.slane %v1589_v47, %v5386_v18  ;;  %v3102_v63 = vrot.slane %v1588_v50, %v5392_v23  ;;  %1098 = vadd.xlane.f32.xlu1 %v1097_v36  ;;  %1047 = vadd.xlane.f32.xlu0 %v1046_v37  ;;  %v4820_v36 = vpack.c.bf16 %v1828_v27, %v1827_v24  ;;  %v1845_v47 = vld [vmem:[%s8013_s1 + $0x1c0] sm:$0xff]  ;;  %v1846_v50 = vld [vmem:[%s8013_s1 + $0x1c8] sm:$0xff]  ;;  %v1832_v24 = vld [vmem:[%s8013_s1 + $0x158] sm:$0xff] }
 0x1c4   :  { %v847_v4 = vpop.xlane.xlu1 %846  ;;  %v844_v5 = vpop.xlane.xlu0 %843  ;;  %4819 = vmatprep.subr.bf16.mxu1 %v4818_v22  ;;  %v4822_v53 = vpack.c.bf16 %v1846_v50, %v1845_v47  ;;  %v1833_v47 = vld [vmem:[%s8013_s1 + $0x160] sm:$0xff] }
 0x1c5   :  { %v3103_v17 = vsel %vm2377_vm8, %v3102_v63, %v3098_v58  ;;  %v1591_v12 = vmul.f32 0.25, %v847_v4  ;;  %v1590_v14 = vmul.f32 0.25, %v844_v5  ;;  %v1103_v4 = vsel %vm379_vm0, %v268_v42, 0.0  ;;  %v286_v5 = vld [vmem:[%s8012_s0 + $0x818] sm:$0xff] }
 0x1c6   :  { %v3108_v21 = vsel %vm2384_vm9, %v3107_v62, %v3103_v17  ;;  %4821 = vmatpush3.bf16.msra.mxu1 %v4820_v36  ;;  %v269_v17 = vld [vmem:[%s8012_s0 + $0x790] sm:$0xff]  ;;  %v1157_v27 = vsel %vm379_vm0, %v286_v5, 0.0  ;;  %v270_v36 = vld [vmem:[%s8012_s0 + $0x798] sm:$0xff] }
 0x1c7   :  { %v3117_v25 = vrot.slane %v1591_v12, %v5406_v38  ;;  %v3112_v20 = vrot.slane %v1590_v14, %v5412_v43  ;;  %1149 = vadd.xlane.f32.xlu1 %v1148_v6  ;;  %1050 = vadd.xlane.f32.xlu0 %v1049_v7  ;;  %v4824_v6 = vpack.c.bf16 %v1830_v60, %v1829_v56  ;;  %v1847_v12 = vld [vmem:[%s8013_s1 + $0x1d0] sm:$0xff]  ;;  %v1848_v14 = vld [vmem:[%s8013_s1 + $0x1d8] sm:$0xff]  ;;  %v1834_v56 = vld [vmem:[%s8013_s1 + $0x168] sm:$0xff] }
 0x1c8   :  { %v853_v28 = vpop.xlane.xlu1 %852  ;;  %v850_v29 = vpop.xlane.xlu0 %849  ;;  %4823 = vmatprep.subr.bf16.mxu1 %v4822_v53  ;;  %v4826_v15 = vpack.c.bf16 %v1848_v14, %v1847_v12 }
 0x1c9   :  { %v3113_v37 = vsel %vm2391_vm10, %v3112_v20, %v3108_v21  ;;  %v1593_v39 = vmul.f32 0.25, %v853_v28  ;;  %v1592_v40 = vmul.f32 0.25, %v850_v29  ;;  %v1106_v28 = vsel %vm379_vm0, %v269_v17, 0.0  ;;  %v287_v29 = vld [vmem:[%s8012_s0 + $0x820] sm:$0xff]  ;;  %v1835_v17 = vld [vmem:[%s8013_s1 + $0x170] sm:$0xff] }
 0x1ca   :  { %v3118_v52 = vsel %vm2398_vm11, %v3117_v25, %v3113_v37  ;;  %4825 = vmatpush3.bf16.msra.mxu1 %v4824_v6  ;;  %v1849_v37 = vld [vmem:[%s8013_s1 + $0x1e0] sm:$0xff]  ;;  %v1160_v60 = vsel %vm379_vm0, %v287_v29, 0.0 }
 0x1cb   :  { %v3127_v58 = vrot.slane %v1593_v39, %v5426_v57  ;;  %v3122_v59 = vrot.slane %v1592_v40, %v5432_v61  ;;  %1101 = vadd.xlane.f32.xlu1 %v1100_v30  ;;  %1152 = vadd.xlane.f32.xlu0 %v1151_v32  ;;  %v4828_v30 = vpack.c.bf16 %v1832_v24, %v1831_v16  ;;  %v1850_v39 = vld [vmem:[%s8013_s1 + $0x1e8] sm:$0xff]  ;;  %v271_v6 = vld [vmem:[%s8012_s0 + $0x7a0] sm:$0xff] }
 0x1cc   :  { %v859_v62 = vpop.xlane.xlu1 %858  ;;  %v856_v63 = vpop.xlane.xlu0 %855  ;;  %4827 = vmatprep.subr.bf16.mxu1 %v4826_v15  ;;  %v4830_v42 = vpack.c.bf16 %v1850_v39, %v1849_v37  ;;  %v1836_v15 = vld [vmem:[%s8013_s1 + $0x178] sm:$0xff] }
 0x1cd   :  { %v3123_v7 = vsel %vm2405_vm12, %v3122_v59, %v3118_v52  ;;  %v1595_v8 = vmul.f32 0.25, %v859_v62  ;;  %v1594_v9 = vmul.f32 0.25, %v856_v63  ;;  %v1109_v62 = vsel %vm379_vm0, %v270_v36, 0.0  ;;  %v288_v63 = vld [vmem:[%s8012_s0 + $0x828] sm:$0xff] }
 0x1ce   :  { %v3128_v19 = vsel %vm2412_vm13, %v3127_v58, %v3123_v7  ;;  %4829 = vmatpush3.bf16.msra.mxu1 %v4828_v30  ;;  %v1851_v7 = vld [vmem:[%s8013_s1 + $0x1f0] sm:$0xff]  ;;  %v4836_v24 = vpack.c.bf16 %v1836_v15, %v1835_v17 }
 0x1cf   :  { %v3137_v21 = vrot.slane %v1595_v8, %v5446_v10  ;;  %v3132_v22 = vrot.slane %v1594_v9, %v5451_v13  ;;  %1155 = vadd.xlane.f32.xlu1 %v1154_v3  ;;  %1104 = vadd.xlane.f32.xlu0 %v1103_v4  ;;  %v4832_v3 = vpack.c.bf16 %v1834_v56, %v1833_v47  ;;  %v1852_v8 = vld [vmem:[%s8013_s1 + $0x1f8] sm:$0xff] }
 0x1d0   :  { %v865_v25 = vpop.xlane.xlu1 %864  ;;  %v862_v20 = vpop.xlane.xlu0 %861  ;;  %4831 = vmatprep.subr.bf16.mxu1 %v4830_v42  ;;  %v4834_v9 = vpack.c.bf16 %v1852_v8, %v1851_v7  ;;  %v290_v8 = vld [vmem:[%s8012_s0 + $0x838] sm:$0xff] }
 0x1d1   :  { %v1597_v32 = vmul.f32 0.25, %v865_v25  ;;  %v1596_v34 = vmul.f32 0.25, %v862_v20  ;;  %v3133_v40 = vsel %vm2419_vm14, %v3132_v22, %v3128_v19  ;;  %v1112_v22 = vsel %vm379_vm0, %v271_v6, 0.0 }
 0x1d2   :  { %v6525_v50 = vsel %vm2426_vm15, %v3137_v21, %v3133_v40  ;;  %4833 = vmatpush3.bf16.msra.mxu1 %v4832_v3  ;;  %v1163_v21 = vsel %vm379_vm0, %v288_v63, 0.0 }
 0x1d3   :  { %8035 = vst [vmem:[#allocation14_spill] sm:$0xff] %v6525_v50  ;;  %v3146_v52 = vrot.slane %v1597_v32, %v5325_v33  ;;  %v3142_v53 = vrot.slane %v1596_v34, %v5322_v31  ;;  %1158 = vadd.xlane.f32.xlu1 %v1157_v27  ;;  %1107 = vadd.xlane.f32.xlu0 %v1106_v28  ;;  %v289_v27 = vld [vmem:[%s8012_s0 + $0x830] sm:$0xff]  ;;  %v272_v28 = vld [vmem:[%s8012_s0 + $0x7a8] sm:$0xff] }
 0x1d4   :  { %v958_v58 = vpop.xlane.xlu1 %957  ;;  %v868_v59 = vpop.xlane.xlu0 %867  ;;  %4835 = vmatprep.subr.bf16.mxu1 %v4834_v9  ;;  %v1166_v37 = vsel %vm379_vm0, %v289_v27, 0.0  ;;  %v1115_v39 = vsel %vm379_vm0, %v272_v28, 0.0  ;;  %v273_v9 = vld [vmem:[%s8012_s0 + $0x7b0] sm:$0xff]  ;;  %v300_v27 = vld [vmem:[%s8012_s0 + $0x888] sm:$0xff]  ;;  %v299_v28 = vld [vmem:[%s8012_s0 + $0x880] sm:$0xff] }
 0x1d5   :  { %v3147_v4 = vsel %vm2328_vm1, %v3146_v52, %v3142_v53  ;;  %v1598_v5 = vmul.f32 0.25, %v868_v59  ;;  %v1628_v12 = vmul.f32 0.25, %v958_v58  ;;  %v316_v52 = vld [vmem:[%s8012_s0 + $0x908] sm:$0xff]  ;;  %v315_v53 = vld [vmem:[%s8012_s0 + $0x900] sm:$0xff] }
 0x1d6   :  { %4837 = vmatpush3.bf16.msra.mxu1 %v4836_v24  ;;  %v1247_v63 = vsel %vm379_vm0, %v316_v52, 0.0  ;;  %v1244_v3 = vsel %vm379_vm0, %v315_v53, 0.0  ;;  %v274_v52 = vld [vmem:[%s8012_s0 + $0x7b8] sm:$0xff]  ;;  %v317_v53 = vld [vmem:[%s8012_s0 + $0x910] sm:$0xff] }
 0x1d7   :  { %v3151_v14 = vrot.slane %v1598_v5, %v5329_v35  ;;  %1161 = vadd.xlane.f32.xlu1 %v1160_v60  ;;  %1110 = vadd.xlane.f32.xlu0 %v1109_v62  ;;  %v3300_v29 = vrot.slane %v1628_v12, %v5322_v31 }
 0x1d8   :  { %v910_v16 = vpop.xlane.xlu1 %909  ;;  %v961_v19 = vpop.xlane.xlu0 %960 }
 0x1d9   :  { %v6557_v25 = vsel %vm2335_vm2, %v3151_v14, %v3147_v4  ;;  %v1629_v20 = vmul.f32 0.25, %v961_v19  ;;  %v1612_v30 = vmul.f32 0.25, %v910_v16  ;;  %v1169_v16 = vsel %vm379_vm0, %v290_v8, 0.0  ;;  %v291_v8 = vld [vmem:[%s8012_s0 + $0x840] sm:$0xff] }
 0x1da   :  { %8036 = vst [vmem:[#allocation15_spill] sm:$0xff] %v6557_v25  ;;  %v1118_v19 = vsel %vm379_vm0, %v273_v9, 0.0 }
 0x1db   :  { %v3304_v32 = vrot.slane %v1629_v20, %v5325_v33  ;;  %1164 = vadd.xlane.f32.xlu1 %v1163_v21  ;;  %1113 = vadd.xlane.f32.xlu0 %v1112_v22  ;;  %v3221_v56 = vrot.slane %v1612_v30, %v5322_v31 }
 0x1dc   :  { %v964_v34 = vpop.xlane.xlu1 %963  ;;  %v913_v36 = vpop.xlane.xlu0 %912 }
 0x1dd   :  { %v3305_v40 = vsel %vm2328_vm1, %v3304_v32, %v3300_v29  ;;  %v1630_v42 = vmul.f32 0.25, %v964_v34  ;;  %v1613_v47 = vmul.f32 0.25, %v913_v36  ;;  %v1199_v36 = vsel %vm379_vm0, %v300_v27, 0.0  ;;  %v318_v27 = vld [vmem:[%s8012_s0 + $0x918] sm:$0xff] }
 0x1df   :  { %v3309_v58 = vrot.slane %v1630_v42, %v5329_v35  ;;  %v3225_v59 = vrot.slane %v1613_v47, %v5325_v33  ;;  %1167 = vadd.xlane.f32.xlu1 %v1166_v37  ;;  %1116 = vadd.xlane.f32.xlu0 %v1115_v39  ;;  %v1196_v37 = vsel %vm379_vm0, %v299_v28, 0.0 }
 0x1e0   :  { %v967_v60 = vpop.xlane.xlu1 %966  ;;  %v916_v62 = vpop.xlane.xlu0 %915 }
 0x1e1   :  { %v3310_v4 = vsel %vm2335_vm2, %v3309_v58, %v3305_v40  ;;  %v3226_v5 = vsel %vm2328_vm1, %v3225_v59, %v3221_v56  ;;  %v1631_v6 = vmul.f32 0.25, %v967_v60  ;;  %v1614_v7 = vmul.f32 0.25, %v916_v62 }
 0x1e2   :  { %v1121_v62 = vsel %vm379_vm0, %v274_v52, 0.0 }
 0x1e3   :  { %v3314_v17 = vrot.slane %v1631_v6, %v5334_v41  ;;  %v3230_v12 = vrot.slane %v1614_v7, %v5329_v35  ;;  %1248 = vadd.xlane.f32.xlu1 %v1247_v63  ;;  %1245 = vadd.xlane.f32.xlu0 %v1244_v3  ;;  %v1250_v63 = vsel %vm379_vm0, %v317_v53, 0.0  ;;  %v301_v7 = vld [vmem:[%s8012_s0 + $0x890] sm:$0xff] }
 0x1e4   :  { %v970_v14 = vpop.xlane.xlu1 %969  ;;  %v919_v15 = vpop.xlane.xlu0 %918 }
 0x1e5   :  { %v3315_v21 = vsel %vm8024_vm3, %v3314_v17, %v3310_v4  ;;  %v3231_v22 = vsel %vm2335_vm2, %v3230_v12, %v3226_v5  ;;  %v1632_v24 = vmul.f32 0.25, %v970_v14  ;;  %v1615_v20 = vmul.f32 0.25, %v919_v15 }
 0x1e6   :  { %v1202_v15 = vsel %vm379_vm0, %v301_v7, 0.0 }
 0x1e7   :  { %v3319_v29 = vrot.slane %v1632_v24, %v5350_v51  ;;  %v3235_v30 = vrot.slane %v1615_v20, %v5334_v41  ;;  %1170 = vadd.xlane.f32.xlu1 %v1169_v16  ;;  %1119 = vadd.xlane.f32.xlu0 %v1118_v19  ;;  %v1172_v16 = vsel %vm379_vm0, %v291_v8, 0.0  ;;  %v275_v20 = vld [vmem:[%s8012_s0 + $0x7c0] sm:$0xff] }
 0x1e8   :  { %v973_v32 = vpop.xlane.xlu1 %972  ;;  %v922_v34 = vpop.xlane.xlu0 %921 }
 0x1e9   :  { %v3320_v39 = vsel %vm2349_vm4, %v3319_v29, %v3315_v21  ;;  %v3236_v40 = vsel %vm8024_vm3, %v3235_v30, %v3231_v22  ;;  %v1633_v42 = vmul.f32 0.25, %v973_v32  ;;  %v1616_v47 = vmul.f32 0.25, %v922_v34 }
 0x1ea   :  { %v1124_v34 = vsel %vm379_vm0, %v275_v20, 0.0 }
 0x1eb   :  { %v3324_v56 = vrot.slane %v1633_v42, %v5343_v46  ;;  %v3240_v58 = vrot.slane %v1616_v47, %v5350_v51  ;;  %1200 = vadd.xlane.f32.xlu1 %v1199_v36  ;;  %1197 = vadd.xlane.f32.xlu0 %v1196_v37  ;;  %v1253_v36 = vsel %vm379_vm0, %v318_v27, 0.0  ;;  %v292_v42 = vld [vmem:[%s8012_s0 + $0x848] sm:$0xff] }
 0x1ec   :  { %v976_v59 = vpop.xlane.xlu1 %975  ;;  %v925_v60 = vpop.xlane.xlu0 %924 }
 0x1ed   :  { %v3325_v3 = vsel %vm2356_vm5, %v3324_v56, %v3320_v39  ;;  %v3241_v4 = vsel %vm2349_vm4, %v3240_v58, %v3236_v40  ;;  %v1634_v5 = vmul.f32 0.25, %v976_v59  ;;  %v1617_v6 = vmul.f32 0.25, %v925_v60  ;;  %v302_v40 = vld [vmem:[%s8012_s0 + $0x898] sm:$0xff] }
 0x1ee   :  { %v1205_v56 = vsel %vm379_vm0, %v302_v40, 0.0  ;;  %v1175_v58 = vsel %vm379_vm0, %v292_v42, 0.0 }
 0x1ef   :  { %v3329_v9 = vrot.slane %v1634_v5, %v5368_v1  ;;  %v3245_v17 = vrot.slane %v1617_v6, %v5343_v46  ;;  %1122 = vadd.xlane.f32.xlu1 %v1121_v62  ;;  %1251 = vadd.xlane.f32.xlu0 %v1250_v63  ;;  %v276_v63 = vld [vmem:[%s8012_s0 + $0x7c8] sm:$0xff] }
 0x1f0   :  { %v1057_v12 = vpop.xlane.xlu1 %1056  ;;  %v1054_v14 = vpop.xlane.xlu0 %1053  ;;  %v1127_v8 = vsel %vm379_vm0, %v276_v63, 0.0 }
 0x1f1   :  { %v6630_v19 = vsel %vm2363_vm6, %v3329_v9, %v3325_v3  ;;  %v3246_v21 = vsel %vm2356_vm5, %v3245_v17, %v3241_v4  ;;  %v1661_v22 = vmul.f32 0.25, %v1057_v12  ;;  %v1660_v24 = vmul.f32 0.25, %v1054_v14  ;;  %v319_v3 = vld [vmem:[%s8012_s0 + $0x920] sm:$0xff] }
 0x1f2   :  { %v1256_v9 = vsel %vm379_vm0, %v319_v3, 0.0  ;;  %v303_v14 = vld [vmem:[%s8012_s0 + $0x8a0] sm:$0xff] }
 0x1f3   :  { %v3462_v28 = vrot.slane %v1661_v22, %v5325_v33  ;;  %v3458_v29 = vrot.slane %v1660_v24, %v5322_v31  ;;  %1203 = vadd.xlane.f32.xlu1 %v1202_v15  ;;  %1173 = vadd.xlane.f32.xlu0 %v1172_v16  ;;  %v293_v15 = vld [vmem:[%s8012_s0 + $0x850] sm:$0xff]  ;;  %v1208_v24 = vsel %vm379_vm0, %v303_v14, 0.0 }
 0x1f4   :  { %v6641_v30 = vpop.xlane.xlu1 %978  ;;  %v928_v32 = vpop.xlane.xlu0 %927  ;;  %v1178_v20 = vsel %vm379_vm0, %v293_v15, 0.0 }
 0x1f5   :  { %v3463_v37 = vsel %vm2328_vm1, %v3462_v28, %v3458_v29  ;;  %v1618_v39 = vmul.f32 0.25, %v928_v32  ;;  %v277_v29 = vld [vmem:[%s8012_s0 + $0x7d0] sm:$0xff]  ;;  %v320_v32 = vld [vmem:[%s8012_s0 + $0x928] sm:$0xff] }
 0x1f6   :  { %v1130_v40 = vsel %vm379_vm0, %v277_v29, 0.0  ;;  %v279_v29 = vld [vmem:[%s8012_s0 + $0x7e0] sm:$0xff] }
 0x1f7   :  { %v3250_v47 = vrot.slane %v1618_v39, %v5368_v1  ;;  %1125 = vadd.xlane.f32.xlu1 %v1124_v34  ;;  %1254 = vadd.xlane.f32.xlu0 %v1253_v36 }
 0x1f8   :  { %v1009_v52 = vpop.xlane.xlu1 %1008  ;;  %v1006_v53 = vpop.xlane.xlu0 %1005 }
 0x1f9   :  { %v6656_v59 = vsel %vm2363_vm6, %v3250_v47, %v3246_v21  ;;  %v1645_v60 = vmul.f32 0.25, %v1009_v52  ;;  %v1644_v62 = vmul.f32 0.25, %v1006_v53  ;;  %v304_v52 = vld [vmem:[%s8012_s0 + $0x8a8] sm:$0xff]  ;;  %v294_v53 = vld [vmem:[%s8012_s0 + $0x858] sm:$0xff] }
 0x1fa   :  { %v1181_v63 = vsel %vm379_vm0, %v294_v53, 0.0 }
 0x1fb   :  { %v3383_v4 = vrot.slane %v1645_v60, %v5325_v33  ;;  %v3379_v5 = vrot.slane %v1644_v62, %v5322_v31  ;;  %1206 = vadd.xlane.f32.xlu1 %v1205_v56  ;;  %1176 = vadd.xlane.f32.xlu0 %v1175_v58  ;;  %v1211_v62 = vsel %vm379_vm0, %v304_v52, 0.0 }
 0x1fc   :  { %v6666_v6 = vpop.xlane.xlu1 %930  ;;  %v1060_v7 = vpop.xlane.xlu0 %1059 }
 0x1fd   :  { %v3384_v17 = vsel %vm2328_vm1, %v3383_v4, %v3379_v5  ;;  %v1662_v12 = vmul.f32 0.25, %v1060_v7  ;;  %v278_v5 = vld [vmem:[%s8012_s0 + $0x7d8] sm:$0xff]  ;;  %v321_v7 = vld [vmem:[%s8012_s0 + $0x930] sm:$0xff] }
 0x1fe   :  { %v1262_v14 = vsel %vm379_vm0, %v321_v7, 0.0 }
 0x1ff   :  { %v3467_v16 = vrot.slane %v1662_v12, %v5329_v35  ;;  %1128 = vadd.xlane.f32.xlu1 %v1127_v8  ;;  %1257 = vadd.xlane.f32.xlu0 %v1256_v9  ;;  %v1133_v12 = vsel %vm379_vm0, %v278_v5, 0.0 }
 0x200   :  { %v1012_v21 = vpop.xlane.xlu1 %1011  ;;  %v6678_v22 = vpop.xlane.xlu0 %981 }
 0x201   :  { %v3468_v27 = vsel %vm2335_vm2, %v3467_v16, %v3463_v37  ;;  %v1646_v28 = vmul.f32 0.25, %v1012_v21  ;;  %v1259_v37 = vsel %vm379_vm0, %v320_v32, 0.0  ;;  %v305_v16 = vld [vmem:[%s8012_s0 + $0x8b0] sm:$0xff]  ;;  %v295_v21 = vld [vmem:[%s8012_s0 + $0x860] sm:$0xff]  ;;  %v322_v32 = vld [vmem:[%s8012_s0 + $0x938] sm:$0xff] }
 0x203   :  { %v3388_v34 = vrot.slane %v1646_v28, %v5329_v35  ;;  %1209 = vadd.xlane.f32.xlu1 %v1208_v24  ;;  %1179 = vadd.xlane.f32.xlu0 %v1178_v20  ;;  %v1184_v28 = vsel %vm379_vm0, %v295_v21, 0.0 }
 0x204   :  { %v6690_v36 = vpop.xlane.xlu1 %933  ;;  %v1063_v39 = vpop.xlane.xlu0 %1062 }
 0x205   :  { %v3389_v42 = vsel %vm2335_vm2, %v3388_v34, %v3384_v17  ;;  %v1663_v47 = vmul.f32 0.25, %v1063_v39 }
 0x207   :  { %v3472_v56 = vrot.slane %v1663_v47, %v5334_v41  ;;  %1131 = vadd.xlane.f32.xlu1 %v1130_v40  ;;  %1260 = vadd.xlane.f32.xlu0 %v1259_v37  ;;  %v1136_v40 = vsel %vm379_vm0, %v279_v29, 0.0  ;;  %v1265_v37 = vsel %vm379_vm0, %v322_v32, 0.0  ;;  %v296_v47 = vld [vmem:[%s8012_s0 + $0x868] sm:$0xff]  ;;  %v281_v29 = vld [vmem:[%s8012_s0 + $0x7f0] sm:$0xff] }
 0x208   :  { %v1015_v58 = vpop.xlane.xlu1 %1014  ;;  %v6702_v60 = vpop.xlane.xlu0 %984  ;;  %v324_v32 = vld [vmem:[%s8012_s0 + $0x948] sm:$0xff] }
 0x209   :  { %v6707_v3 = vsel %vm8024_vm3, %v3472_v56, %v3468_v27  ;;  %v1647_v4 = vmul.f32 0.25, %v1015_v58  ;;  %v1214_v27 = vsel %vm379_vm0, %v305_v16, 0.0  ;;  %v1187_v58 = vsel %vm379_vm0, %v296_v47, 0.0 }
 0x20b   :  { %v3393_v8 = vrot.slane %v1647_v4, %v5334_v41  ;;  %1212 = vadd.xlane.f32.xlu1 %v1211_v62  ;;  %1182 = vadd.xlane.f32.xlu0 %v1181_v63  ;;  %v280_v62 = vld [vmem:[%s8012_s0 + $0x7e8] sm:$0xff]  ;;  %v323_v63 = vld [vmem:[%s8012_s0 + $0x940] sm:$0xff] }
 0x20c   :  { %v6716_v9 = vpop.xlane.xlu1 %936  ;;  %v6718_v17 = vpop.xlane.xlu0 %1065  ;;  %v1139_v7 = vsel %vm379_vm0, %v280_v62, 0.0  ;;  %v1271_v62 = vsel %vm379_vm0, %v324_v32, 0.0 }
 0x20d   :  { %v6723_v15 = vsel %vm8024_vm3, %v3393_v8, %v3389_v42  ;;  %v306_v42 = vld [vmem:[%s8012_s0 + $0x8b8] sm:$0xff]  ;;  %v1268_v8 = vsel %vm379_vm0, %v323_v63, 0.0  ;;  %v308_v63 = vld [vmem:[%s8012_s0 + $0x8c8] sm:$0xff]  ;;  %vm8025_vm3 = vcmask 1041409  }
 0x20e   :  { %v1217_v56 = vsel %vm379_vm0, %v306_v42, 0.0 }
 0x20f   :  { %1134 = vadd.xlane.f32.xlu1 %v1133_v12  ;;  %1263 = vadd.xlane.f32.xlu0 %v1262_v14  ;;  %v307_v12 = vld [vmem:[%s8012_s0 + $0x8c0] sm:$0xff]  ;;  %v297_v14 = vld [vmem:[%s8012_s0 + $0x870] sm:$0xff] }
 0x210   :  { %v6731_v24 = vpop.xlane.xlu1 %1017  ;;  %v6733_v20 = vpop.xlane.xlu0 %987 }
 0x211   :  { %v1638_v54 = vmul.f32 0.25, %v6733_v20 }
 0x213   :  { %1215 = vadd.xlane.f32.xlu1 %v1214_v27  ;;  %1185 = vadd.xlane.f32.xlu0 %v1184_v28  ;;  %v1220_v27 = vsel %vm379_vm0, %v307_v12, 0.0  ;;  %v1190_v28 = vsel %vm379_vm0, %v297_v14, 0.0  ;;  %v1223_v14 = vsel %vm379_vm0, %v308_v63, 0.0  ;;  %v309_v63 = vld [vmem:[%s8012_s0 + $0x8d0] sm:$0xff] }
 0x214   :  { %v6743_v34 = vpop.xlane.xlu1 %939  ;;  %v6745_v39 = vpop.xlane.xlu0 %1068  ;;  %v1226_v26 = vsel %vm379_vm0, %v309_v63, 0.0 }
 0x215   :  { %v1622_v35 = vmul.f32 0.25, %v6743_v34 }
 0x217   :  { %1137 = vadd.xlane.f32.xlu1 %v1136_v40  ;;  %1266 = vadd.xlane.f32.xlu0 %v1265_v37  ;;  %v1869_v40 = vld [vmem:[%s8013_s1 + $0x280] sm:$0xff]  ;;  %v1870_v37 = vld [vmem:[%s8013_s1 + $0x288] sm:$0xff] }
 0x218   :  { %v6755_v52 = vpop.xlane.xlu1 %1020  ;;  %v6757_v53 = vpop.xlane.xlu0 %990  ;;  %v4838_v42 = vpack.c.bf16 %v1870_v37, %v1869_v40 }
 0x21a   :  { %4839 = vmatprep.subr.bf16.mxu0 %v4838_v42 }
 0x21b   :  { %1218 = vadd.xlane.f32.xlu1 %v1217_v56  ;;  %1188 = vadd.xlane.f32.xlu0 %v1187_v58  ;;  %v1142_v58 = vsel %vm379_vm0, %v281_v29, 0.0  ;;  %v325_v29 = vld [vmem:[%s8012_s0 + $0x950] sm:$0xff] }
 0x21c   :  { %v6767_v4 = vpop.xlane.xlu1 %942  ;;  %v6769_v5 = vpop.xlane.xlu0 %1071  ;;  %v1274_v42 = vsel %vm379_vm0, %v325_v29, 0.0  ;;  %v328_v29 = vld [vmem:[%s8012_s0 + $0x968] sm:$0xff] }
 0x21d   :  { %v1283_v11 = vsel %vm379_vm0, %v328_v29, 0.0 }
 0x21f   :  { %1140 = vadd.xlane.f32.xlu1 %v1139_v7  ;;  %1269 = vadd.xlane.f32.xlu0 %v1268_v8  ;;  %v298_v7 = vld [vmem:[%s8012_s0 + $0x878] sm:$0xff] }
 0x220   :  { %v6779_v16 = vpop.xlane.xlu1 %1023  ;;  %v994_v21 = vpop.xlane.xlu0 %993 }
 0x221   :  { %v1640_v2 = vmul.f32 0.25, %v994_v21 }
 0x223   :  { %1221 = vadd.xlane.f32.xlu1 %v1220_v27  ;;  %1191 = vadd.xlane.f32.xlu0 %v1190_v28  ;;  %v1193_v27 = vsel %vm379_vm0, %v298_v7, 0.0  ;;  %v282_v28 = vld [vmem:[%s8012_s0 + $0x7f8] sm:$0xff]  ;;  %v327_v7 = vld [vmem:[%s8012_s0 + $0x960] sm:$0xff] }
 0x224   :  { %v6795_v47 = vpop.xlane.xlu1 %945  ;;  %v6797_v56 = vpop.xlane.xlu0 %1074  ;;  %v1145_v37 = vsel %vm379_vm0, %v282_v28, 0.0  ;;  %v1637_v28 = vmul.f32 0.25, %v6702_v60  ;;  %v1280_v48 = vsel %vm379_vm0, %v327_v7, 0.0  ;;  %v1621_v7 = vmul.f32 0.25, %v6716_v9 }
 0x226   :  { %v3265_v34 = vrot.slane %v1621_v7, %v5386_v18 }
 0x227   :  { %1143 = vadd.xlane.f32.xlu1 %v1142_v58  ;;  %1272 = vadd.xlane.f32.xlu0 %v1271_v62  ;;  %v1635_v58 = vmul.f32 0.25, %v6641_v30  ;;  %v326_v62 = vld [vmem:[%s8012_s0 + $0x958] sm:$0xff]  ;;  %v1619_v30 = vmul.f32 0.25, %v6666_v6  ;;  %v311_v6 = vld [vmem:[%s8012_s0 + $0x8e0] sm:$0xff] }
 0x228   :  { %v6807_v8 = vpop.xlane.xlu1 %1026  ;;  %v997_v12 = vpop.xlane.xlu0 %996 }
 0x229   :  { %v3334_v60 = vrot.slane %v1635_v58, %v5365_v0  ;;  %v3255_v41 = vrot.slane %v1619_v30, %v5365_v0  ;;  %v3344_v58 = vrot.slane %v1637_v28, %v5386_v18  ;;  %v1623_v30 = vmul.f32 0.25, %v6767_v4 }
 0x22a   :  { %v1624_v28 = vmul.f32 0.25, %v6795_v47 }
 0x22b   :  { %1224 = vadd.xlane.f32.xlu1 %v1223_v14  ;;  %1194 = vadd.xlane.f32.xlu0 %v1193_v27  ;;  %v1636_v14 = vmul.f32 0.25, %v6678_v22  ;;  %v310_v27 = vld [vmem:[%s8012_s0 + $0x8d8] sm:$0xff]  ;;  %v1277_v22 = vsel %vm379_vm0, %v326_v62, 0.0  ;;  %v329_v62 = vld [vmem:[%s8012_s0 + $0x970] sm:$0xff]  ;;  %v3335_v21 = vsel %vm2370_vm7, %v3334_v60, %v6630_v19  ;;  %v3256_v29 = vsel %vm2370_vm7, %v3255_v41, %v6656_v59 }
 0x22c   :  { %v949_v32 = vpop.xlane.xlu1 %948  ;;  %v6817_v40 = vpop.xlane.xlu0 %1077  ;;  %v1229_v20 = vsel %vm379_vm0, %v310_v27, 0.0  ;;  %v3349_v27 = vrot.slane %v1638_v54, %v5412_v43  ;;  %v6867_v9 = vsel %vm379_vm0, %v329_v62, 0.0  ;;  %v3270_v60 = vrot.slane %v1622_v35, %v5412_v43  ;;  %v1901_v35 = vld [vmem:[%s8013_s1 + $0x380] sm:$0xff] }
 0x22d   :  { %v3339_v63 = vrot.slane %v1636_v14, %v5392_v23  ;;  %v3275_v59 = vrot.slane %v1623_v30, %v5406_v38  ;;  %v3280_v7 = vrot.slane %v1624_v28, %v5432_v61 }
 0x22f   :  { %1146 = vadd.xlane.f32.xlu1 %v1145_v37  ;;  %1275 = vadd.xlane.f32.xlu0 %v1274_v42  ;;  %v1620_v37 = vmul.f32 0.25, %v6690_v36  ;;  %v1639_v42 = vmul.f32 0.25, %v6757_v53  ;;  %v1641_v36 = vmul.f32 0.25, %v997_v12  ;;  %v1232_v53 = vsel %vm379_vm0, %v311_v6, 0.0 }
 0x230   :  { %v6841_v50 = vpop.xlane.xlu1 %1029  ;;  %v1000_v25 = vpop.xlane.xlu0 %999  ;;  %v3340_v54 = vsel %vm2377_vm8, %v3339_v63, %v3335_v21  ;;  %v1625_v6 = vmul.f32 0.25, %v949_v32 }
 0x231   :  { %v1642_v33 = vmul.f32 0.25, %v1000_v25  ;;  %v3260_v12 = vrot.slane %v1620_v37, %v5392_v23  ;;  %v3359_v25 = vrot.slane %v1640_v2, %v5432_v61  ;;  %v3364_v19 = vrot.slane %v1641_v36, %v5426_v57 }
 0x233   :  { %1278 = vadd.xlane.f32.xlu1 %v1277_v22  ;;  %1227 = vadd.xlane.f32.xlu0 %v1226_v26  ;;  %v3354_v26 = vrot.slane %v1639_v42, %v5406_v38  ;;  %v3345_v22 = vsel %vm2384_vm9, %v3344_v58, %v3340_v54  ;;  %v3369_v37 = vrot.slane %v1642_v33, %v5451_v13  ;;  %v1902_v33 = vld [vmem:[%s8013_s1 + $0x388] sm:$0xff]  ;;  %v330_v58 = vld [vmem:[%s8012_s0 + $0x978] sm:$0xff] }
 0x234   :  { %v952_v14 = vpop.xlane.xlu1 %951  ;;  %v6864_v31 = vpop.xlane.xlu0 %1080  ;;  %v3350_v4 = vsel %vm2391_vm10, %v3349_v27, %v3345_v22  ;;  %v3261_v62 = vsel %vm2377_vm8, %v3260_v12, %v3256_v29  ;;  %v4870_v36 = vpack.c.bf16 %v1902_v33, %v1901_v35  ;;  %v3285_v27 = vrot.slane %v1625_v6, %v5426_v57  ;;  %v313_v12 = vld [vmem:[%s8012_s0 + $0x8f0] sm:$0xff]  ;;  %v314_v6 = vld [vmem:[%s8012_s0 + $0x8f8] sm:$0xff] }
 0x235   :  { %v1626_v42 = vmul.f32 0.25, %v952_v14  ;;  %v3355_v41 = vsel %vm2398_vm11, %v3354_v26, %v3350_v4  ;;  %v3266_v32 = vsel %vm2384_vm9, %v3265_v34, %v3261_v62  ;;  %v1664_v4 = vmul.f32 0.25, %v6718_v17  ;;  %v1853_v62 = vld [vmem:[%s8013_s1 + $0x200] sm:$0xff]  ;;  %v1872_v35 = vld [vmem:[%s8013_s1 + $0x298] sm:$0xff] }
 0x236   :  { %v3271_v26 = vsel %vm2391_vm10, %v3270_v60, %v3266_v32  ;;  %4871 = vmatprep.subr.bf16.mxu1 %v4870_v36  ;;  %v1648_v17 = vmul.f32 0.25, %v6731_v24  ;;  %v1665_v33 = vmul.f32 0.25, %v6745_v39  ;;  %v1649_v24 = vmul.f32 0.25, %v6755_v52  ;;  %v349_v52 = vld [vmem:[%s8012_s0 + $0xa10] sm:$0xff] }
 0x237   :  { %1281 = vadd.xlane.f32.xlu1 %v1280_v48  ;;  %1230 = vadd.xlane.f32.xlu0 %v1229_v20  ;;  %v312_v48 = vld [vmem:[%s8012_s0 + $0x8e8] sm:$0xff]  ;;  %v3360_v20 = vsel %vm2405_vm12, %v3359_v25, %v3355_v41  ;;  %v3290_v30 = vrot.slane %v1626_v42, %v5451_v13  ;;  %v1238_v42 = vsel %vm379_vm0, %v313_v12, 0.0  ;;  %v1666_v36 = vmul.f32 0.25, %v6769_v5 }
 0x238   :  { %v6885_v2 = vpop.xlane.xlu1 %1032  ;;  %v1003_v47 = vpop.xlane.xlu0 %1002  ;;  %v3365_v21 = vsel %vm2412_vm13, %v3364_v19, %v3360_v20  ;;  %v1235_v25 = vsel %vm379_vm0, %v312_v48, 0.0  ;;  %v1289_v19 = vsel %vm379_vm0, %v330_v58, 0.0  ;;  %v1854_v41 = vld [vmem:[%s8013_s1 + $0x208] sm:$0xff]  ;;  %v1871_v48 = vld [vmem:[%s8013_s1 + $0x290] sm:$0xff]  ;;  %v3477_v12 = vrot.slane %v1664_v4, %v5350_v51 }
 0x239   :  { %v1643_v63 = vmul.f32 0.25, %v1003_v47  ;;  %v3370_v28 = vsel %vm2419_vm14, %v3369_v37, %v3365_v21  ;;  %v331_v47 = vld [vmem:[%s8012_s0 + $0x980] sm:$0xff]  ;;  %v348_v58 = vld [vmem:[%s8012_s0 + $0xa08] sm:$0xff]  ;;  %v4840_v21 = vpack.c.bf16 %v1854_v41, %v1853_v62 }
 0x23a   :  { %v6963_v39 = vsel %vm379_vm0, %v331_v47, 0.0  ;;  %v1668_v47 = vmul.f32 0.25, %v6817_v40  ;;  %v1858_v40 = vld [vmem:[%s8013_s1 + $0x228] sm:$0xff] }
 0x23b   :  { %v3374_v14 = vrot.slane %v1643_v63, %v5446_v10  ;;  %1284 = vadd.xlane.f32.xlu1 %v1283_v11  ;;  %1233 = vadd.xlane.f32.xlu0 %v1232_v53  ;;  %v347_v11 = vld [vmem:[%s8012_s0 + $0xa00] sm:$0xff]  ;;  %v3276_v53 = vsel %vm2398_vm11, %v3275_v59, %v3271_v26  ;;  %v1650_v26 = vmul.f32 0.25, %v6779_v16  ;;  %v1667_v16 = vmul.f32 0.25, %v6797_v56 }
 0x23c   :  { %v955_v54 = vpop.xlane.xlu1 %954  ;;  %v6913_v34 = vpop.xlane.xlu0 %1083  ;;  %v3281_v60 = vsel %vm2405_vm12, %v3280_v7, %v3276_v53  ;;  %v1340_v63 = vsel %vm379_vm0, %v347_v11, 0.0  ;;  %v1241_v7 = vsel %vm379_vm0, %v314_v6, 0.0  ;;  %v3398_v11 = vrot.slane %v1648_v17, %v5350_v51  ;;  %v1874_v6 = vld [vmem:[%s8013_s1 + $0x2a8] sm:$0xff] }
 0x23d   :  { %v1627_v29 = vmul.f32 0.25, %v955_v54  ;;  %v3375_v22 = vsel %vm2426_vm15, %v3374_v14, %v3370_v28  ;;  %v3286_v59 = vsel %vm2412_vm13, %v3285_v27, %v3281_v60  ;;  %v332_v14 = vld [vmem:[%s8012_s0 + $0x988] sm:$0xff]  ;;  %v4842_v54 = vpack.c.bf16 %v1872_v35, %v1871_v48  ;;  %v1856_v28 = vld [vmem:[%s8013_s1 + $0x218] sm:$0xff]  ;;  %v1857_v35 = vld [vmem:[%s8013_s1 + $0x220] sm:$0xff] }
 0x23e   :  { %v4089_v37 = vsel %vm8025_vm3, %v3375_v22, %v5572_v45  ;;  %v1651_v53 = vmul.f32 0.25, %v6807_v8  ;;  %v1873_v22 = vld [vmem:[%s8013_s1 + $0x2a0] sm:$0xff]  ;;  %v3482_v56 = vrot.slane %v1665_v33, %v5343_v46  ;;  %v3403_v8 = vrot.slane %v1649_v24, %v5343_v46 }
 0x23f   :  { %v3295_v45 = vrot.slane %v1627_v29, %v5446_v10  ;;  %1287 = vadd.xlane.f32.xlu1 %v6867_v9  ;;  %1236 = vadd.xlane.f32.xlu0 %v1235_v25  ;;  %v3291_v9 = vsel %vm2419_vm14, %v3290_v30, %v3286_v59  ;;  %v350_v30 = vld [vmem:[%s8012_s0 + $0xa18] sm:$0xff]  ;;  %v1855_v25 = vld [vmem:[%s8013_s1 + $0x210] sm:$0xff]  ;;  %v7000_v60 = vsel %vm379_vm0, %v349_v52, 0.0  ;;  %v3478_v17 = vsel %vm2349_vm4, %v3477_v12, %v6707_v3 }
 0x240   :  { %4174 = vmatprep.mubr.f32.mxu0 %v4089_v37  ;;  %v1087_v32 = vpop.xlane.xlu1 %1086  ;;  %v6953_v20 = vpop.xlane.xlu0 %1035  ;;  %v333_v29 = vld [vmem:[%s8012_s0 + $0x990] sm:$0xff]  ;;  %v7003_v37 = vsel %vm379_vm0, %v332_v14, 0.0  ;;  %v7008_v62 = vsel %vm379_vm0, %v350_v30, 0.0  ;;  %v4844_v41 = vpack.c.bf16 %v1856_v28, %v1855_v25  ;;  %v3408_v59 = vrot.slane %v1650_v26, %v5368_v1  ;;  %v1860_v30 = vld [vmem:[%s8013_s1 + $0x238] sm:$0xff] }
 0x241   :  { %v3296_v27 = vsel %vm2426_vm15, %v3295_v45, %v3291_v9  ;;  %v7014_v45 = vsel %vm379_vm0, %v333_v29, 0.0  ;;  %v4846_v48 = vpack.c.bf16 %v1874_v6, %v1873_v22  ;;  %v3399_v33 = vsel %vm2349_vm4, %v3398_v11, %v6723_v15 }
 0x242   :  { %v4088_v5 = vsel %vm8025_vm3, %v3296_v27, %v5475_v44  ;;  %v1343_v44 = vsel %vm379_vm0, %v348_v58, 0.0  ;;  %v3492_v3 = vrot.slane %v1667_v16, %v5365_v0  ;;  %v3413_v24 = vrot.slane %v1651_v53, %v5365_v0  ;;  %v1875_v58 = vld [vmem:[%s8013_s1 + $0x2b0] sm:$0xff]  ;;  %v1877_v53 = vld [vmem:[%s8013_s1 + $0x2c0] sm:$0xff] }
 0x243   :  { %1290 = vadd.xlane.f32.xlu1 %v1289_v19  ;;  %1239 = vadd.xlane.f32.xlu0 %v1238_v42  ;;  %v3487_v42 = vrot.slane %v1666_v36, %v5368_v1  ;;  %v1669_v9 = vmul.f32 0.25, %v6864_v31  ;;  %v1876_v36 = vld [vmem:[%s8013_s1 + $0x2b8] sm:$0xff]  ;;  %v3483_v27 = vsel %vm2356_vm5, %v3482_v56, %v3478_v17  ;;  %v3404_v15 = vsel %vm2356_vm5, %v3403_v8, %v3399_v33 }
 0x244   :  { %4175 = vmatmul.mubr.f32.vlgmr.msra.gmra.mrb[0].mxu0 %v4088_v5  ;;  %v1090_v19 = vpop.xlane.xlu1 %1089  ;;  %v1039_v4 = vpop.xlane.xlu0 %1038  ;;  %v1652_v52 = vmul.f32 0.25, %v6841_v50  ;;  %v1670_v14 = vmul.f32 0.25, %v6913_v34  ;;  %v1671_v12 = vmul.f32 0.25, %v1087_v32  ;;  %v4848_v26 = vpack.c.bf16 %v1858_v40, %v1857_v35  ;;  %v1859_v5 = vld [vmem:[%s8013_s1 + $0x230] sm:$0xff] }
 0x245   :  { %4841 = vmatpush3.bf16.msra.mxu0 %v4840_v21  ;;  %v3409_v50 = vsel %vm2363_vm6, %v3408_v59, %v3404_v15  ;;  %v1653_v34 = vmul.f32 0.25, %v6885_v2  ;;  %v4850_v25 = vpack.c.bf16 %v1876_v36, %v1875_v58  ;;  %v3502_v11 = vrot.slane %v1669_v9, %v5386_v18  ;;  %v1878_v2 = vld [vmem:[%s8013_s1 + $0x2c8] sm:$0xff]  ;;  %v1880_v9 = vld [vmem:[%s8013_s1 + $0x2d8] sm:$0xff] }
 0x246   :  { %4843 = vmatprep.subr.bf16.mxu0 %v4842_v54  ;;  %v1672_v54 = vmul.f32 0.25, %v1090_v19  ;;  %v3414_v32 = vsel %vm2370_vm7, %v3413_v24, %v3409_v50  ;;  %v3418_v29 = vrot.slane %v1652_v52, %v5392_v23  ;;  %v3507_v22 = vrot.slane %v1670_v14, %v5412_v43  ;;  %v1863_v50 = vld [vmem:[%s8013_s1 + $0x250] sm:$0xff] }
 0x247   :  { %1341 = vadd.xlane.f32.xlu1 %v1340_v63  ;;  %1242 = vadd.xlane.f32.xlu0 %v1241_v7  ;;  %v3488_v63 = vsel %vm2363_vm6, %v3487_v42, %v3483_v27  ;;  %v3497_v7 = vrot.slane %v1668_v47, %v5392_v23  ;;  %v1654_v6 = vmul.f32 0.25, %v6953_v20  ;;  %v4852_v19 = vpack.c.bf16 %v1860_v30, %v1859_v5 }
 0x248   :  { %v1093_v21 = vpop.xlane.xlu1 %1092  ;;  %v1042_v31 = vpop.xlane.xlu0 %1041  ;;  %v3493_v28 = vsel %vm2370_vm7, %v3492_v3, %v3488_v63  ;;  %v3512_v47 = vrot.slane %v1671_v12, %v5406_v38  ;;  %v3423_v20 = vrot.slane %v1653_v34, %v5386_v18  ;;  %v3517_v59 = vrot.slane %v1672_v54, %v5432_v61  ;;  %v1864_v34 = vld [vmem:[%s8013_s1 + $0x258] sm:$0xff] }
 0x249   :  { %4845 = vmatpush3.bf16.msra.mxu0 %v4844_v41  ;;  %v1673_v16 = vmul.f32 0.25, %v1093_v21  ;;  %v3498_v42 = vsel %vm2377_vm8, %v3497_v7, %v3493_v28  ;;  %v1655_v41 = vmul.f32 0.25, %v1039_v4  ;;  %v4854_v35 = vpack.c.bf16 %v1878_v2, %v1877_v53  ;;  %v1879_v4 = vld [vmem:[%s8013_s1 + $0x2d0] sm:$0xff]  ;;  %v334_v7 = vld [vmem:[%s8012_s0 + $0x998] sm:$0xff] }
 0x24a   :  { %4847 = vmatprep.subr.bf16.mxu0 %v4846_v48  ;;  %v1656_v48 = vmul.f32 0.25, %v1042_v31  ;;  %v3503_v40 = vsel %vm2384_vm9, %v3502_v11, %v3498_v42  ;;  %v3419_v58 = vsel %vm2377_vm8, %v3418_v29, %v3414_v32  ;;  %v3428_v27 = vrot.slane %v1654_v6, %v5412_v43  ;;  %v1881_v11 = vld [vmem:[%s8013_s1 + $0x2e0] sm:$0xff]  ;;  %v352_v6 = vld [vmem:[%s8012_s0 + $0xa28] sm:$0xff] }
 0x24b   :  { %1293 = vadd.xlane.f32.xlu1 %v6963_v39  ;;  %1344 = vadd.xlane.f32.xlu0 %v1343_v44  ;;  %v1861_v39 = vld [vmem:[%s8013_s1 + $0x240] sm:$0xff]  ;;  %v1862_v44 = vld [vmem:[%s8013_s1 + $0x248] sm:$0xff]  ;;  %v3522_v33 = vrot.slane %v1673_v16, %v5426_v57  ;;  %v3508_v36 = vsel %vm2391_vm10, %v3507_v22, %v3503_v40  ;;  %v3433_v21 = vrot.slane %v1655_v41, %v5406_v38 }
 0x24c   :  { %v1096_v56 = vpop.xlane.xlu1 %1095  ;;  %v1045_v8 = vpop.xlane.xlu0 %1044  ;;  %v4856_v24 = vpack.c.bf16 %v1862_v44, %v1861_v39  ;;  %v3513_v14 = vsel %vm2398_vm11, %v3512_v47, %v3508_v36  ;;  %v3424_v12 = vsel %vm2384_vm9, %v3423_v20, %v3419_v58  ;;  %v3438_v5 = vrot.slane %v1656_v48, %v5432_v61  ;;  %v1882_v16 = vld [vmem:[%s8013_s1 + $0x2e8] sm:$0xff]  ;;  %v335_v39 = vld [vmem:[%s8012_s0 + $0x9a0] sm:$0xff] }
 0x24d   :  { %v1674_v17 = vmul.f32 0.25, %v1096_v56  ;;  %4849 = vmatpush3.bf16.msra.mxu0 %v4848_v26  ;;  %v1657_v3 = vmul.f32 0.25, %v1045_v8  ;;  %v3518_v26 = vsel %vm2405_vm12, %v3517_v59, %v3513_v14  ;;  %v4858_v30 = vpack.c.bf16 %v1880_v9, %v1879_v4  ;;  %v1865_v42 = vld [vmem:[%s8013_s1 + $0x260] sm:$0xff]  ;;  %v1866_v47 = vld [vmem:[%s8013_s1 + $0x268] sm:$0xff]  ;;  %v1904_v4 = vld [vmem:[%s8013_s1 + $0x398] sm:$0xff] }
 0x24e   :  { %4851 = vmatprep.subr.bf16.mxu0 %v4850_v25  ;;  %v3523_v32 = vsel %vm2412_vm13, %v3522_v33, %v3518_v26  ;;  %v3429_v53 = vsel %vm2391_vm10, %v3428_v27, %v3424_v12  ;;  %v4860_v44 = vpack.c.bf16 %v1864_v34, %v1863_v50  ;;  %v4862_v20 = vpack.c.bf16 %v1882_v16, %v1881_v11  ;;  %v1885_v59 = vld [vmem:[%s8013_s1 + $0x300] sm:$0xff]  ;;  %v1886_v48 = vld [vmem:[%s8013_s1 + $0x308] sm:$0xff]  ;;  %v1888_v50 = vld [vmem:[%s8013_s1 + $0x318] sm:$0xff] }
 0x24f   :  { %1347 = vadd.xlane.f32.xlu1 %v7000_v60  ;;  %1296 = vadd.xlane.f32.xlu0 %v7003_v37  ;;  %v3527_v15 = vrot.slane %v1674_v17, %v5451_v13  ;;  %v351_v37 = vld [vmem:[%s8012_s0 + $0xa20] sm:$0xff]  ;;  %v3443_v54 = vrot.slane %v1657_v3, %v5426_v57  ;;  %v3434_v56 = vsel %vm2398_vm11, %v3433_v21, %v3429_v53  ;;  %v1355_v36 = vsel %vm379_vm0, %v352_v6, 0.0  ;;  %v336_v14 = vld [vmem:[%s8012_s0 + $0x9a8] sm:$0xff] }
 0x250   :  { %v1099_v60 = vpop.xlane.xlu1 %1098  ;;  %v1048_v52 = vpop.xlane.xlu0 %1047  ;;  %v1352_v28 = vsel %vm379_vm0, %v351_v37, 0.0  ;;  %v3439_v41 = vsel %vm2405_vm12, %v3438_v5, %v3434_v56  ;;  %v1304_v27 = vsel %vm379_vm0, %v335_v39, 0.0  ;;  %v4864_v21 = vpack.c.bf16 %v1866_v47, %v1865_v42  ;;  %v8037_v34 = vld [vmem:[#allocation5_spill] sm:$0xff] }
 0x251   :  { %v1675_v31 = vmul.f32 0.25, %v1099_v60  ;;  %v1658_v63 = vmul.f32 0.25, %v1048_v52  ;;  %4853 = vmatpush3.bf16.msra.mxu0 %v4852_v19  ;;  %v3528_v22 = vsel %vm2419_vm14, %v3527_v15, %v3523_v32  ;;  %v3444_v40 = vsel %vm2412_vm13, %v3443_v54, %v3439_v41  ;;  %v353_v60 = vld [vmem:[%s8012_s0 + $0xa30] sm:$0xff]  ;;  %v1906_v11 = vld [vmem:[%s8013_s1 + $0x3a8] sm:$0xff]  ;;  %v1889_v39 = vld [vmem:[%s8013_s1 + $0x320] sm:$0xff] }
 0x252   :  { %4855 = vmatprep.subr.bf16.mxu0 %v4854_v35  ;;  %v1883_v35 = vld [vmem:[%s8013_s1 + $0x2f0] sm:$0xff] }
 0x253   :  { %v3532_v25 = vrot.slane %v1675_v31, %v5446_v10  ;;  %1350 = vadd.xlane.f32.xlu1 %v7008_v62  ;;  %1299 = vadd.xlane.f32.xlu0 %v7014_v45  ;;  %v3448_v2 = vrot.slane %v1658_v63, %v5451_v13  ;;  %v1301_v45 = vsel %vm379_vm0, %v334_v7, 0.0  ;;  %v4872_v31 = vpack.c.bf16 %v1886_v48, %v1885_v59  ;;  %v1867_v63 = vld [vmem:[%s8013_s1 + $0x270] sm:$0xff]  ;;  %v1868_v7 = vld [vmem:[%s8013_s1 + $0x278] sm:$0xff] }
 0x254   :  { %v1150_v29 = vpop.xlane.xlu1 %1149  ;;  %v1051_v62 = vpop.xlane.xlu0 %1050  ;;  %v8039_v41 = vld [vmem:[#allocation7_spill] sm:$0xff] }
 0x255   :  { %v1659_v8 = vmul.f32 0.25, %v1051_v62  ;;  %v3533_v19 = vsel %vm2426_vm15, %v3532_v25, %v3528_v22  ;;  %4857 = vmatpush3.bf16.msra.mxu0 %v4856_v24  ;;  %v1692_v33 = vmul.f32 0.25, %v1150_v29  ;;  %v1903_v24 = vld [vmem:[%s8013_s1 + $0x390] sm:$0xff]  ;;  %v3449_v15 = vsel %vm2419_vm14, %v3448_v2, %v3444_v40  ;;  %v354_v62 = vld [vmem:[%s8012_s0 + $0xa38] sm:$0xff] }
 0x256   :  { %v4091_v17 = vsel %vm8025_vm3, %v3533_v19, %v5766_v55  ;;  %4859 = vmatprep.subr.bf16.mxu0 %v4858_v30  ;;  %v1884_v55 = vld [vmem:[%s8013_s1 + $0x2f8] sm:$0xff]  ;;  %v4874_v5 = vpack.c.bf16 %v1904_v4, %v1903_v24  ;;  %v1887_v30 = vld [vmem:[%s8013_s1 + $0x310] sm:$0xff]  ;;  %v1358_v2 = vsel %vm379_vm0, %v353_v60, 0.0  ;;  %v1307_v29 = vsel %vm379_vm0, %v336_v14, 0.0 }
 0x257   :  { %v3453_v3 = vrot.slane %v1659_v8, %v5446_v10  ;;  %1353 = vadd.xlane.f32.xlu1 %v1352_v28  ;;  %1302 = vadd.xlane.f32.xlu0 %v1301_v45  ;;  %v4866_v26 = vpack.c.bf16 %v1884_v55, %v1883_v35  ;;  %v3616_v54 = vrot.slane %v1692_v33, %v8037_v34  ;;  %v8038_v28 = vld [vmem:[#allocation6_spill] sm:$0xff]  ;;  %v1908_v48 = vld [vmem:[%s8013_s1 + $0x3b8] sm:$0xff]  ;;  %v1361_v33 = vsel %vm379_vm0, %v354_v62, 0.0 }
 0x258   :  { %4244 = vmatprep.mubr.f32.mxu1 %v4091_v17  ;;  %v1102_v9 = vpop.xlane.xlu1 %1101  ;;  %v1153_v58 = vpop.xlane.xlu0 %1152  ;;  %v4868_v45 = vpack.c.bf16 %v1868_v7, %v1867_v63  ;;  %v337_v8 = vld [vmem:[%s8012_s0 + $0x9b0] sm:$0xff]  ;;  %v4876_v19 = vpack.c.bf16 %v1888_v50, %v1887_v30  ;;  %v364_v55 = vld [vmem:[%s8012_s0 + $0xa88] sm:$0xff]  ;;  %v1892_v60 = vld [vmem:[%s8013_s1 + $0x338] sm:$0xff] }
 0x259   :  { %v1693_v52 = vmul.f32 0.25, %v1153_v58  ;;  %v3454_v37 = vsel %vm2426_vm15, %v3453_v3, %v3449_v15  ;;  %4861 = vmatpush3.bf16.msra.mxu0 %v4860_v44  ;;  %v1676_v25 = vmul.f32 0.25, %v1102_v9  ;;  %v1890_v44 = vld [vmem:[%s8013_s1 + $0x328] sm:$0xff]  ;;  %v1907_v59 = vld [vmem:[%s8013_s1 + $0x3b0] sm:$0xff]  ;;  %v1310_v3 = vsel %vm379_vm0, %v337_v8, 0.0  ;;  %v355_v30 = vld [vmem:[%s8012_s0 + $0xa40] sm:$0xff] }
 0x25a   :  { %v4090_v12 = vsel %vm8025_vm3, %v3454_v37, %v5669_v49  ;;  %4863 = vmatprep.subr.bf16.mxu0 %v4862_v20  ;;  %v1905_v49 = vld [vmem:[%s8013_s1 + $0x3a0] sm:$0xff]  ;;  %v4880_v24 = vpack.c.bf16 %v1890_v44, %v1889_v39  ;;  %v1891_v15 = vld [vmem:[%s8013_s1 + $0x330] sm:$0xff]  ;;  %v1910_v63 = vld [vmem:[%s8013_s1 + $0x3c8] sm:$0xff]  ;;  %vm8041_vm3 = vcmask 261312   ;;  %v1364_v8 = vsel %vm379_vm0, %v355_v30, 0.0 }
 0x25b   :  { %v3620_v32 = vrot.slane %v1693_v52, %v8038_v28  ;;  %1356 = vadd.xlane.f32.xlu1 %v1355_v36  ;;  %1305 = vadd.xlane.f32.xlu0 %v1304_v27  ;;  %v4878_v42 = vpack.c.bf16 %v1906_v11, %v1905_v49  ;;  %v3537_v47 = vrot.slane %v1676_v25, %v8037_v34  ;;  %v363_v27 = vld [vmem:[%s8012_s0 + $0xa80] sm:$0xff]  ;;  %v338_v11 = vld [vmem:[%s8012_s0 + $0x9b8] sm:$0xff]  ;;  %v1915_v30 = vld [vmem:[%s8013_s1 + $0x3f0] sm:$0xff] }
 0x25c   :  { %4245 = vmatmul.mubr.f32.vlgmr.msra.gmra.mrb[0].mxu1 %v4090_v12  ;;  %v1156_v16 = vpop.xlane.xlu1 %1155  ;;  %v1105_v53 = vpop.xlane.xlu0 %1104  ;;  %v4882_v52 = vpack.c.bf16 %v1908_v48, %v1907_v59  ;;  %v8040_v37 = vld [vmem:[#allocation8_spill] sm:$0xff]  ;;  %v4884_v50 = vpack.c.bf16 %v1892_v60, %v1891_v15  ;;  %v365_v59 = vld [vmem:[%s8012_s0 + $0xa90] sm:$0xff] }
 0x25d   :  { %v3621_v22 = vsel %vm2328_vm1, %v3620_v32, %v3616_v54  ;;  %v1694_v6 = vmul.f32 0.25, %v1156_v16  ;;  %v1677_v56 = vmul.f32 0.25, %v1105_v53  ;;  %4865 = vmatpush3.bf16.msra.mxu0 %v4864_v21  ;;  %4873 = vmatpush3.bf16.msra.mxu1 %v4872_v31  ;;  %v1909_v31 = vld [vmem:[%s8013_s1 + $0x3c0] sm:$0xff]  ;;  %v1894_v53 = vld [vmem:[%s8013_s1 + $0x348] sm:$0xff]  ;;  %v190_v39 = vld [vmem:[%s8012_s0 + $0x518] sm:$0xff] }
 0x25e   :  { %4867 = vmatprep.subr.bf16.mxu0 %v4866_v26  ;;  %4875 = vmatprep.subr.bf16.mxu1 %v4874_v5  ;;  %v1391_v26 = vsel %vm379_vm0, %v364_v55, 0.0  ;;  %v1388_v5 = vsel %vm379_vm0, %v363_v27, 0.0  ;;  %v1893_v16 = vld [vmem:[%s8013_s1 + $0x340] sm:$0xff]  ;;  %v1895_v48 = vld [vmem:[%s8013_s1 + $0x350] sm:$0xff]  ;;  %v356_v27 = vld [vmem:[%s8012_s0 + $0xa48] sm:$0xff] }
 0x25f   :  { %v3625_v17 = vrot.slane %v1694_v6, %v8039_v41  ;;  %v3541_v20 = vrot.slane %v1677_v56, %v8038_v28  ;;  %1359 = vadd.xlane.f32.xlu1 %v1358_v2  ;;  %1308 = vadd.xlane.f32.xlu0 %v1307_v29  ;;  %v4886_v2 = vpack.c.bf16 %v1910_v63, %v1909_v31  ;;  %v1913_v55 = vld [vmem:[%s8013_s1 + $0x3e0] sm:$0xff] }
 0x260   :  { %v1159_v35 = vpop.xlane.xlu1 %1158  ;;  %v1108_v40 = vpop.xlane.xlu0 %1107  ;;  %v4888_v44 = vpack.c.bf16 %v1894_v53, %v1893_v16  ;;  %v339_v31 = vld [vmem:[%s8012_s0 + $0x9c0] sm:$0xff] }
 0x261   :  { %v3626_v4 = vsel %vm2335_vm2, %v3625_v17, %v3621_v22  ;;  %v3542_v9 = vsel %vm2328_vm1, %v3541_v20, %v3537_v47  ;;  %v1695_v58 = vmul.f32 0.25, %v1159_v35  ;;  %v1678_v36 = vmul.f32 0.25, %v1108_v40  ;;  %4869 = vmatpush3.bf16.msra.mxu0 %v4868_v45  ;;  %4877 = vmatpush3.bf16.msra.mxu1 %v4876_v19  ;;  %v1911_v45 = vld [vmem:[%s8013_s1 + $0x3d0] sm:$0xff]  ;;  %v1912_v22 = vld [vmem:[%s8013_s1 + $0x3d8] sm:$0xff]  ;;  %v1897_v63 = vld [vmem:[%s8013_s1 + $0x360] sm:$0xff] }
 0x262   :  { %4879 = vmatprep.subr.bf16.mxu1 %v4878_v42  ;;  %v1313_v19 = vsel %vm379_vm0, %v338_v11, 0.0  ;;  %v1896_v35 = vld [vmem:[%s8013_s1 + $0x358] sm:$0xff]  ;;  %v4890_v40 = vpack.c.bf16 %v1912_v22, %v1911_v45 }
 0x263   :  { %v3630_v14 = vrot.slane %v1695_v58, %v8040_v37  ;;  %v3546_v21 = vrot.slane %v1678_v36, %v8039_v41  ;;  %1362 = vadd.xlane.f32.xlu1 %v1361_v33  ;;  %1311 = vadd.xlane.f32.xlu0 %v1310_v3  ;;  %v869_v58 = vsel %vm379_vm0, %v190_v39, 0.0  ;;  %v1394_v36 = vsel %vm379_vm0, %v365_v59, 0.0  ;;  %v366_v45 = vld [vmem:[%s8012_s0 + $0xa98] sm:$0xff]  ;;  %v340_v59 = vld [vmem:[%s8012_s0 + $0x9c8] sm:$0xff] }
 0x264   :  { %v1162_v7 = vpop.xlane.xlu1 %1161  ;;  %v1111_v12 = vpop.xlane.xlu0 %1110  ;;  %v4892_v15 = vpack.c.bf16 %v1896_v35, %v1895_v48 }
 0x265   :  { %v3631_v54 = vsel %vm8041_vm3, %v3630_v14, %v3626_v4  ;;  %v3547_v25 = vsel %vm2335_vm2, %v3546_v21, %v3542_v9  ;;  %v1696_v32 = vmul.f32 0.25, %v1162_v7  ;;  %v1679_v49 = vmul.f32 0.25, %v1111_v12  ;;  %4881 = vmatpush3.bf16.msra.mxu1 %v4880_v24  ;;  %v1914_v24 = vld [vmem:[%s8013_s1 + $0x3e8] sm:$0xff] }
 0x266   :  { %4883 = vmatprep.subr.bf16.mxu1 %v4882_v52  ;;  %v1898_v7 = vld [vmem:[%s8013_s1 + $0x368] sm:$0xff]  ;;  %v4894_v12 = vpack.c.bf16 %v1914_v24, %v1913_v55 }
 0x267   :  { %v3635_v29 = vrot.slane %v1696_v32, %v5350_v51  ;;  %v3551_v62 = vrot.slane %v1679_v49, %v8040_v37  ;;  %1392 = vadd.xlane.f32.xlu1 %v1391_v26  ;;  %1389 = vadd.xlane.f32.xlu0 %v1388_v5  ;;  %v1367_v32 = vsel %vm379_vm0, %v356_v27, 0.0  ;;  %v1316_v49 = vsel %vm379_vm0, %v339_v31, 0.0  ;;  %v358_v31 = vld [vmem:[%s8012_s0 + $0xa58] sm:$0xff] }
 0x268   :  { %v1165_v6 = vpop.xlane.xlu1 %1164  ;;  %v1114_v56 = vpop.xlane.xlu0 %1113  ;;  %v4896_v11 = vpack.c.bf16 %v1898_v7, %v1897_v63  ;;  %v341_v63 = vld [vmem:[%s8012_s0 + $0x9d0] sm:$0xff] }
 0x269   :  { %v3636_v42 = vsel %vm2349_vm4, %v3635_v29, %v3631_v54  ;;  %v3552_v47 = vsel %vm8041_vm3, %v3551_v62, %v3547_v25  ;;  %v1697_v17 = vmul.f32 0.25, %v1165_v6  ;;  %v1680_v20 = vmul.f32 0.25, %v1114_v56  ;;  %4885 = vmatpush3.bf16.msra.mxu1 %v4884_v50  ;;  %v1916_v50 = vld [vmem:[%s8013_s1 + $0x3f8] sm:$0xff]  ;;  %v191_v62 = vld [vmem:[%s8012_s0 + $0x520] sm:$0xff]  ;;  %v1899_v6 = vld [vmem:[%s8013_s1 + $0x370] sm:$0xff] }
 0x26a   :  { %4887 = vmatprep.subr.bf16.mxu1 %v4886_v2  ;;  %v4898_v22 = vpack.c.bf16 %v1916_v50, %v1915_v30  ;;  %v1900_v56 = vld [vmem:[%s8013_s1 + $0x378] sm:$0xff]  ;;  %v1322_v30 = vsel %vm379_vm0, %v341_v63, 0.0 }
 0x26b   :  { %v3640_v33 = vrot.slane %v1697_v17, %v5343_v46  ;;  %v3556_v3 = vrot.slane %v1680_v20, %v5350_v51  ;;  %1365 = vadd.xlane.f32.xlu1 %v1364_v8  ;;  %1314 = vadd.xlane.f32.xlu0 %v1313_v19  ;;  %v357_v20 = vld [vmem:[%s8012_s0 + $0xa50] sm:$0xff]  ;;  %v4900_v48 = vpack.c.bf16 %v1900_v56, %v1899_v6  ;;  %v359_v6 = vld [vmem:[%s8012_s0 + $0xa60] sm:$0xff]  ;;  %v342_v56 = vld [vmem:[%s8012_s0 + $0x9d8] sm:$0xff] }
 0x26c   :  { %v1168_v4 = vpop.xlane.xlu1 %1167  ;;  %v1117_v9 = vpop.xlane.xlu0 %1116 }
 0x26d   :  { %v3641_v60 = vsel %vm2356_vm5, %v3640_v33, %v3636_v42  ;;  %v3557_v52 = vsel %vm2349_vm4, %v3556_v3, %v3552_v47  ;;  %v1698_v14 = vmul.f32 0.25, %v1168_v4  ;;  %v1681_v21 = vmul.f32 0.25, %v1117_v9  ;;  %4889 = vmatpush3.bf16.msra.mxu1 %v4888_v44  ;;  %v192_v4 = vld [vmem:[%s8012_s0 + $0x528] sm:$0xff]  ;;  %v367_v9 = vld [vmem:[%s8012_s0 + $0xaa0] sm:$0xff] }
 0x26e   :  { %4891 = vmatprep.subr.bf16.mxu1 %v4890_v40  ;;  %v872_v42 = vsel %vm379_vm0, %v191_v62, 0.0  ;;  %v1397_v47 = vsel %vm379_vm0, %v366_v45, 0.0  ;;  %v1370_v33 = vsel %vm379_vm0, %v357_v20, 0.0  ;;  %v1319_v3 = vsel %vm379_vm0, %v340_v59, 0.0 }
 0x26f   :  { %v3645_v26 = vrot.slane %v1698_v14, %v5368_v1  ;;  %v3561_v5 = vrot.slane %v1681_v21, %v5343_v46  ;;  %870 = vadd.xlane.f32.xlu1 %v869_v58  ;;  %1395 = vadd.xlane.f32.xlu0 %v1394_v36 }
 0x270   :  { %v1249_v54 = vpop.xlane.xlu1 %1248  ;;  %v1246_v25 = vpop.xlane.xlu0 %1245 }
 0x271   :  { %v7309_v16 = vsel %vm2363_vm6, %v3645_v26, %v3641_v60  ;;  %v7312_v53 = vsel %vm2356_vm5, %v3561_v5, %v3557_v52  ;;  %v1725_v2 = vmul.f32 0.25, %v1249_v54  ;;  %v1724_v29 = vmul.f32 0.25, %v1246_v25  ;;  %4893 = vmatpush3.bf16.msra.mxu1 %v4892_v15  ;;  %v193_v25 = vld [vmem:[%s8012_s0 + $0x530] sm:$0xff] }
 0x272   :  { %4895 = vmatprep.subr.bf16.mxu1 %v4894_v12  ;;  %v875_v60 = vsel %vm379_vm0, %v192_v4, 0.0  ;;  %v1400_v52 = vsel %vm379_vm0, %v367_v9, 0.0  ;;  %v1373_v5 = vsel %vm379_vm0, %v358_v31, 0.0  ;;  %v360_v9 = vld [vmem:[%s8012_s0 + $0xa68] sm:$0xff] }
 0x273   :  { %v3778_v8 = vrot.slane %v1725_v2, %v8038_v28  ;;  %v3774_v19 = vrot.slane %v1724_v29, %v8037_v34  ;;  %1368 = vadd.xlane.f32.xlu1 %v1367_v32  ;;  %1317 = vadd.xlane.f32.xlu0 %v1316_v49  ;;  %v368_v32 = vld [vmem:[%s8012_s0 + $0xaa8] sm:$0xff]  ;;  %v878_v29 = vsel %vm379_vm0, %v193_v25, 0.0 }
 0x274   :  { %v7328_v39 = vpop.xlane.xlu1 %1170  ;;  %v7330_v44 = vpop.xlane.xlu0 %1119  ;;  %v1403_v62 = vsel %vm379_vm0, %v368_v32, 0.0 }
 0x275   :  { %v3779_v17 = vsel %vm2328_vm1, %v3778_v8, %v3774_v19  ;;  %4897 = vmatpush3.bf16.msra.mxu1 %v4896_v11 }
 0x276   :  { %4899 = vmatprep.subr.bf16.mxu1 %v4898_v22 }
 0x277   :  { %873 = vadd.xlane.f32.xlu1 %v872_v42  ;;  %1398 = vadd.xlane.f32.xlu0 %v1397_v47  ;;  %v1376_v47 = vsel %vm379_vm0, %v359_v6, 0.0  ;;  %v362_v6 = vld [vmem:[%s8012_s0 + $0xa78] sm:$0xff] }
 0x278   :  { %v1201_v35 = vpop.xlane.xlu1 %1200  ;;  %v1198_v40 = vpop.xlane.xlu0 %1197 }
 0x279   :  { %v1709_v55 = vmul.f32 0.25, %v1201_v35  ;;  %v1708_v24 = vmul.f32 0.25, %v1198_v40  ;;  %4901 = vmatpush3.bf16.msra.mxu1 %v4900_v48  ;;  %v194_v48 = vld [vmem:[%s8012_s0 + $0x538] sm:$0xff]  ;;  %v369_v35 = vld [vmem:[%s8012_s0 + $0xab0] sm:$0xff] }
 0x27b   :  { %v3699_v58 = vrot.slane %v1709_v55, %v8038_v28  ;;  %v3695_v36 = vrot.slane %v1708_v24, %v8037_v34  ;;  %1371 = vadd.xlane.f32.xlu1 %v1370_v33  ;;  %1320 = vadd.xlane.f32.xlu0 %v1319_v3  ;;  %v881_v55 = vsel %vm379_vm0, %v194_v48, 0.0  ;;  %v1406_v24 = vsel %vm379_vm0, %v369_v35, 0.0 }
 0x27c   :  { %v7351_v27 = vpop.xlane.xlu1 %1122  ;;  %v1252_v15 = vpop.xlane.xlu0 %1251  ;;  %v1385_v48 = vsel %vm379_vm0, %v362_v6, 0.0  ;;  %v375_v6 = vld [vmem:[%s8012_s0 + $0xae0] sm:$0xff] }
 0x27d   :  { %v3700_v14 = vsel %vm2328_vm1, %v3699_v58, %v3695_v36  ;;  %v1726_v21 = vmul.f32 0.25, %v1252_v15  ;;  %v343_v58 = vld [vmem:[%s8012_s0 + $0x9e0] sm:$0xff] }
 0x27f   :  { %v3783_v7 = vrot.slane %v1726_v21, %v8039_v41  ;;  %876 = vadd.xlane.f32.xlu1 %v875_v60  ;;  %1401 = vadd.xlane.f32.xlu0 %v1400_v52  ;;  %v1379_v60 = vsel %vm379_vm0, %v360_v9, 0.0  ;;  %v1328_v52 = vsel %vm379_vm0, %v343_v58, 0.0  ;;  %v370_v21 = vld [vmem:[%s8012_s0 + $0xab8] sm:$0xff] }
 0x280   :  { %v1204_v12 = vpop.xlane.xlu1 %1203  ;;  %v7363_v26 = vpop.xlane.xlu0 %1173 }
 0x281   :  { %v3784_v50 = vsel %vm2335_vm2, %v3783_v7, %v3779_v17  ;;  %v1710_v54 = vmul.f32 0.25, %v1204_v12  ;;  %v1325_v17 = vsel %vm379_vm0, %v342_v56, 0.0  ;;  %v1409_v12 = vsel %vm379_vm0, %v370_v21, 0.0  ;;  %v345_v56 = vld [vmem:[%s8012_s0 + $0x9f0] sm:$0xff] }
 0x282   :  { %v1334_v35 = vsel %vm379_vm0, %v345_v56, 0.0  ;;  %v199_v56 = vld [vmem:[%s8012_s0 + $0x560] sm:$0xff] }
 0x283   :  { %v3704_v49 = vrot.slane %v1710_v54, %v8039_v41  ;;  %1374 = vadd.xlane.f32.xlu1 %v1373_v5  ;;  %1323 = vadd.xlane.f32.xlu0 %v1322_v30  ;;  %v361_v5 = vld [vmem:[%s8012_s0 + $0xa70] sm:$0xff]  ;;  %v344_v30 = vld [vmem:[%s8012_s0 + $0x9e8] sm:$0xff] }
 0x284   :  { %v7375_v11 = vpop.xlane.xlu1 %1125  ;;  %v1255_v2 = vpop.xlane.xlu0 %1254  ;;  %v1382_v25 = vsel %vm379_vm0, %v361_v5, 0.0  ;;  %v1331_v32 = vsel %vm379_vm0, %v344_v30, 0.0  ;;  %v374_v30 = vld [vmem:[%s8012_s0 + $0xad8] sm:$0xff] }
 0x285   :  { %v3705_v45 = vsel %vm2335_vm2, %v3704_v49, %v3700_v14  ;;  %v1727_v22 = vmul.f32 0.25, %v1255_v2  ;;  %v195_v14 = vld [vmem:[%s8012_s0 + $0x540] sm:$0xff]  ;;  %v196_v49 = vld [vmem:[%s8012_s0 + $0x548] sm:$0xff] }
 0x286   :  { %v884_v7 = vsel %vm379_vm0, %v195_v14, 0.0  ;;  %v371_v2 = vld [vmem:[%s8012_s0 + $0xac0] sm:$0xff]  ;;  %v346_v14 = vld [vmem:[%s8012_s0 + $0x9f8] sm:$0xff] }
 0x287   :  { %v3788_v8 = vrot.slane %v1727_v22, %v8040_v37  ;;  %879 = vadd.xlane.f32.xlu1 %v878_v29  ;;  %1404 = vadd.xlane.f32.xlu0 %v1403_v62  ;;  %v1412_v22 = vsel %vm379_vm0, %v371_v2, 0.0  ;;  %v1337_v5 = vsel %vm379_vm0, %v346_v14, 0.0 }
 0x288   :  { %v1207_v19 = vpop.xlane.xlu1 %1206  ;;  %v7387_v42 = vpop.xlane.xlu0 %1176 }
 0x289   :  { %v7392_v20 = vsel %vm8041_vm3, %v3788_v8, %v3784_v50  ;;  %v1711_v59 = vmul.f32 0.25, %v1207_v19  ;;  %v1933_v8 = vld [vmem:[%s8013_s1 + $0x480] sm:$0xff]  ;;  %v1934_v19 = vld [vmem:[%s8013_s1 + $0x488] sm:$0xff] }
 0x28b   :  { %v3709_v40 = vrot.slane %v1711_v59, %v8040_v37  ;;  %1377 = vadd.xlane.f32.xlu1 %v1376_v47  ;;  %1326 = vadd.xlane.f32.xlu0 %v1325_v17  ;;  %v4902_v47 = vpack.c.bf16 %v1934_v19, %v1933_v8  ;;  %v1682_v8 = vmul.f32 0.25, %v7330_v44  ;;  %v200_v19 = vld [vmem:[%s8012_s0 + $0x568] sm:$0xff]  ;;  %v1424_v44 = vsel %vm379_vm0, %v375_v6, 0.0 }
 0x28c   :  { %v7401_v33 = vpop.xlane.xlu1 %1128  ;;  %v7403_v3 = vpop.xlane.xlu0 %1257 }
 0x28d   :  { %v7408_v4 = vsel %vm8041_vm3, %v3709_v40, %v3705_v45  ;;  %v887_v45 = vsel %vm379_vm0, %v196_v49, 0.0  ;;  %4903 = vmatprep.subr.bf16.mxu0 %v4902_v47  ;;  %v197_v40 = vld [vmem:[%s8012_s0 + $0x550] sm:$0xff]  ;;  %v1700_v47 = vmul.f32 0.25, %v7363_v26 }
 0x28e   :  { %v890_v58 = vsel %vm379_vm0, %v197_v40, 0.0  ;;  %v1701_v40 = vmul.f32 0.25, %v7387_v42  ;;  %v899_v42 = vsel %vm379_vm0, %v200_v19, 0.0 }
 0x28f   :  { %882 = vadd.xlane.f32.xlu1 %v881_v55  ;;  %1407 = vadd.xlane.f32.xlu0 %v1406_v24  ;;  %v372_v55 = vld [vmem:[%s8012_s0 + $0xac8] sm:$0xff] }
 0x290   :  { %v7416_v36 = vpop.xlane.xlu1 %1209  ;;  %v7418_v15 = vpop.xlane.xlu0 %1179 }
 0x293   :  { %1380 = vadd.xlane.f32.xlu1 %v1379_v60  ;;  %1329 = vadd.xlane.f32.xlu0 %v1328_v52  ;;  %v1415_v60 = vsel %vm379_vm0, %v372_v55, 0.0  ;;  %v373_v52 = vld [vmem:[%s8012_s0 + $0xad0] sm:$0xff]  ;;  %v896_v55 = vsel %vm379_vm0, %v199_v56, 0.0  ;;  %v3660_v56 = vrot.slane %v1701_v40, %v5386_v18 }
 0x294   :  { %v7428_v31 = vpop.xlane.xlu1 %1131  ;;  %v7430_v63 = vpop.xlane.xlu0 %1260 }
 0x297   :  { %885 = vadd.xlane.f32.xlu1 %v884_v7  ;;  %1410 = vadd.xlane.f32.xlu0 %v1409_v12  ;;  %v1418_v12 = vsel %vm379_vm0, %v373_v52, 0.0 }
 0x298   :  { %v7440_v50 = vpop.xlane.xlu1 %1212  ;;  %v7442_v54 = vpop.xlane.xlu0 %1182 }
 0x29b   :  { %1383 = vadd.xlane.f32.xlu1 %v1382_v25  ;;  %1332 = vadd.xlane.f32.xlu0 %v1331_v32  ;;  %v198_v25 = vld [vmem:[%s8012_s0 + $0x558] sm:$0xff]  ;;  %v1699_v32 = vmul.f32 0.25, %v7328_v39  ;;  %v376_v39 = vld [vmem:[%s8012_s0 + $0xae8] sm:$0xff] }
 0x29c   :  { %v7452_v29 = vpop.xlane.xlu1 %1134  ;;  %v7454_v62 = vpop.xlane.xlu0 %1263 }
 0x29d   :  { %v3650_v26 = vrot.slane %v1699_v32, %v5365_v0  ;;  %v1685_v32 = vmul.f32 0.25, %v7401_v33 }
 0x29f   :  { %888 = vadd.xlane.f32.xlu1 %v887_v45  ;;  %1413 = vadd.xlane.f32.xlu0 %v1412_v22  ;;  %v1421_v45 = vsel %vm379_vm0, %v374_v30, 0.0  ;;  %v893_v22 = vsel %vm379_vm0, %v198_v25, 0.0  ;;  %v1703_v30 = vmul.f32 0.25, %v7442_v54 }
 0x2a0   :  { %v7470_v17 = vpop.xlane.xlu1 %1215  ;;  %v1186_v59 = vpop.xlane.xlu0 %1185 }
 0x2a3   :  { %1386 = vadd.xlane.f32.xlu1 %v1385_v48  ;;  %1335 = vadd.xlane.f32.xlu0 %v1334_v35  ;;  %v377_v48 = vld [vmem:[%s8012_s0 + $0xaf0] sm:$0xff]  ;;  %v1683_v35 = vmul.f32 0.25, %v7351_v27  ;;  %v1427_v27 = vsel %vm379_vm0, %v376_v39, 0.0 }
 0x2a4   :  { %v7480_v24 = vpop.xlane.xlu1 %1137  ;;  %v7482_v9 = vpop.xlane.xlu0 %1266  ;;  %v1430_v25 = vsel %vm379_vm0, %v377_v48, 0.0 }
 0x2a5   :  { %v3571_v6 = vrot.slane %v1683_v35, %v5365_v0  ;;  %v3670_v35 = vrot.slane %v1703_v30, %v5406_v38 }
 0x2a7   :  { %891 = vadd.xlane.f32.xlu1 %v890_v58  ;;  %1416 = vadd.xlane.f32.xlu0 %v1415_v60  ;;  %v201_v58 = vld [vmem:[%s8012_s0 + $0x570] sm:$0xff]  ;;  %v1702_v60 = vmul.f32 0.25, %v7418_v15  ;;  %v1704_v15 = vmul.f32 0.25, %v1186_v59  ;;  %v4986_v59 = vmov 0.0|0.0  }
 0x2a8   :  { %v7492_v21 = vpop.xlane.xlu1 %1218  ;;  %v1189_v7 = vpop.xlane.xlu0 %1188  ;;  %4934 = vmatprep.subr.bf16.mxu1 %v4986_v59 }
 0x2a9   :  { %v1705_v39 = vmul.f32 0.25, %v1189_v7  ;;  %v3665_v54 = vrot.slane %v1702_v60, %v5412_v43 }
 0x2ab   :  { %1419 = vadd.xlane.f32.xlu1 %v1418_v12  ;;  %1338 = vadd.xlane.f32.xlu0 %v1337_v5  ;;  %v3566_v12 = vrot.slane %v1682_v8, %v5368_v1  ;;  %v1684_v5 = vmul.f32 0.25, %v7375_v11  ;;  %v3651_v11 = vsel %vm2370_vm7, %v3650_v26, %v7309_v16  ;;  %v1686_v8 = vmul.f32 0.25, %v7428_v31 }
 0x2ac   :  { %v1141_v49 = vpop.xlane.xlu1 %1140  ;;  %v7503_v2 = vpop.xlane.xlu0 %1269  ;;  %v1687_v16 = vmul.f32 0.25, %v7452_v29  ;;  %v3581_v31 = vrot.slane %v1685_v32, %v5386_v18 }
 0x2ad   :  { %v3567_v48 = vsel %vm2363_vm6, %v3566_v12, %v7312_v53  ;;  %v3576_v7 = vrot.slane %v1684_v5, %v5392_v23  ;;  %v3680_v53 = vrot.slane %v1705_v39, %v5426_v57  ;;  %v1689_v60 = vmul.f32 0.25, %v1141_v49 }
 0x2ae   :  { %v3586_v29 = vrot.slane %v1686_v8, %v5412_v43 }
 0x2af   :  { %1422 = vadd.xlane.f32.xlu1 %v1421_v45  ;;  %894 = vadd.xlane.f32.xlu0 %v893_v22  ;;  %v3655_v45 = vrot.slane %v1700_v47, %v5392_v23  ;;  %v902_v22 = vsel %vm379_vm0, %v201_v58, 0.0  ;;  %v3572_v58 = vsel %vm2370_vm7, %v3571_v6, %v3567_v48 }
 0x2b0   :  { %v7533_v52 = vpop.xlane.xlu1 %1221  ;;  %v1192_v14 = vpop.xlane.xlu0 %1191  ;;  %v3577_v32 = vsel %vm2377_vm8, %v3576_v7, %v3572_v58  ;;  %v1728_v58 = vmul.f32 0.25, %v7403_v3 }
 0x2b1   :  { %v1706_v19 = vmul.f32 0.25, %v1192_v14  ;;  %v3656_v40 = vsel %vm2377_vm8, %v3655_v45, %v3651_v11  ;;  %v3582_v6 = vsel %vm2384_vm9, %v3581_v31, %v3577_v32 }
 0x2b2   :  { %v3661_v26 = vsel %vm2384_vm9, %v3660_v56, %v3656_v40 }
 0x2b3   :  { %1425 = vadd.xlane.f32.xlu1 %v1424_v44  ;;  %897 = vadd.xlane.f32.xlu0 %v896_v55  ;;  %v3675_v44 = vrot.slane %v1704_v15, %v5432_v61  ;;  %v1688_v55 = vmul.f32 0.25, %v7480_v24  ;;  %v3666_v14 = vsel %vm2391_vm10, %v3665_v54, %v3661_v26  ;;  %v3685_v12 = vrot.slane %v1706_v19, %v5451_v13  ;;  %v378_v24 = vld [vmem:[%s8012_s0 + $0xaf8] sm:$0xff] }
 0x2b4   :  { %v1144_v47 = vpop.xlane.xlu1 %1143  ;;  %v7550_v33 = vpop.xlane.xlu0 %1272  ;;  %v3671_v49 = vsel %vm2398_vm11, %v3670_v35, %v3666_v14  ;;  %v202_v15 = vld [vmem:[%s8012_s0 + $0x578] sm:$0xff]  ;;  %v3601_v54 = vrot.slane %v1689_v60, %v5426_v57  ;;  %v1433_v19 = vsel %vm379_vm0, %v378_v24, 0.0  ;;  %v1935_v14 = vld [vmem:[%s8013_s1 + $0x490] sm:$0xff]  ;;  %v1713_v24 = vmul.f32 0.25, %v7440_v50 }
 0x2b5   :  { %v1690_v5 = vmul.f32 0.25, %v1144_v47  ;;  %v3676_v56 = vsel %vm2405_vm12, %v3675_v44, %v3671_v49  ;;  %v3596_v39 = vrot.slane %v1688_v55, %v5432_v61  ;;  %v3587_v47 = vsel %vm2391_vm10, %v3586_v29, %v3582_v6  ;;  %v1936_v29 = vld [vmem:[%s8013_s1 + $0x498] sm:$0xff] }
 0x2b6   :  { %v3681_v11 = vsel %vm2412_vm13, %v3680_v53, %v3676_v56  ;;  %v8042_v53 = vld [vmem:[#allocation10_spill] sm:$0xff]  ;;  %v4906_v6 = vpack.c.bf16 %v1936_v29, %v1935_v14  ;;  %v1920_v50 = vld [vmem:[%s8013_s1 + $0x418] sm:$0xff] }
 0x2b7   :  { %1428 = vadd.xlane.f32.xlu1 %v1427_v27  ;;  %900 = vadd.xlane.f32.xlu0 %v899_v42  ;;  %v3591_v27 = vrot.slane %v1687_v16, %v5406_v38  ;;  %v3606_v48 = vrot.slane %v1690_v5, %v5451_v13  ;;  %v905_v16 = vsel %vm379_vm0, %v202_v15, 0.0  ;;  %v3686_v40 = vsel %vm2419_vm14, %v3685_v12, %v3681_v11  ;;  %v1919_v56 = vld [vmem:[%s8013_s1 + $0x410] sm:$0xff] }
 0x2b8   :  { %v7568_v30 = vpop.xlane.xlu1 %1224  ;;  %v1195_v45 = vpop.xlane.xlu0 %1194  ;;  %vm8043_vm0 = vcmask 1041409   ;;  %v1712_v12 = vmul.f32 0.25, %v7416_v36  ;;  %v1729_v5 = vmul.f32 0.25, %v7430_v63  ;;  %v1730_v15 = vmul.f32 0.25, %v7454_v62 }
 0x2b9   :  { %v1707_v42 = vmul.f32 0.25, %v1195_v45  ;;  %v3592_v31 = vsel %vm2398_vm11, %v3591_v27, %v3587_v47  ;;  %v1714_v36 = vmul.f32 0.25, %v7470_v17  ;;  %v1731_v11 = vmul.f32 0.25, %v7482_v9  ;;  %vm8045_vm3 = vmmov %vm8043_vm0  ;;  %v1937_v17 = vld [vmem:[%s8013_s1 + $0x4a0] sm:$0xff] }
 0x2ba   :  { %v3597_v26 = vsel %vm2405_vm12, %v3596_v39, %v3592_v31  ;;  %v3793_v39 = vrot.slane %v1728_v58, %v5350_v51  ;;  %v3798_v47 = vrot.slane %v1729_v5, %v5343_v46  ;;  %v1715_v9 = vmul.f32 0.25, %v7492_v21 }
 0x2bb   :  { %v3690_v8 = vrot.slane %v1707_v42, %v5446_v10  ;;  %1431 = vadd.xlane.f32.xlu1 %v1430_v25  ;;  %903 = vadd.xlane.f32.xlu0 %v902_v22  ;;  %v1917_v25 = vld [vmem:[%s8013_s1 + $0x400] sm:$0xff]  ;;  %v1918_v22 = vld [vmem:[%s8013_s1 + $0x408] sm:$0xff]  ;;  %v3602_v45 = vsel %vm2412_vm13, %v3601_v54, %v3597_v26  ;;  %v3803_v31 = vrot.slane %v1730_v15, %v5368_v1  ;;  %v1732_v26 = vmul.f32 0.25, %v7503_v2 }
 0x2bc   :  { %v1147_v7 = vpop.xlane.xlu1 %1146  ;;  %v1276_v35 = vpop.xlane.xlu0 %1275  ;;  %v3607_v32 = vsel %vm2419_vm14, %v3606_v48, %v3602_v45  ;;  %v4904_v42 = vpack.c.bf16 %v1918_v22, %v1917_v25  ;;  %v8044_v54 = vld [vmem:[#allocation9_spill] sm:$0xff]  ;;  %v3719_v48 = vrot.slane %v1713_v24, %v5343_v46  ;;  %v3794_v21 = vsel %vm2349_vm4, %v3793_v39, %v7392_v20 }
 0x2bd   :  { %v1691_v44 = vmul.f32 0.25, %v1147_v7  ;;  %v3691_v55 = vsel %vm2426_vm15, %v3690_v8, %v3686_v40  ;;  %v1938_v8 = vld [vmem:[%s8013_s1 + $0x4a8] sm:$0xff]  ;;  %v4908_v40 = vpack.c.bf16 %v1920_v50, %v1919_v56  ;;  %v1921_v25 = vld [vmem:[%s8013_s1 + $0x420] sm:$0xff]  ;;  %v3808_v58 = vrot.slane %v1731_v11, %v5365_v0 }
 0x2be   :  { %v4093_v60 = vsel %vm8043_vm0, %v3691_v55, %v8042_v53  ;;  %v4910_v55 = vpack.c.bf16 %v1938_v8, %v1937_v17  ;;  %v1922_v22 = vld [vmem:[%s8013_s1 + $0x428] sm:$0xff]  ;;  %v1939_v53 = vld [vmem:[%s8013_s1 + $0x4b0] sm:$0xff]  ;;  %v3799_v29 = vsel %vm2356_vm5, %v3798_v47, %v3794_v21  ;;  %v3729_v5 = vrot.slane %v1715_v9, %v5365_v0 }
 0x2bf   :  { %v3611_v3 = vrot.slane %v1691_v44, %v5446_v10  ;;  %1434 = vadd.xlane.f32.xlu1 %v1433_v19  ;;  %906 = vadd.xlane.f32.xlu0 %v905_v16  ;;  %v3714_v19 = vrot.slane %v1712_v12, %v5350_v51  ;;  %v3724_v44 = vrot.slane %v1714_v36, %v5368_v1  ;;  %v1733_v12 = vmul.f32 0.25, %v7550_v33  ;;  %v1926_v11 = vld [vmem:[%s8013_s1 + $0x448] sm:$0xff] }
 0x2c0   :  { %4314 = vmatprep.mubr.f32.mxu0 %v4093_v60  ;;  %v1279_v49 = vpop.xlane.xlu1 %1278  ;;  %v7614_v27 = vpop.xlane.xlu0 %1227  ;;  %v1940_v60 = vld [vmem:[%s8013_s1 + $0x4b8] sm:$0xff]  ;;  %v1734_v2 = vmul.f32 0.25, %v1276_v35  ;;  %v4912_v24 = vpack.c.bf16 %v1922_v22, %v1921_v25  ;;  %v1941_v35 = vld [vmem:[%s8013_s1 + $0x4c0] sm:$0xff]  ;;  %v3813_v56 = vrot.slane %v1732_v26, %v5392_v23  ;;  %v1716_v50 = vmul.f32 0.25, %v7533_v52 }
 0x2c1   :  { %v3612_v63 = vsel %vm2426_vm15, %v3611_v3, %v3607_v32  ;;  %v3715_v14 = vsel %vm2349_vm4, %v3714_v19, %v7408_v4  ;;  %v1923_v32 = vld [vmem:[%s8013_s1 + $0x430] sm:$0xff]  ;;  %v1924_v4 = vld [vmem:[%s8013_s1 + $0x438] sm:$0xff]  ;;  %v1735_v15 = vmul.f32 0.25, %v1279_v49  ;;  %v4914_v36 = vpack.c.bf16 %v1940_v60, %v1939_v53  ;;  %v1925_v49 = vld [vmem:[%s8013_s1 + $0x440] sm:$0xff] }
 0x2c2   :  { %v4092_v62 = vsel %vm8045_vm3, %v3612_v63, %v8044_v54  ;;  %v3720_v20 = vsel %vm2356_vm5, %v3719_v48, %v3715_v14  ;;  %v1942_v63 = vld [vmem:[%s8013_s1 + $0x4c8] sm:$0xff]  ;;  %v3818_v54 = vrot.slane %v1733_v12, %v5386_v18  ;;  %v4916_v8 = vpack.c.bf16 %v1924_v4, %v1923_v32  ;;  %v1944_v25 = vld [vmem:[%s8013_s1 + $0x4d8] sm:$0xff]  ;;  %v1927_v4 = vld [vmem:[%s8013_s1 + $0x450] sm:$0xff] }
 0x2c3   :  { %4315 = vmatmul.mubr.f32.vlgmr.msra.gmra.mrb[2].mxu0 %v4092_v62  ;;  %v3725_v33 = vsel %vm2363_vm6, %v3724_v44, %v3720_v20  ;;  %v1717_v62 = vmul.f32 0.25, %v7568_v30  ;;  %v3823_v47 = vrot.slane %v1734_v2, %v5412_v43  ;;  %v1718_v52 = vmul.f32 0.25, %v7614_v27  ;;  %v1943_v30 = vld [vmem:[%s8013_s1 + $0x4d0] sm:$0xff]  ;;  %vm8048_vm3 = vmmov %vm8043_vm0 }
 0x2c4   :  { %v1282_v7 = vpop.xlane.xlu1 %1281  ;;  %v1231_v16 = vpop.xlane.xlu0 %1230  ;;  %4905 = vmatpush3.bf16.msra.mxu0 %v4904_v42  ;;  %v3804_v42 = vsel %vm2363_vm6, %v3803_v31, %v3799_v29  ;;  %v3730_v19 = vsel %vm2370_vm7, %v3729_v5, %v3725_v33  ;;  %v3734_v22 = vrot.slane %v1716_v50, %v5392_v23  ;;  %v4922_v2 = vpack.c.bf16 %v1944_v25, %v1943_v30  ;;  %v1947_v25 = vld [vmem:[%s8013_s1 + $0x4f0] sm:$0xff] }
 0x2c5   :  { %4907 = vmatprep.subr.bf16.mxu0 %v4906_v6  ;;  %v3809_v6 = vsel %vm2370_vm7, %v3808_v58, %v3804_v42  ;;  %v1736_v39 = vmul.f32 0.25, %v1282_v7  ;;  %v4918_v7 = vpack.c.bf16 %v1942_v63, %v1941_v35  ;;  %v1719_v31 = vmul.f32 0.25, %v1231_v16  ;;  %v1928_v42 = vld [vmem:[%s8013_s1 + $0x458] sm:$0xff]  ;;  %v1945_v35 = vld [vmem:[%s8013_s1 + $0x4e0] sm:$0xff]  ;;  %v1946_v63 = vld [vmem:[%s8013_s1 + $0x4e8] sm:$0xff] }
 0x2c6   :  { %v3814_v27 = vsel %vm2377_vm8, %v3813_v56, %v3809_v6  ;;  %v3739_v26 = vrot.slane %v1717_v62, %v5386_v18  ;;  %v3744_v29 = vrot.slane %v1718_v52, %v5412_v43  ;;  %v3735_v33 = vsel %vm2377_vm8, %v3734_v22, %v3730_v19  ;;  %v1949_v19 = vld [vmem:[%s8013_s1 + $0x500] sm:$0xff] }
 0x2c7   :  { %v3833_v21 = vrot.slane %v1736_v39, %v5432_v61  ;;  %v3819_v16 = vsel %vm2384_vm9, %v3818_v54, %v3814_v27  ;;  %v1948_v27 = vld [vmem:[%s8013_s1 + $0x4f8] sm:$0xff] }
 0x2c8   :  { %v1285_v45 = vpop.xlane.xlu1 %1284  ;;  %v1234_v3 = vpop.xlane.xlu0 %1233  ;;  %4909 = vmatpush3.bf16.msra.mxu0 %v4908_v40  ;;  %v3828_v40 = vrot.slane %v1735_v15, %v5406_v38  ;;  %v3824_v14 = vsel %vm2391_vm10, %v3823_v47, %v3819_v16  ;;  %v3740_v6 = vsel %vm2384_vm9, %v3739_v26, %v3735_v33 }
 0x2c9   :  { %4911 = vmatprep.subr.bf16.mxu0 %v4910_v55  ;;  %v1737_v17 = vmul.f32 0.25, %v1285_v45  ;;  %v4920_v55 = vpack.c.bf16 %v1926_v11, %v1925_v49  ;;  %v1720_v58 = vmul.f32 0.25, %v1234_v3  ;;  %v3749_v3 = vrot.slane %v1719_v31, %v5406_v38  ;;  %v1930_v31 = vld [vmem:[%s8013_s1 + $0x468] sm:$0xff] }
 0x2ca   :  { %v3829_v45 = vsel %vm2398_vm11, %v3828_v40, %v3824_v14  ;;  %v3745_v49 = vsel %vm2391_vm10, %v3744_v29, %v3740_v6  ;;  %v1929_v40 = vld [vmem:[%s8013_s1 + $0x460] sm:$0xff]  ;;  %v1951_v29 = vld [vmem:[%s8013_s1 + $0x510] sm:$0xff] }
 0x2cb   :  { %v3838_v53 = vrot.slane %v1737_v17, %v5426_v57  ;;  %v3834_v15 = vsel %vm2405_vm12, %v3833_v21, %v3829_v45  ;;  %v3750_v47 = vsel %vm2398_vm11, %v3749_v3, %v3745_v49  ;;  %v4928_v14 = vpack.c.bf16 %v1930_v31, %v1929_v40  ;;  %v1931_v45 = vld [vmem:[%s8013_s1 + $0x470] sm:$0xff]  ;;  %v1932_v3 = vld [vmem:[%s8013_s1 + $0x478] sm:$0xff]  ;;  %v1954_v49 = vld [vmem:[%s8013_s1 + $0x528] sm:$0xff] }
 0x2cc   :  { %v1288_v48 = vpop.xlane.xlu1 %1287  ;;  %v1237_v9 = vpop.xlane.xlu0 %1236  ;;  %4913 = vmatpush3.bf16.msra.mxu0 %v4912_v24  ;;  %v1955_v40 = vld [vmem:[%s8013_s1 + $0x530] sm:$0xff]  ;;  %v1956_v31 = vld [vmem:[%s8013_s1 + $0x538] sm:$0xff] }
 0x2cd   :  { %v1738_v44 = vmul.f32 0.25, %v1288_v48  ;;  %4915 = vmatprep.subr.bf16.mxu0 %v4914_v36  ;;  %v1721_v60 = vmul.f32 0.25, %v1237_v9  ;;  %v3754_v36 = vrot.slane %v1720_v58, %v5432_v61  ;;  %v3839_v56 = vsel %vm2412_vm13, %v3838_v53, %v3834_v15  ;;  %v1950_v9 = vld [vmem:[%s8013_s1 + $0x508] sm:$0xff] }
 0x2cf   :  { %v3843_v12 = vrot.slane %v1738_v44, %v5451_v13  ;;  %v3759_v50 = vrot.slane %v1721_v60, %v5426_v57  ;;  %v3755_v44 = vsel %vm2405_vm12, %v3754_v36, %v3750_v47  ;;  %v4935_v60 = vpack.c.bf16 %v1950_v9, %v1949_v19 }
 0x2d0   :  { %v1291_v20 = vpop.xlane.xlu1 %1290  ;;  %v1240_v5 = vpop.xlane.xlu0 %1239  ;;  %4917 = vmatpush3.bf16.msra.mxu0 %v4916_v8  ;;  %v4924_v8 = vpack.c.bf16 %v1928_v42, %v1927_v4 }
 0x2d1   :  { %v1739_v24 = vmul.f32 0.25, %v1291_v20  ;;  %v1722_v32 = vmul.f32 0.25, %v1240_v5  ;;  %4919 = vmatprep.subr.bf16.mxu0 %v4918_v7  ;;  %v3844_v17 = vsel %vm2419_vm14, %v3843_v12, %v3839_v56  ;;  %v4926_v7 = vpack.c.bf16 %v1946_v63, %v1945_v35  ;;  %v1952_v5 = vld [vmem:[%s8013_s1 + $0x518] sm:$0xff] }
 0x2d2   :  { %v3760_v22 = vsel %vm2412_vm13, %v3759_v50, %v3755_v44  ;;  %v4938_v35 = vpack.c.bf16 %v1952_v5, %v1951_v29  ;;  %v4932_v63 = vpack.c.bf16 %v1932_v3, %v1931_v45  ;;  %v1959_v3 = vld [vmem:[%s8013_s1 + $0x550] sm:$0xff] }
 0x2d3   :  { %v3848_v39 = vrot.slane %v1739_v24, %v5446_v10  ;;  %v3764_v11 = vrot.slane %v1722_v32, %v5451_v13  ;;  %v8047_v24 = vld [vmem:[#allocation11_spill] sm:$0xff] }
 0x2d4   :  { %v1342_v54 = vpop.xlane.xlu1 %1341  ;;  %v1243_v62 = vpop.xlane.xlu0 %1242  ;;  %4921 = vmatpush3.bf16.msra.mxu0 %v4920_v55  ;;  %v8046_v55 = vld [vmem:[#allocation12_spill] sm:$0xff] }
 0x2d5   :  { %v1723_v52 = vmul.f32 0.25, %v1243_v62  ;;  %v3849_v48 = vsel %vm2426_vm15, %v3848_v39, %v3844_v17  ;;  %4923 = vmatprep.subr.bf16.mxu0 %v4922_v2  ;;  %v1756_v21 = vmul.f32 0.25, %v1342_v54  ;;  %v3765_v16 = vsel %vm2419_vm14, %v3764_v11, %v3760_v22  ;;  %v1953_v39 = vld [vmem:[%s8013_s1 + $0x520] sm:$0xff] }
 0x2d6   :  { %v4095_v30 = vsel %vm8043_vm0, %v3849_v48, %v8046_v55  ;;  %v4930_v2 = vpack.c.bf16 %v1948_v27, %v1947_v25  ;;  %vm4987_vm0 = vmmov 0   ;;  %v4988_v11 = vmov 0.0  }
 0x2d7   :  { %v3769_v58 = vrot.slane %v1723_v52, %v5446_v10  ;;  %4384 = vmatprep.mubr.f32.mxu1 %v4095_v30  ;;  %v3932_v4 = vrot.slane %v1756_v21, %v8037_v34  ;;  %v4941_v47 = vpack.c.bf16 %v1954_v49, %v1953_v39  ;;  %v4944_v27 = vpack.c.bf16 %v1956_v31, %v1955_v40 }
 0x2d8   :  { %v1294_v26 = vpop.xlane.xlu1 %1293  ;;  %v1345_v53 = vpop.xlane.xlu0 %1344  ;;  %4925 = vmatpush3.bf16.msra.mxu0 %v4924_v8 }
 0x2d9   :  { %v1757_v12 = vmul.f32 0.25, %v1345_v53  ;;  %v3770_v20 = vsel %vm2426_vm15, %v3769_v58, %v3765_v16  ;;  %4927 = vmatprep.subr.bf16.mxu0 %v4926_v7  ;;  %v1740_v42 = vmul.f32 0.25, %v1294_v26  ;;  %v1957_v26 = vld [vmem:[%s8013_s1 + $0x540] sm:$0xff]  ;;  %v1958_v53 = vld [vmem:[%s8013_s1 + $0x548] sm:$0xff] }
 0x2da   :  { %v4094_v32 = vsel %vm8048_vm3, %v3770_v20, %v8047_v24  ;;  %vm8049_vm3 = vcmask 261312   ;;  %v4947_v20 = vpack.c.bf16 %v1958_v53, %v1957_v26  ;;  %v1960_v24 = vld [vmem:[%s8013_s1 + $0x558] sm:$0xff] }
 0x2db   :  { %v3936_v33 = vrot.slane %v1757_v12, %v8038_v28  ;;  %4385 = vmatmul.mubr.f32.vlgmr.msra.gmra.mrb[2].mxu1 %v4094_v32  ;;  %v3853_v54 = vrot.slane %v1740_v42, %v8037_v34 }
 0x2dc   :  { %v1348_v15 = vpop.xlane.xlu1 %1347  ;;  %v1297_v36 = vpop.xlane.xlu0 %1296  ;;  %4936 = vmatpush3.bf16.msra.mxu1 %v4935_v60  ;;  %4929 = vmatpush3.bf16.msra.mxu0 %v4928_v14 }
 0x2dd   :  { %v3937_v6 = vsel %vm2328_vm1, %v3936_v33, %v3932_v4  ;;  %v1758_v56 = vmul.f32 0.25, %v1348_v15  ;;  %v1741_v50 = vmul.f32 0.25, %v1297_v36  ;;  %4937 = vmatprep.subr.bf16.mxu1 %v4986_v59  ;;  %4931 = vmatprep.subr.bf16.mxu0 %v4930_v2  ;;  %v4950_v33 = vpack.c.bf16 %v1960_v24, %v1959_v3 }
 0x2de   :  { %4771 = vmatprep.mubr.msk.f32.mxu1 %vm4987_vm0, %v4988_v11  ;;  %vm8050_vm0 = vmmov %vm8049_vm3  ;;  %v1963_v11 = vld [vmem:[%s8013_s1 + $0x570] sm:$0xff] }
 0x2df   :  { %v3941_v62 = vrot.slane %v1758_v56, %v8039_v41  ;;  %v3857_v17 = vrot.slane %v1741_v50, %v8038_v28 }
 0x2e0   :  { %v1351_v8 = vpop.xlane.xlu1 %1350  ;;  %v1300_v19 = vpop.xlane.xlu0 %1299  ;;  %4939 = vmatpush3.bf16.msra.mxu1 %v4938_v35  ;;  %4933 = vmatpush3.bf16.msra.mxu0 %v4932_v63  ;;  %v1961_v35 = vld [vmem:[%s8013_s1 + $0x560] sm:$0xff]  ;;  %v1962_v63 = vld [vmem:[%s8013_s1 + $0x568] sm:$0xff] }
 0x2e1   :  { %v3942_v52 = vsel %vm2335_vm2, %v3941_v62, %v3937_v6  ;;  %v3858_v48 = vsel %vm2328_vm1, %v3857_v17, %v3853_v54  ;;  %v1759_v9 = vmul.f32 0.25, %v1351_v8  ;;  %v1742_v7 = vmul.f32 0.25, %v1300_v19  ;;  %4940 = vmatprep.subr.bf16.mxu1 %v4986_v59  ;;  %v1964_v54 = vld [vmem:[%s8013_s1 + $0x578] sm:$0xff] }
 0x2e2   :  { %v4953_v39 = vpack.c.bf16 %v1962_v63, %v1961_v35  ;;  %v4956_v8 = vpack.c.bf16 %v1964_v54, %v1963_v11 }
 0x2e3   :  { %v3946_v44 = vrot.slane %v1759_v9, %v8040_v37  ;;  %v3862_v55 = vrot.slane %v1742_v7, %v8039_v41 }
 0x2e4   :  { %v1354_v30 = vpop.xlane.xlu1 %1353  ;;  %v1303_v25 = vpop.xlane.xlu0 %1302  ;;  %4942 = vmatpush3.bf16.msra.mxu1 %v4941_v47 }
 0x2e5   :  { %v3947_v22 = vsel %vm8049_vm3, %v3946_v44, %v3942_v52  ;;  %v3863_v21 = vsel %vm2335_vm2, %v3862_v55, %v3858_v48  ;;  %v1760_v58 = vmul.f32 0.25, %v1354_v30  ;;  %v1743_v16 = vmul.f32 0.25, %v1303_v25  ;;  %4943 = vmatprep.subr.bf16.mxu1 %v4986_v59  ;;  %vm8052_vm3 = vmmov %vm8050_vm0 }
 0x2e7   :  { %v3951_v60 = vrot.slane %v1760_v58, %v5350_v51  ;;  %v3867_v14 = vrot.slane %v1743_v16, %v8040_v37 }
 0x2e8   :  { %v7807_v29 = vpop.xlane.xlu1 %1356  ;;  %v1306_v12 = vpop.xlane.xlu0 %1305  ;;  %4945 = vmatpush3.bf16.msra.mxu1 %v4944_v27 }
 0x2e9   :  { %v7810_v5 = vsel %vm2349_vm4, %v3951_v60, %v3947_v22  ;;  %v3868_v2 = vsel %vm8050_vm0, %v3867_v14, %v3863_v21  ;;  %v1744_v45 = vmul.f32 0.25, %v1306_v12  ;;  %4946 = vmatprep.subr.bf16.mxu1 %v4986_v59  ;;  %v1761_v63 = vmul.f32 0.25, %v7807_v29 }
 0x2eb   :  { %v3872_v32 = vrot.slane %v1744_v45, %v5350_v51 }
 0x2ec   :  { %v1360_v4 = vpop.xlane.xlu1 %1359  ;;  %v1309_v42 = vpop.xlane.xlu0 %1308  ;;  %4948 = vmatpush3.bf16.msra.mxu1 %v4947_v20 }
 0x2ed   :  { %v3873_v15 = vsel %vm2349_vm4, %v3872_v32, %v3868_v2  ;;  %v1745_v36 = vmul.f32 0.25, %v1309_v42  ;;  %4949 = vmatprep.subr.bf16.mxu1 %v4986_v59 }
 0x2ef   :  { %v3877_v6 = vrot.slane %v1745_v36, %v5343_v46 }
 0x2f0   :  { %v1363_v56 = vpop.xlane.xlu1 %1362  ;;  %v7830_v50 = vpop.xlane.xlu0 %1311  ;;  %4951 = vmatpush3.bf16.msra.mxu1 %v4950_v33 }
 0x2f1   :  { %v7833_v49 = vsel %vm2356_vm5, %v3877_v6, %v3873_v15  ;;  %4952 = vmatprep.subr.bf16.mxu1 %v4986_v59  ;;  %v1762_v6 = vmul.f32 0.25, %v1360_v4  ;;  %v1763_v11 = vmul.f32 0.25, %v1363_v56 }
 0x2f4   :  { %v1393_v62 = vpop.xlane.xlu1 %1392  ;;  %v1390_v17 = vpop.xlane.xlu0 %1389  ;;  %4954 = vmatpush3.bf16.msra.mxu1 %v4953_v39 }
 0x2f5   :  { %v1773_v19 = vmul.f32 0.25, %v1393_v62  ;;  %v1772_v47 = vmul.f32 0.25, %v1390_v17  ;;  %4955 = vmatprep.subr.bf16.mxu1 %v4986_v59  ;;  %v8051_v59 = vld [vmem:[#allocation15_spill] sm:$0xff]  ;;  %v3956_v17 = vrot.slane %v1761_v63, %v5343_v46 }
 0x2f7   :  { %v4015_v52 = vrot.slane %v1773_v19, %v8038_v28  ;;  %v4011_v48 = vrot.slane %v1772_v47, %v8037_v34  ;;  %v3961_v19 = vrot.slane %v1762_v6, %v5368_v1  ;;  %v3957_v56 = vsel %vm2356_vm5, %v3956_v17, %v7810_v5 }
 0x2f8   :  { %v1366_v9 = vpop.xlane.xlu1 %1365  ;;  %v1315_v7 = vpop.xlane.xlu0 %1314  ;;  %4957 = vmatpush3.bf16.msra.mxu1 %v4956_v8 }
 0x2f9   :  { %v4016_v40 = vsel %vm2328_vm1, %v4015_v52, %v4011_v48  ;;  %v1764_v62 = vmul.f32 0.25, %v1366_v9  ;;  %v3966_v48 = vrot.slane %v1763_v11, %v5365_v0  ;;  %vm8054_vm1 = vcmask 1041409  }
 0x2fb   :  { %v3971_v29 = vrot.slane %v1764_v62, %v5392_v23 }
 0x2fc   :  { %v871_v31 = vpop.xlane.xlu1 %870  ;;  %v1396_v44 = vpop.xlane.xlu0 %1395 }
 0x2fd   :  { %v1599_v55 = vmul.f32 0.25, %v871_v31  ;;  %v1774_v30 = vmul.f32 0.25, %v1396_v44 }
 0x2ff   :  { %v3156_v25 = vrot.slane %v1599_v55, %v8040_v37  ;;  %v4020_v27 = vrot.slane %v1774_v30, %v8039_v41  ;;  %v3962_v55 = vsel %vm2363_vm6, %v3961_v19, %v3957_v56  ;;  %v1746_v30 = vmul.f32 0.25, %v7830_v50 }
 0x300   :  { %v1369_v22 = vpop.xlane.xlu1 %1368  ;;  %v1318_v21 = vpop.xlane.xlu0 %1317 }
 0x301   :  { %v7850_v28 = vsel %vm8052_vm3, %v3156_v25, %v8051_v59  ;;  %v7853_v34 = vsel %vm2335_vm2, %v4020_v27, %v4016_v40  ;;  %v1765_v8 = vmul.f32 0.25, %v1369_v22  ;;  %v3967_v59 = vsel %vm2370_vm7, %v3966_v48, %v3962_v55  ;;  %vm8056_vm2 = vmmov %vm8054_vm1 }
 0x302   :  { %v3972_v5 = vsel %vm2377_vm8, %v3971_v29, %v3967_v59  ;;  %v3882_v6 = vrot.slane %v1746_v30, %v5368_v1 }
 0x303   :  { %v3976_v44 = vrot.slane %v1765_v8, %v5386_v18 }
 0x304   :  { %v7855_v58 = vpop.xlane.xlu1 %873  ;;  %v7857_v16 = vpop.xlane.xlu0 %1398  ;;  %v3883_v59 = vsel %vm2363_vm6, %v3882_v6, %v7833_v49 }
 0x308   :  { %v1372_v26 = vpop.xlane.xlu1 %1371  ;;  %v1321_v53 = vpop.xlane.xlu0 %1320 }
 0x309   :  { %v1766_v47 = vmul.f32 0.25, %v1372_v26  ;;  %v1749_v62 = vmul.f32 0.25, %v1321_v53 }
 0x30b   :  { %v3981_v25 = vrot.slane %v1766_v47, %v5412_v43  ;;  %v3897_v30 = vrot.slane %v1749_v62, %v5386_v18 }
 0x30c   :  { %v7859_v60 = vpop.xlane.xlu1 %876  ;;  %v7861_v14 = vpop.xlane.xlu0 %1401 }
 0x310   :  { %v1375_v41 = vpop.xlane.xlu1 %1374  ;;  %v1324_v12 = vpop.xlane.xlu0 %1323 }
 0x311   :  { %v1767_v40 = vmul.f32 0.25, %v1375_v41 }
 0x313   :  { %v3986_v26 = vrot.slane %v1767_v40, %v5406_v38 }
 0x314   :  { %v7863_v20 = vpop.xlane.xlu1 %879  ;;  %v7865_v2 = vpop.xlane.xlu0 %1404 }
 0x317   :  { %v4579_v45 = vpop.f32.mrb[0].mxu0 }
 0x318   :  { %v4580_v3 = vpop.f32.mrb[1].mxu0  ;;  %v1378_v24 = vpop.xlane.xlu1 %1377 }
 0x319   :  { %v4581_v32 = vadd.f32 %v4580_v3, %v4579_v45  ;;  %v1327_v42 = vpop.xlane.xlu0 %1326  ;;  %v1768_v4 = vmul.f32 0.25, %v1378_v24  ;;  %v1747_v45 = vmul.f32 0.25, %v1315_v7  ;;  %v1748_v3 = vmul.f32 0.25, %v1318_v21 }
 0x31a   :  { %v1750_v7 = vmul.f32 0.25, %v1324_v12  ;;  %v1751_v56 = vmul.f32 0.25, %v1327_v42 }
 0x31b   :  { %v3991_v24 = vrot.slane %v1768_v4, %v5432_v61  ;;  %v3887_v40 = vrot.slane %v1747_v45, %v5365_v0  ;;  %v3892_v29 = vrot.slane %v1748_v3, %v5392_v23  ;;  %v8053_v3 = vld [vmem:[#allocation14_spill] sm:$0xff] }
 0x31c   :  { %v7867_v33 = vpop.xlane.xlu1 %882 }
 0x31d   :  { %v7869_v15 = vpop.xlane.xlu0 %1407 }
 0x320   :  { %v1381_v36 = vpop.xlane.xlu1 %1380 }
 0x321   :  { %v1330_v35 = vpop.xlane.xlu0 %1329  ;;  %v1769_v9 = vmul.f32 0.25, %v1381_v36  ;;  %v3977_v36 = vsel %vm2384_vm9, %v3976_v44, %v3972_v5 }
 0x322   :  { %v3982_v11 = vsel %vm2391_vm10, %v3981_v25, %v3977_v36  ;;  %v1752_v53 = vmul.f32 0.25, %v1330_v35  ;;  %v3907_v35 = vrot.slane %v1751_v56, %v5406_v38 }
 0x323   :  { %v3996_v50 = vrot.slane %v1769_v9, %v5426_v57  ;;  %v3987_v47 = vsel %vm2398_vm11, %v3986_v26, %v3982_v11  ;;  %v3902_v26 = vrot.slane %v1750_v7, %v5412_v43  ;;  %v1601_v7 = vmul.f32 0.25, %v7859_v60 }
 0x324   :  { %v7872_v39 = vpop.xlane.xlu1 %885  ;;  %v3992_v4 = vsel %vm2405_vm12, %v3991_v24, %v3987_v47  ;;  %v3912_v36 = vrot.slane %v1752_v53, %v5432_v61 }
 0x325   :  { %v7874_v54 = vpop.xlane.xlu0 %1410  ;;  %v3997_v44 = vsel %vm2412_vm13, %v3996_v50, %v3992_v4 }
 0x328   :  { %v1384_v52 = vpop.xlane.xlu1 %1383 }
 0x329   :  { %v1333_v31 = vpop.xlane.xlu0 %1332  ;;  %v1770_v27 = vmul.f32 0.25, %v1384_v52 }
 0x32a   :  { %v1753_v12 = vmul.f32 0.25, %v1333_v31 }
 0x32b   :  { %v4001_v17 = vrot.slane %v1770_v27, %v5451_v13 }
 0x32c   :  { %v7886_v22 = vpop.xlane.xlu1 %888  ;;  %v3917_v50 = vrot.slane %v1753_v12, %v5426_v57 }
 0x32d   :  { %v7890_v41 = vpop.xlane.xlu0 %1413  ;;  %v4002_v27 = vsel %vm2419_vm14, %v4001_v17, %v3997_v44  ;;  %v1600_v17 = vmul.f32 0.25, %v7855_v58  ;;  %v1777_v58 = vmul.f32 0.25, %v7865_v2 }
 0x32f   :  { %v4614_v63 = vpop.f32.mrb[0].mxu1  ;;  %v3161_v44 = vrot.slane %v1600_v17, %v5350_v51 }
 0x330   :  { %v4615_v8 = vpop.f32.mrb[1].mxu1  ;;  %v1387_v19 = vpop.xlane.xlu1 %1386 }
 0x331   :  { %v4616_v21 = vadd.f32 %v4615_v8, %v4614_v63  ;;  %v1771_v52 = vmul.f32 0.25, %v1387_v19  ;;  %v1336_v48 = vpop.xlane.xlu0 %1335  ;;  %v1775_v8 = vmul.f32 0.25, %v7857_v16 }
 0x332   :  { %v1754_v5 = vmul.f32 0.25, %v1336_v48  ;;  %v1602_v48 = vmul.f32 0.25, %v7863_v20  ;;  %v3166_v20 = vrot.slane %v1601_v7, %v5343_v46 }
 0x333   :  { %v7904_v9 = vadd.f32 %v4616_v21, %v4581_v32  ;;  %v4006_v55 = vrot.slane %v1771_v52, %v5446_v10  ;;  %v3888_v32 = vsel %vm2370_vm7, %v3887_v40, %v3883_v59  ;;  %v1776_v21 = vmul.f32 0.25, %v7861_v14 }
 0x334   :  { %v892_v25 = vpop.xlane.xlu1 %891  ;;  %v3893_v31 = vsel %vm2377_vm8, %v3892_v29, %v3888_v32  ;;  %v3922_v11 = vrot.slane %v1754_v5, %v5451_v13  ;;  %v4025_v60 = vrot.slane %v1775_v8, %v8040_v37  ;;  %v1603_v14 = vmul.f32 0.25, %v7867_v33 }
 0x335   :  { %v1417_v42 = vpop.xlane.xlu0 %1416  ;;  %v4007_v45 = vsel %vm2426_vm15, %v4006_v55, %v4002_v27  ;;  %v3898_v49 = vsel %vm2384_vm9, %v3897_v30, %v3893_v31  ;;  %v4030_v55 = vrot.slane %v1776_v21, %v5350_v51  ;;  %v8055_v30 = vld [vmem:[#allocation13_spill] sm:$0xff]  ;;  %v3171_v2 = vrot.slane %v1602_v48, %v5368_v1 }
 0x336   :  { %v4097_v24 = vsel %vm8054_vm1, %v4007_v45, %v8053_v3  ;;  %v3903_v6 = vsel %vm2391_vm10, %v3902_v26, %v3898_v49  ;;  %v1778_v27 = vmul.f32 0.25, %v7869_v15  ;;  %v4035_v26 = vrot.slane %v1777_v58, %v5343_v46 }
 0x337   :  { %4454 = vmatprep.mubr.f32.mxu0 %v4097_v24  ;;  %v3908_v19 = vsel %vm2398_vm11, %v3907_v35, %v3903_v6  ;;  %v1779_v37 = vmul.f32 0.25, %v7874_v54  ;;  %v3162_v5 = vsel %vm2349_vm4, %v3161_v44, %v7850_v28  ;;  %v4026_v51 = vsel %vm8050_vm0, %v4025_v60, %v7853_v34 }
 0x338   :  { %v1420_v63 = vpop.xlane.xlu1 %1419  ;;  %v3913_v52 = vsel %vm2405_vm12, %v3912_v36, %v3908_v19  ;;  %v3176_v45 = vrot.slane %v1603_v14, %v5365_v0  ;;  %v1780_v32 = vmul.f32 0.25, %v7890_v41  ;;  %v3167_v35 = vsel %vm2356_vm5, %v3166_v20, %v3162_v5 }
 0x339   :  { %v1339_v62 = vpop.xlane.xlu0 %1338  ;;  %v3918_v40 = vsel %vm2412_vm13, %v3917_v50, %v3913_v52  ;;  %v4031_v15 = vsel %vm2349_vm4, %v4030_v55, %v4026_v51  ;;  %v1604_v3 = vmul.f32 0.25, %v7872_v39  ;;  %v1781_v46 = vmul.f32 0.25, %v1417_v42  ;;  %vm8057_vm4 = vmmov %vm8054_vm1 }
 0x33a   :  { %v1755_v47 = vmul.f32 0.25, %v1339_v62  ;;  %v3923_v16 = vsel %vm2419_vm14, %v3922_v11, %v3918_v40  ;;  %v3172_v54 = vsel %vm2363_vm6, %v3171_v2, %v3167_v35  ;;  %v4040_v24 = vrot.slane %v1778_v27, %v5368_v1 }
 0x33b   :  { %v1605_v28 = vmul.f32 0.25, %v7886_v22  ;;  %v1782_v31 = vmul.f32 0.25, %v1420_v63  ;;  %v4036_v34 = vsel %vm2356_vm5, %v4035_v26, %v4031_v15  ;;  %v4045_v49 = vrot.slane %v1779_v37, %v5365_v0  ;;  %v4546_v15 = vld [vmem:[%s8014_s2] ss:$0 sm:$0xff]  ;;  %s4962_s2 = scalar_lea.vmem %s4539_s13, 32 }
 0x33c   :  { %v3927_v29 = vrot.slane %v1755_v47, %v5446_v10  ;;  %v1423_v4 = vpop.xlane.xlu1 %1422  ;;  %v1606_v41 = vmul.f32 0.25, %v892_v25  ;;  %v3177_v11 = vsel %vm2370_vm7, %v3176_v45, %v3172_v54  ;;  %v4050_v39 = vrot.slane %v1780_v32, %v5392_v23  ;;  %26 = vst [vmem:[#allocation2] sm:$0x3] %v4546_v15  ;;  %p4963_p0 = scmp.ne.s32.totalorder %s4539_s13, %s4962_s2  ;;  %p4968_p2 = scmp.lt.s32.totalorder %s4962_s2, %s4962_s2 }
 0x33d   :  { %v895_v56 = vpop.xlane.xlu0 %894  ;;  %v1783_v50 = vmul.f32 0.25, %v1423_v4  ;;  %v3181_v17 = vrot.slane %v1604_v3, %v5392_v23  ;;  %v4055_v1 = vrot.slane %v1781_v46, %v5386_v18  ;;  %v4041_v8 = vsel %vm2363_vm6, %v4040_v24, %v4036_v34 }
 0x33e   :  { %v3928_v53 = vsel %vm2426_vm15, %v3927_v29, %v3923_v16  ;;  %v1607_v42 = vmul.f32 0.25, %v895_v56  ;;  %v3186_v19 = vrot.slane %v1605_v28, %v5386_v18  ;;  %v4060_v0 = vrot.slane %v1782_v31, %v5412_v43  ;;  %p4969_p3 = por %p4968_p2, %p4967_p1 }
 0x33f   :  { %v4096_v12 = vsel %vm8056_vm2, %v3928_v53, %v8055_v30  ;;  %v4046_v7 = vsel %vm2370_vm7, %v4045_v49, %v4041_v8  ;;  %v3191_v21 = vrot.slane %v1606_v41, %v5412_v43  ;;  %v4065_v52 = vrot.slane %v1783_v50, %v5406_v38 }
 0x340   :  { %4455 = vmatmul.mubr.f32.vlgmr.msra.gmra.mrb[4].mxu0 %v4096_v12  ;;  %v1426_v59 = vpop.xlane.xlu1 %1425  ;;  %v4051_v40 = vsel %vm2377_vm8, %v4050_v39, %v4046_v7  ;;  %v3196_v29 = vrot.slane %v1607_v42, %v5406_v38  ;;  %v3182_v18 = vsel %vm2377_vm8, %v3181_v17, %v3177_v11  ;;  %p4970_p4 = pnand %p4969_p3, %p4963_p0 }
 0x341   :  { %v898_v33 = vpop.xlane.xlu0 %897  ;;  %v1784_v62 = vmul.f32 0.25, %v1426_v59  ;;  %v4056_v16 = vsel %vm2384_vm9, %v4055_v1, %v4051_v40  ;;  %v3187_v43 = vsel %vm2384_vm9, %v3186_v19, %v3182_v18 }
 0x342   :  { %v1608_v22 = vmul.f32 0.25, %v898_v33  ;;  %v4061_v60 = vsel %vm2391_vm10, %v4060_v0, %v4056_v16  ;;  %v3192_v20 = vsel %vm2391_vm10, %v3191_v21, %v3187_v43 }
 0x343   :  { %v4070_v4 = vrot.slane %v1784_v62, %v5432_v61  ;;  %v4066_v55 = vsel %vm2398_vm11, %v4065_v52, %v4061_v60 }
 0x344   :  { %v1429_v36 = vpop.xlane.xlu1 %1428  ;;  %v3201_v56 = vrot.slane %v1608_v22, %v5432_v61  ;;  %v3197_v61 = vsel %vm2398_vm11, %v3196_v29, %v3192_v20 }
 0x345   :  { %v901_v6 = vpop.xlane.xlu0 %900  ;;  %v1785_v63 = vmul.f32 0.25, %v1429_v36  ;;  %v4071_v27 = vsel %vm2405_vm12, %v4070_v4, %v4066_v55 }
 0x346   :  { %v1609_v25 = vmul.f32 0.25, %v901_v6  ;;  %v3202_v26 = vsel %vm2405_vm12, %v3201_v56, %v3197_v61  ;;  %v1788_v6 = vld [vmem:[#allocation2] sm:$0x3] }
 0x347   :  { %v4075_v44 = vrot.slane %v1785_v63, %v5426_v57 }
 0x348   :  { %v1432_v47 = vpop.xlane.xlu1 %1431  ;;  %v3206_v14 = vrot.slane %v1609_v25, %v5426_v57 }
 0x349   :  { %v1786_v48 = vmul.f32 0.25, %v1432_v47  ;;  %v904_v23 = vpop.xlane.xlu0 %903  ;;  %v4076_v57 = vsel %vm2412_vm13, %v4075_v44, %v4071_v27 }
 0x34a   :  { %v1610_v58 = vmul.f32 0.25, %v904_v23  ;;  %v3207_v33 = vsel %vm2412_vm13, %v3206_v14, %v3202_v26 }
 0x34b   :  { %v4080_v53 = vrot.slane %v1786_v48, %v5451_v13 }
 0x34c   :  { %v1435_v38 = vpop.xlane.xlu1 %1434  ;;  %v3211_v30 = vrot.slane %v1610_v58, %v5451_v13 }
 0x34d   :  { %v1787_v12 = vmul.f32 0.25, %v1435_v38  ;;  %v907_v2 = vpop.xlane.xlu0 %906  ;;  %v4081_v5 = vsel %vm2419_vm14, %v4080_v53, %v4076_v57 }
 0x34e   :  { %v1611_v59 = vmul.f32 0.25, %v907_v2  ;;  %v3212_v13 = vsel %vm2419_vm14, %v3211_v30, %v3207_v33 }
 0x34f   :  { %v4085_v37 = vrot.slane %v1787_v12, %v5446_v10 }
 0x350   :  { %v3216_v51 = vrot.slane %v1611_v59, %v5446_v10 }
 0x351   :  { %v4086_v45 = vsel %vm2426_vm15, %v4085_v37, %v4081_v5 }
 0x352   :  { %v3217_v32 = vsel %vm2426_vm15, %v3216_v51, %v3212_v13 }
 0x353   :  { %v4098_v35 = vsel %vm8057_vm4, %v4086_v45, %v3217_v32 }
 0x354   :  { %4772 = vmatmul.mubr.f32.vlgmr.msra.gmra.mrb[4].mxu1 %v4098_v35 }
 0x396   :  { %v4649_v3 = vpop.f32.mrb[2].mxu0 }
 0x397   :  { %v4650_v46 = vpop.f32.mrb[3].mxu0 }
 0x398   :  { %v4651_v54 = vadd.f32 %v4650_v46, %v4649_v3 }
 0x39a   :  { %v4317_v24 = vadd.f32 %v4651_v54, %v7904_v9 }
 0x3ae   :  { %v4684_v10 = vpop.f32.mrb[2].mxu1 }
 0x3af   :  { %v4685_v28 = vpop.f32.mrb[3].mxu1 }
 0x3b0   :  { %v4686_v31 = vadd.f32 %v4685_v28, %v4684_v10 }
 0x3b2   :  { %v4387_v36 = vadd.f32 %v4686_v31, %v4317_v24 }
 0x413   :  { %v4719_v34 = vpop.f32.mrb[4].mxu0 }
 0x414   :  { %v4720_v49 = vpop.f32.mrb[5].mxu0 }
 0x415   :  { %v4721_v41 = vadd.f32 %v4720_v49, %v4719_v34 }
 0x417   :  { %v4457_v50 = vadd.f32 %v4721_v41, %v4387_v36 }
 0x427   :  { %v4526_v11 = vpop.f32.mrb[4].mxu1 }
 0x428   :  { %v4527_v39 = vadd.f32 %v4526_v11, %v4457_v50  ;;  %v4773_v42 = vpop.f32.mrb[5].mxu1 }
 0x42a   :  { %v4530_v62 = vadd.f32 %v4527_v39, %v1788_v6 }
 0x42c   :  { %4531 = vst [vmem:[#allocation2] sm:$0x3] %v4530_v62 }
 0x42d   :  { %4973 = shalt.err (!%p4970_p4)
}
 0x42e   :  { %s4974_s16 = scalar_lea.hbm %s8015_s3, 32 }
 0x42f   :  { %p4975_p5 = scmp.ne.s32.totalorder %s8015_s3, %s4974_s16  ;;  %p4978_p6 = scmp.lt.u32.totalorder %s4974_s16, %s8015_s3 }
 0x431   :  { %p4980_p7 = pnand %p4978_p6, %p4975_p5 }
 0x433   :  { %4983 = shalt.err (!%p4980_p7)
}
 0x434   :  { %4541 = dma.vmem_to_hbm [thread:$0]  %s4539_s13, 32, %s8015_s3, [#allocation3]  }
 0x435   :  { %4984 = dma.done.wait [#allocation3], 32  }
 0x436   :  { %4985 = vsyncadd [#allocation3], 4294967264 }
 0x437   :  { %4545 = vsyncpa [#allocation3], 1 }

</bundles_post_ra>
